<compile_context>
chip_gen: v7x
topology: tpu7x:2x2x1
jax: 0.10.0
libtpu: 0.0.40
codegen_flags: <defaults>
</compile_context>

<pallas_src>
import functools

import jax
import jax.numpy as jnp
from jax import lax
from jax.experimental import pallas as pl
from jax.experimental.pallas import tpu as pltpu


def _round_up(x, m):
    return (x + m - 1) // m * m


def _fire_kernel(x_ref, mask_ref, wsq_ref, bsq_ref, wc_ref, bc_ref, w3_ref,
                 o_ref, *, guard, m_out, ce1, tap_offsets, compute_dtype):
    # x_ref    : (M_big, Cin)   pixels in padded-flat layout + guard rows
    # mask_ref : (M_big, 1)     1.0 at real pixels, 0.0 at halo / guard rows
    # wsq_ref  : (Cin, Csq)     squeeze 1x1 weights
    # bsq_ref  : (1, Csq)
    # wc_ref   : (Csq, Cout)    [expand1x1 | expand3x3 center tap] fused
    # bc_ref   : (1, Cout)      [b1 | b3]
    # w3_ref   : (8, Csq, Ce3)  the 8 non-center 3x3 taps
    # o_ref    : (M_out, Cout)

    # ---- squeeze: 1x1 conv + ReLU, zeroed at padding positions -----------
    s = jnp.dot(x_ref[...], wsq_ref[...], preferred_element_type=jnp.float32)
    s = jnp.maximum(s + bsq_ref[...], 0.0) * mask_ref[...]
    s = s.astype(compute_dtype)                          # (M_big, Csq)

    # ---- expand3x3, non-center taps: shifted-row matmuls, accumulate -----
    e3x = None
    for t, d in enumerate(tap_offsets):                  # static unroll (8)
        tap = s[guard + d:guard + d + m_out]             # static row shift
        contrib = jnp.dot(tap, w3_ref[t], preferred_element_type=jnp.float32)
        e3x = contrib if e3x is None else e3x + contrib  # (M_out, Ce3)

    # ---- expand1x1 fused with the 3x3 center tap: one wide matmul --------
    sc = s[guard:guard + m_out]                          # 8-aligned slice
    acc = jnp.dot(sc, wc_ref[...], preferred_element_type=jnp.float32)
    acc = acc + bc_ref[...]                              # (M_out, Cout) f32

    # ---- bias + ReLU, write straight into the output columns -------------
    o_ref[:, :ce1] = jnp.maximum(acc[:, :ce1], 0.0).astype(o_ref.dtype)
    o_ref[:, ce1:] = jnp.maximum(acc[:, ce1:] + e3x, 0.0).astype(o_ref.dtype)


def fire_forward(x_nchw, params, *, compute_dtype=jnp.bfloat16):
    """x_nchw: (N, Cin, H, W) float32.  Returns (N, Ce1+Ce3, H, W) float32."""
    wsq, bsq, w1, b1, w3, b3 = params
    N, Cin, H, W = x_nchw.shape
    Csq = wsq.shape[0]
    Ce1 = w1.shape[0]
    Ce3 = w3.shape[0]
    Cout = Ce1 + Ce3

    HP, WP = H + 2, W + 2             # spatial dims incl. 3x3 halo
    M = HP * WP                       # padded-flat rows per image
    G = _round_up(WP + 1, 8)          # 8-aligned guard rows above/below
    M_out = _round_up(M, 8)           # rows computed / stored per image
    M_big = M_out + 2 * G             # squeeze-activation rows per image

    # ---- input: NCHW -> NHWC -> zero-pad halo -> flatten -> guard rows ---
    x = jnp.transpose(x_nchw, (0, 2, 3, 1))                     # (N,H,W,Cin)
    x = jnp.pad(x, ((0, 0), (1, 1), (1, 1), (0, 0)))            # (N,HP,WP,Cin)
    x = x.reshape(N, M, Cin)
    x = jnp.pad(x, ((0, 0), (G, M_big - M - G), (0, 0)))        # (N,M_big,Cin)
    x = x.reshape(N * M_big, Cin).astype(compute_dtype)

    # ---- mask of real pixels in the padded-flat domain -------------------
    hh = jnp.arange(HP)[:, None]
    ww = jnp.arange(WP)[None, :]
    interior = (hh >= 1) & (hh <= H) & (ww >= 1) & (ww <= W)
    mask = interior.reshape(M).astype(jnp.float32)
    mask = jnp.pad(mask, (G, M_big - M - G)).reshape(M_big, 1)

    # ---- weights: matmul layouts; fuse expand1x1 with 3x3 center tap -----
    wsq_t = jnp.transpose(wsq.reshape(Csq, Cin)).astype(compute_dtype)  # (Cin,Csq)
    w1_t = jnp.transpose(w1.reshape(Ce1, Csq))                          # (Csq,Ce1)
    w3_t = jnp.transpose(w3, (2, 3, 1, 0))                              # (3,3,Csq,Ce3)
    w_center = jnp.concatenate([w1_t, w3_t[1, 1]], axis=1).astype(compute_dtype)
    taps = [(kh, kw) for kh in range(3) for kw in range(3) if (kh, kw) != (1, 1)]
    w3_taps = jnp.stack([w3_t[kh, kw] for kh, kw in taps]).astype(compute_dtype)
    tap_offsets = tuple((kh - 1) * WP + (kw - 1) for kh, kw in taps)
    bsq2 = bsq.reshape(1, Csq).astype(jnp.float32)
    bcat = jnp.concatenate([b1, b3]).reshape(1, Cout).astype(jnp.float32)

    kernel = functools.partial(
        _fire_kernel, guard=G, m_out=M_out, ce1=Ce1,
        tap_offsets=tap_offsets, compute_dtype=compute_dtype)

    out_flat = pl.pallas_call(
        kernel,
        out_shape=jax.ShapeDtypeStruct((N * M_out, Cout), jnp.float32),
        grid_spec=pltpu.PrefetchScalarGridSpec(
            num_scalar_prefetch=0,
            grid=(N,),
            in_specs=[
                pl.BlockSpec((M_big, Cin), lambda n: (n, 0)),
                pl.BlockSpec((M_big, 1), lambda n: (0, 0)),
                pl.BlockSpec((Cin, Csq), lambda n: (0, 0)),
                pl.BlockSpec((1, Csq), lambda n: (0, 0)),
                pl.BlockSpec((Csq, Cout), lambda n: (0, 0)),
                pl.BlockSpec((1, Cout), lambda n: (0, 0)),
                pl.BlockSpec((8, Csq, Ce3), lambda n: (0, 0, 0)),
            ],
            out_specs=pl.BlockSpec((M_out, Cout), lambda n: (n, 0)),
        ),
        compiler_params=pltpu.CompilerParams(
            dimension_semantics=("parallel",)),
    )(x, mask, wsq_t, bsq2, w_center, bcat, w3_taps)

    # ---- back to NCHW: drop halo/guard rows, unflatten, transpose ---------
    out = out_flat.reshape(N, M_out, Cout)[:, :M, :]
    out = out.reshape(N, HP, WP, Cout)[:, 1:H + 1, 1:W + 1, :]
    return jnp.transpose(out, (0, 3, 1, 2))


def ref_fire(x_nchw, params):
    """Pure-JAX reference matching torch semantics (NCHW, OIHW)."""
    wsq, bsq, w1, b1, w3, b3 = params
    dn = ("NCHW", "OIHW", "NCHW")

    def conv(x, w, b, pad):
        y = lax.conv_general_dilated(x, w, window_strides=(1, 1),
                                     padding=pad, dimension_numbers=dn)
        return y + b.reshape(1, -1, 1, 1)

    s = jnp.maximum(conv(x_nchw, wsq, bsq, "VALID"), 0.0)
    e1 = jnp.maximum(conv(s, w1, b1, "VALID"), 0.0)
    e3 = jnp.maximum(conv(s, w3, b3, ((1, 1), (1, 1))), 0.0)
    return jnp.concatenate([e1, e3], axis=1)


def init_fire_params(key, inplanes, squeeze_planes, expand1x1_planes, expand3x3_planes):
    ks = jax.random.split(key, 6)
    wsq = jax.random.normal(ks[0], (squeeze_planes, inplanes, 1, 1), jnp.float32) * 0.1
    bsq = jax.random.normal(ks[1], (squeeze_planes,), jnp.float32) * 0.1
    w1 = jax.random.normal(ks[2], (expand1x1_planes, squeeze_planes, 1, 1), jnp.float32) * 0.1
    b1 = jax.random.normal(ks[3], (expand1x1_planes,), jnp.float32) * 0.1
    w3 = jax.random.normal(ks[4], (expand3x3_planes, squeeze_planes, 3, 3), jnp.float32) * 0.1
    b3 = jax.random.normal(ks[5], (expand3x3_planes,), jnp.float32) * 0.1
    return (wsq, bsq, w1, b1, w3, b3)


if __name__ == "__main__":
    # Fire(inplanes=16, squeeze=16, expand1x1=64, expand3x3=64):
    # Cout = 128 keeps the output block lane-dense (multiple of 128 lanes).
    N, Cin, H, W = 2, 16, 16, 16
    Csq, Ce1, Ce3 = 16, 64, 64

    key = jax.random.PRNGKey(0)
    kx, kp = jax.random.split(key)
    x = jax.random.normal(kx, (N, Cin, H, W), jnp.float32)
    params = init_fire_params(kp, Cin, Csq, Ce1, Ce3)

    ref = jax.block_until_ready(ref_fire(x, params))

    # 1) f32 feed: validates kernel structure tightly against the reference.
    out_f32 = jax.block_until_ready(
        fire_forward(x, params, compute_dtype=jnp.float32))
    assert out_f32.shape == (N, Ce1 + Ce3, H, W), out_f32.shape
    assert jnp.allclose(out_f32, ref, atol=1e-3, rtol=1e-3), \
        float(jnp.max(jnp.abs(out_f32 - ref)))

    # 2) Performance config: bf16 operand feeds (f32 accumulate) -> looser tol.
    out_bf16 = jax.block_until_ready(fire_forward(x, params))
    assert out_bf16.shape == (N, Ce1 + Ce3, H, W), out_bf16.shape
    assert jnp.allclose(out_bf16, ref, atol=5e-2, rtol=5e-2), \
        float(jnp.max(jnp.abs(out_bf16 - ref)))

    print("KERNEL_OK")
</pallas_src>

<mosaic_0001>
module attributes {stable_mosaic.version = 11 : i64} {
  func.func @_fire_kernel(%arg0: i32, %arg1: memref<376x16xf32, #tpu.memory_space<vmem>>, %arg2: memref<376x1xf32, #tpu.memory_space<vmem>>, %arg3: memref<16x16xf32, #tpu.memory_space<vmem>>, %arg4: memref<1x16xf32, #tpu.memory_space<vmem>>, %arg5: memref<16x128xf32, #tpu.memory_space<vmem>>, %arg6: memref<1x128xf32, #tpu.memory_space<vmem>>, %arg7: memref<8x16x64xf32, #tpu.memory_space<vmem>>, %arg8: memref<328x128xf32, #tpu.memory_space<vmem>>) attributes {dimension_semantics = [#tpu.dimension_semantics<parallel>], iteration_bounds = array<i64: 2>, scalar_prefetch = 0 : i64, scratch_operands = 0 : i64, tpu.core_type = #tpu.core_type<tc>, window_params = [{transform_indices = @transform_0, window_bounds = array<i64: 376, 16>}, {pipeline_mode = #tpu.pipeline_mode<synchronous>, transform_indices = @transform_1, window_bounds = array<i64: 376, 1>}, {pipeline_mode = #tpu.pipeline_mode<synchronous>, transform_indices = @transform_2, window_bounds = array<i64: 16, 16>}, {pipeline_mode = #tpu.pipeline_mode<synchronous>, transform_indices = @transform_3, window_bounds = array<i64: 1, 16>}, {pipeline_mode = #tpu.pipeline_mode<synchronous>, transform_indices = @transform_4, window_bounds = array<i64: 16, 128>}, {pipeline_mode = #tpu.pipeline_mode<synchronous>, transform_indices = @transform_5, window_bounds = array<i64: 1, 128>}, {pipeline_mode = #tpu.pipeline_mode<synchronous>, transform_indices = @transform_6, window_bounds = array<i64: 8, 16, 64>}, {transform_indices = @transform_7, window_bounds = array<i64: 328, 128>}]} {
    %c0 = arith.constant 0 : index
    %c0_0 = arith.constant 0 : index
    %0 = vector.load %arg1[%c0, %c0_0] : memref<376x16xf32, #tpu.memory_space<vmem>>, vector<376x16xf32>
    %c0_1 = arith.constant 0 : index
    %c0_2 = arith.constant 0 : index
    %1 = vector.load %arg3[%c0_1, %c0_2] : memref<16x16xf32, #tpu.memory_space<vmem>>, vector<16x16xf32>
    %cst = arith.constant dense<0.000000e+00> : vector<376x16xf32>
    %2 = tpu.matmul %0, %1, %cst {dimension_numbers = #tpu.dot_dimension_numbers<[1], [0], [0], [1], [0, 0, 1, 1], [], []>} : vector<376x16xf32>, vector<16x16xf32>, vector<376x16xf32> -> vector<376x16xf32>
    %c0_3 = arith.constant 0 : index
    %c0_4 = arith.constant 0 : index
    %3 = vector.load %arg4[%c0_3, %c0_4] : memref<1x16xf32, #tpu.memory_space<vmem>>, vector<1x16xf32>
    %4 = vector.broadcast %3 : vector<1x16xf32> to vector<376x16xf32>
    %5 = arith.addf %2, %4 : vector<376x16xf32>
    %cst_5 = arith.constant 0.000000e+00 : f32
    %6 = vector.broadcast %cst_5 : f32 to vector<376x16xf32>
    %7 = arith.maximumf %5, %6 : vector<376x16xf32>
    %c0_6 = arith.constant 0 : index
    %c0_7 = arith.constant 0 : index
    %8 = vector.load %arg2[%c0_6, %c0_7] : memref<376x1xf32, #tpu.memory_space<vmem>>, vector<376x1xf32>
    %9 = vector.broadcast %8 : vector<376x1xf32> to vector<376x16xf32>
    %10 = arith.mulf %7, %9 : vector<376x16xf32>
    %11 = vector.extract_strided_slice %10 {offsets = [5, 0], sizes = [328, 16], strides = [1, 1]} : vector<376x16xf32> to vector<328x16xf32>
    %c0_8 = arith.constant 0 : index
    %c0_9 = arith.constant 0 : index
    %c0_10 = arith.constant 0 : index
    %12 = vector.load %arg7[%c0_8, %c0_9, %c0_10] : memref<8x16x64xf32, #tpu.memory_space<vmem>>, vector<1x16x64xf32>
    %13 = vector.shape_cast %12 : vector<1x16x64xf32> to vector<16x64xf32>
    %cst_11 = arith.constant dense<0.000000e+00> : vector<328x64xf32>
    %14 = tpu.matmul %11, %13, %cst_11 {dimension_numbers = #tpu.dot_dimension_numbers<[1], [0], [0], [1], [0, 0, 1, 1], [], []>} : vector<328x16xf32>, vector<16x64xf32>, vector<328x64xf32> -> vector<328x64xf32>
    %15 = vector.extract_strided_slice %10 {offsets = [6, 0], sizes = [328, 16], strides = [1, 1]} : vector<376x16xf32> to vector<328x16xf32>
    %c1 = arith.constant 1 : index
    %c0_12 = arith.constant 0 : index
    %c0_13 = arith.constant 0 : index
    %16 = vector.load %arg7[%c1, %c0_12, %c0_13] : memref<8x16x64xf32, #tpu.memory_space<vmem>>, vector<1x16x64xf32>
    %17 = vector.shape_cast %16 : vector<1x16x64xf32> to vector<16x64xf32>
    %cst_14 = arith.constant dense<0.000000e+00> : vector<328x64xf32>
    %18 = tpu.matmul %15, %17, %cst_14 {dimension_numbers = #tpu.dot_dimension_numbers<[1], [0], [0], [1], [0, 0, 1, 1], [], []>} : vector<328x16xf32>, vector<16x64xf32>, vector<328x64xf32> -> vector<328x64xf32>
    %19 = arith.addf %14, %18 : vector<328x64xf32>
    %20 = vector.extract_strided_slice %10 {offsets = [7, 0], sizes = [328, 16], strides = [1, 1]} : vector<376x16xf32> to vector<328x16xf32>
    %c2 = arith.constant 2 : index
    %c0_15 = arith.constant 0 : index
    %c0_16 = arith.constant 0 : index
    %21 = vector.load %arg7[%c2, %c0_15, %c0_16] : memref<8x16x64xf32, #tpu.memory_space<vmem>>, vector<1x16x64xf32>
    %22 = vector.shape_cast %21 : vector<1x16x64xf32> to vector<16x64xf32>
    %cst_17 = arith.constant dense<0.000000e+00> : vector<328x64xf32>
    %23 = tpu.matmul %20, %22, %cst_17 {dimension_numbers = #tpu.dot_dimension_numbers<[1], [0], [0], [1], [0, 0, 1, 1], [], []>} : vector<328x16xf32>, vector<16x64xf32>, vector<328x64xf32> -> vector<328x64xf32>
    %24 = arith.addf %19, %23 : vector<328x64xf32>
    %25 = vector.extract_strided_slice %10 {offsets = [23, 0], sizes = [328, 16], strides = [1, 1]} : vector<376x16xf32> to vector<328x16xf32>
    %c3 = arith.constant 3 : index
    %c0_18 = arith.constant 0 : index
    %c0_19 = arith.constant 0 : index
    %26 = vector.load %arg7[%c3, %c0_18, %c0_19] : memref<8x16x64xf32, #tpu.memory_space<vmem>>, vector<1x16x64xf32>
    %27 = vector.shape_cast %26 : vector<1x16x64xf32> to vector<16x64xf32>
    %cst_20 = arith.constant dense<0.000000e+00> : vector<328x64xf32>
    %28 = tpu.matmul %25, %27, %cst_20 {dimension_numbers = #tpu.dot_dimension_numbers<[1], [0], [0], [1], [0, 0, 1, 1], [], []>} : vector<328x16xf32>, vector<16x64xf32>, vector<328x64xf32> -> vector<328x64xf32>
    %29 = arith.addf %24, %28 : vector<328x64xf32>
    %30 = vector.extract_strided_slice %10 {offsets = [25, 0], sizes = [328, 16], strides = [1, 1]} : vector<376x16xf32> to vector<328x16xf32>
    %c4 = arith.constant 4 : index
    %c0_21 = arith.constant 0 : index
    %c0_22 = arith.constant 0 : index
    %31 = vector.load %arg7[%c4, %c0_21, %c0_22] : memref<8x16x64xf32, #tpu.memory_space<vmem>>, vector<1x16x64xf32>
    %32 = vector.shape_cast %31 : vector<1x16x64xf32> to vector<16x64xf32>
    %cst_23 = arith.constant dense<0.000000e+00> : vector<328x64xf32>
    %33 = tpu.matmul %30, %32, %cst_23 {dimension_numbers = #tpu.dot_dimension_numbers<[1], [0], [0], [1], [0, 0, 1, 1], [], []>} : vector<328x16xf32>, vector<16x64xf32>, vector<328x64xf32> -> vector<328x64xf32>
    %34 = arith.addf %29, %33 : vector<328x64xf32>
    %35 = vector.extract_strided_slice %10 {offsets = [41, 0], sizes = [328, 16], strides = [1, 1]} : vector<376x16xf32> to vector<328x16xf32>
    %c5 = arith.constant 5 : index
    %c0_24 = arith.constant 0 : index
    %c0_25 = arith.constant 0 : index
    %36 = vector.load %arg7[%c5, %c0_24, %c0_25] : memref<8x16x64xf32, #tpu.memory_space<vmem>>, vector<1x16x64xf32>
    %37 = vector.shape_cast %36 : vector<1x16x64xf32> to vector<16x64xf32>
    %cst_26 = arith.constant dense<0.000000e+00> : vector<328x64xf32>
    %38 = tpu.matmul %35, %37, %cst_26 {dimension_numbers = #tpu.dot_dimension_numbers<[1], [0], [0], [1], [0, 0, 1, 1], [], []>} : vector<328x16xf32>, vector<16x64xf32>, vector<328x64xf32> -> vector<328x64xf32>
    %39 = arith.addf %34, %38 : vector<328x64xf32>
    %40 = vector.extract_strided_slice %10 {offsets = [42, 0], sizes = [328, 16], strides = [1, 1]} : vector<376x16xf32> to vector<328x16xf32>
    %c6 = arith.constant 6 : index
    %c0_27 = arith.constant 0 : index
    %c0_28 = arith.constant 0 : index
    %41 = vector.load %arg7[%c6, %c0_27, %c0_28] : memref<8x16x64xf32, #tpu.memory_space<vmem>>, vector<1x16x64xf32>
    %42 = vector.shape_cast %41 : vector<1x16x64xf32> to vector<16x64xf32>
    %cst_29 = arith.constant dense<0.000000e+00> : vector<328x64xf32>
    %43 = tpu.matmul %40, %42, %cst_29 {dimension_numbers = #tpu.dot_dimension_numbers<[1], [0], [0], [1], [0, 0, 1, 1], [], []>} : vector<328x16xf32>, vector<16x64xf32>, vector<328x64xf32> -> vector<328x64xf32>
    %44 = arith.addf %39, %43 : vector<328x64xf32>
    %45 = vector.extract_strided_slice %10 {offsets = [43, 0], sizes = [328, 16], strides = [1, 1]} : vector<376x16xf32> to vector<328x16xf32>
    %c7 = arith.constant 7 : index
    %c0_30 = arith.constant 0 : index
    %c0_31 = arith.constant 0 : index
    %46 = vector.load %arg7[%c7, %c0_30, %c0_31] : memref<8x16x64xf32, #tpu.memory_space<vmem>>, vector<1x16x64xf32>
    %47 = vector.shape_cast %46 : vector<1x16x64xf32> to vector<16x64xf32>
    %cst_32 = arith.constant dense<0.000000e+00> : vector<328x64xf32>
    %48 = tpu.matmul %45, %47, %cst_32 {dimension_numbers = #tpu.dot_dimension_numbers<[1], [0], [0], [1], [0, 0, 1, 1], [], []>} : vector<328x16xf32>, vector<16x64xf32>, vector<328x64xf32> -> vector<328x64xf32>
    %49 = arith.addf %44, %48 : vector<328x64xf32>
    %50 = vector.extract_strided_slice %10 {offsets = [24, 0], sizes = [328, 16], strides = [1, 1]} : vector<376x16xf32> to vector<328x16xf32>
    %c0_33 = arith.constant 0 : index
    %c0_34 = arith.constant 0 : index
    %51 = vector.load %arg5[%c0_33, %c0_34] : memref<16x128xf32, #tpu.memory_space<vmem>>, vector<16x128xf32>
    %cst_35 = arith.constant dense<0.000000e+00> : vector<328x128xf32>
    %52 = tpu.matmul %50, %51, %cst_35 {dimension_numbers = #tpu.dot_dimension_numbers<[1], [0], [0], [1], [0, 0, 1, 1], [], []>} : vector<328x16xf32>, vector<16x128xf32>, vector<328x128xf32> -> vector<328x128xf32>
    %c0_36 = arith.constant 0 : index
    %c0_37 = arith.constant 0 : index
    %53 = vector.load %arg6[%c0_36, %c0_37] : memref<1x128xf32, #tpu.memory_space<vmem>>, vector<1x128xf32>
    %54 = vector.broadcast %53 : vector<1x128xf32> to vector<328x128xf32>
    %55 = arith.addf %52, %54 : vector<328x128xf32>
    %56 = vector.extract_strided_slice %55 {offsets = [0, 0], sizes = [328, 64], strides = [1, 1]} : vector<328x128xf32> to vector<328x64xf32>
    %cst_38 = arith.constant 0.000000e+00 : f32
    %57 = vector.broadcast %cst_38 : f32 to vector<328x64xf32>
    %58 = arith.maximumf %56, %57 : vector<328x64xf32>
    %c0_39 = arith.constant 0 : index
    %c0_40 = arith.constant 0 : index
    %59 = vector.load %arg8[%c0_39, %c0_40] : memref<328x128xf32, #tpu.memory_space<vmem>>, vector<328x64xf32>
    tpu.vector_store %arg8[%c0_39, %c0_40], %58 {strides = array<i32>} : memref<328x128xf32, #tpu.memory_space<vmem>>, vector<328x64xf32>,
    %60 = vector.extract_strided_slice %55 {offsets = [0, 64], sizes = [328, 64], strides = [1, 1]} : vector<328x128xf32> to vector<328x64xf32>
    %61 = arith.addf %60, %49 : vector<328x64xf32>
    %cst_41 = arith.constant 0.000000e+00 : f32
    %62 = vector.broadcast %cst_41 : f32 to vector<328x64xf32>
    %63 = arith.maximumf %61, %62 : vector<328x64xf32>
    %c0_42 = arith.constant 0 : index
    %c64 = arith.constant 64 : index
    %64 = vector.load %arg8[%c0_42, %c64] : memref<328x128xf32, #tpu.memory_space<vmem>>, vector<328x64xf32>
    tpu.vector_store %arg8[%c0_42, %c64], %63 {strides = array<i32>} : memref<328x128xf32, #tpu.memory_space<vmem>>, vector<328x64xf32>,
    return
  }
  func.func @transform_0(%arg0: i32) -> (i32, i32) {
    %c0_i32 = arith.constant 0 : i32
    %c0_i32_0 = arith.constant 0 : i32
    return %arg0, %c0_i32 : i32, i32
  }
  func.func @transform_1(%arg0: i32) -> (i32, i32) {
    %c0_i32 = arith.constant 0 : i32
    %c0_i32_0 = arith.constant 0 : i32
    %c0_i32_1 = arith.constant 0 : i32
    return %c0_i32, %c0_i32_0 : i32, i32
  }
  func.func @transform_2(%arg0: i32) -> (i32, i32) {
    %c0_i32 = arith.constant 0 : i32
    %c0_i32_0 = arith.constant 0 : i32
    %c0_i32_1 = arith.constant 0 : i32
    return %c0_i32, %c0_i32_0 : i32, i32
  }
  func.func @transform_3(%arg0: i32) -> (i32, i32) {
    %c0_i32 = arith.constant 0 : i32
    %c0_i32_0 = arith.constant 0 : i32
    %c0_i32_1 = arith.constant 0 : i32
    return %c0_i32, %c0_i32_0 : i32, i32
  }
  func.func @transform_4(%arg0: i32) -> (i32, i32) {
    %c0_i32 = arith.constant 0 : i32
    %c0_i32_0 = arith.constant 0 : i32
    %c0_i32_1 = arith.constant 0 : i32
    return %c0_i32, %c0_i32_0 : i32, i32
  }
  func.func @transform_5(%arg0: i32) -> (i32, i32) {
    %c0_i32 = arith.constant 0 : i32
    %c0_i32_0 = arith.constant 0 : i32
    %c0_i32_1 = arith.constant 0 : i32
    return %c0_i32, %c0_i32_0 : i32, i32
  }
  func.func @transform_6(%arg0: i32) -> (i32, i32, i32) {
    %c0_i32 = arith.constant 0 : i32
    %c0_i32_0 = arith.constant 0 : i32
    %c0_i32_1 = arith.constant 0 : i32
    %c0_i32_2 = arith.constant 0 : i32
    return %c0_i32, %c0_i32_0, %c0_i32_1 : i32, i32, i32
  }
  func.func @transform_7(%arg0: i32) -> (i32, i32) {
    %c0_i32 = arith.constant 0 : i32
    %c0_i32_0 = arith.constant 0 : i32
    return %arg0, %c0_i32 : i32, i32
  }
}

</mosaic_0001>

<bundles_post_ra>
// kernel: tpu_custom_call.1
= control target key start
LH: loop header
LB: loop body
LE: loop exit
PB: predicated region body
PF: predicated region fallthrough
CT: control target
= control target key end

     0   :  { %12 = vsyncpa [#allocation3], 0  ;;  %s11678_s0 = inlined_call_operand.vmem [shape: f32[752,16], index: 0, kind: input, shape index: {}]   ;;  %s11679_s1 = inlined_call_operand.vmem [shape: f32[376,1], index: 1, kind: input, shape index: {}]   ;;  %s11680_s2 = inlined_call_operand.vmem [shape: f32[16,16], index: 2, kind: input, shape index: {}]   ;;  %s11681_s3 = inlined_call_operand.vmem [shape: f32[1,16], index: 3, kind: input, shape index: {}]   ;;  %s11682_s4 = inlined_call_operand.vmem [shape: f32[16,128], index: 4, kind: input, shape index: {}]   ;;  %s11683_s5 = inlined_call_operand.vmem [shape: f32[1,128], index: 5, kind: input, shape index: {}]   ;;  %s11684_s6 = inlined_call_operand.vmem [shape: f32[8,16,64], index: 6, kind: input, shape index: {}]   ;;  %s11685_s7 = inlined_call_operand.hbm [shape: f32[656,128], index: 7, kind: output, shape index: {}]  }
   0x1   :  { %14 = vsyncpa [#allocation3 + $0x1], 0  ;;  %s8342_s24 = smov 0   ;;  %s8344_s25 = smov 0  }
   0x2   :  { %s8346_s26 = smov 0   ;;  %s8348_s27 = smov 0  }
   0x3 LB: > { %s8363_s28 = sadd.s32 4294967295, %s8292_s27   ;;  %s5450_s29 = sadd.s32 4294967294, %s8292_s27   ;;  %s8292_s27 = sphi %s8348_s27, %s12057_s27   ;;  %s8288_s26 = sphi %s8346_s26, %s12056_s26   ;;  %s8284_s25 = sphi %s8344_s25, %s12055_s25   ;;  %s8280_s24 = sphi %s8342_s24, %s12054_s24  }
   0x4   : > { %s8367_s30 = sadd.s32 1, %s8292_s27   ;;  %s179_s8 = sadd.s32 1, %s8288_s26 }
   0x5   : > { %s176_s9 = ssub.s32 %s8292_s27, %s8367_s30  ;;  %p189_p0 = scmp.ne.s32.totalorder %s8288_s26, %s8284_s25 }
   0x6   : > { %p177_p1 = scmp.eq.s32.totalorder %s176_s9, 0  ;;  %p190_p2 = scmp.eq.s32.totalorder %s8363_s28, 1 }
   0x7   : > { %p195_p3 = scmp.ne.s32.totalorder %s8284_s25, %s8280_s24  ;;  %p196_p4 = scmp.eq.s32.totalorder %s5450_s29, 1 }
   0x8   : > { %s8378_s10 = scalar_select %p177_p1, %s8288_s26, %s179_s8  }
   0x9   : > { %p8380_p5 = por %p190_p2, %p189_p0  ;;  %p8384_p6 = por %p196_p4, %p195_p3 }
   0xa   : > { %p5453_p7 = scmp.ge.s32.totalorder %s8292_s27, 1  ;;  %p241_p8 = scmp.lt.s32.totalorder %s8292_s27, 3 }
   0xc   : > { %p242_p9 = pnand %p5453_p7, %p241_p8 }
   0xe   : > { %245 = sbr.rel (%p242_p9) target bundleno = 1582 (0x62e), region = 48 }
  0x15   : > { %v327_v0 = vld [vmem:[%s11680_s2] sm:$0xff]  ;;  %v328_v1 = vld [vmem:[%s11680_s2 + $0x8] sm:$0xff]  ;;  %s273_s17 = smul.u32 47, %s8363_s28  ;;  %v11688_v2 = vmov 0.0|0.0   ;;  %vm8295_vm0 = vmmov 0   ;;  %v11695_v4 = vmov 0.0  }
  0x16   : > { %7615 = vmatprep.subr.bf16.mxu0 %v11688_v2  ;;  %v7616_v3 = vpack.c.bf16 %v328_v1, %v327_v0  ;;  %6331 = vmatprep.mubr.msk.f32.mxu0 %vm8295_vm0, %v11695_v4  ;;  %v863_v5 = vld [vmem:[%s11679_s1 + $0x130] sm:$0xff]  ;;  %v865_v6 = vld [vmem:[%s11679_s1 + $0x140] sm:$0xff]  ;;  %v8297_v7 = vmov 0   ;;  %v864_v8 = vld [vmem:[%s11679_s1 + $0x138] sm:$0xff]  ;;  %vm336_vm1 = vcmask 130048   ;;  %vm1201_vm2 = vcmask 1041408  }
  0x17   : > { %p274_p10 = scmp.lt.s32.totalorder %s273_s17, 93  ;;  %8227 = vset.pattern.permute.xlu0 %v8297_v7  ;;  %8228 = vset.pattern.permute.xlu1 %v8297_v7  ;;  %v866_v9 = vld [vmem:[%s11679_s1 + $0x148] sm:$0xff]  ;;  %v827_v11 = vld [vmem:[%s11679_s1 + $0x10] sm:$0xff]  ;;  %v828_v12 = vld [vmem:[%s11679_s1 + $0x18] sm:$0xff]  ;;  %vm2076_vm3 = vcmask 1040384   ;;  %vm1637_vm4 = vcmask 1042432  }
  0x18   : > { %7617 = vmatpush3.bf16.msra.mxu0 %v7616_v3  ;;  %1064 = vperm.xlu0 %8227, %v863_v5   ;;  %v829_v14 = vld [vmem:[%s11679_s1 + $0x20] sm:$0xff]  ;;  %v830_v15 = vld [vmem:[%s11679_s1 + $0x28] sm:$0xff]  ;;  %v831_v17 = vld [vmem:[%s11679_s1 + $0x30] sm:$0xff]  ;;  %vm2881_vm5 = vcmask 1046528   ;;  %vm3685_vm6 = vcmask 1045504   ;;  %vm4165_vm7 = vcmask 1044480  }
  0x19   : > { %s12059_s17 = smov (!%p274_p10, %s273_s17), 93  ;;  %1074 = vperm.xlu1 %8228, %v865_v6   ;;  %7618 = vmatprep.subr.bf16.mxu0 %v11688_v2  ;;  %v832_v18 = vld [vmem:[%s11679_s1 + $0x38] sm:$0xff]  ;;  %v833_v20 = vld [vmem:[%s11679_s1 + $0x40] sm:$0xff]  ;;  %v834_v21 = vld [vmem:[%s11679_s1 + $0x48] sm:$0xff]  ;;  %s270_s22 = sand.u32 1, %s8284_s25   ;;  %vm5044_vm8 = vcmask 523264  }
  0x1a   : > { %7645 = vmatprep.subr.bf16.mxu1 %v11688_v2  ;;  %6844 = vmatprep.mubr.msk.f32.mxu1 %vm8295_vm0, %v11695_v4  ;;  %s5454_s9 = sshll.u32 %s12059_s17, 3  ;;  %v835_v23 = vld [vmem:[%s11679_s1 + $0x50] sm:$0xff]  ;;  %v836_v24 = vld [vmem:[%s11679_s1 + $0x58] sm:$0xff]  ;;  %v837_v26 = vld [vmem:[%s11679_s1 + $0x60] sm:$0xff]  ;;  %s8180_s23 = smul.u32 328, %s270_s22  ;;  %vm5332_vm9 = vcmask 1048064  }
  0x1b   : > { %s8419_s15 = scalar_lea.vmem %s11678_s0, %s5454_s9  ;;  %v838_v27 = vld [vmem:[%s11679_s1 + $0x68] sm:$0xff]  ;;  %v839_v29 = vld [vmem:[%s11679_s1 + $0x70] sm:$0xff]  ;;  %v840_v30 = vld [vmem:[%s11679_s1 + $0x78] sm:$0xff]  ;;  %s8298_s13 = smov 64  }
  0x1c   : > { %1069 = vperm.xlu0 %8227, %v864_v8   ;;  %v280_v10 = vld [vmem:[%s8419_s15] sm:$0xff]  ;;  %v281_v13 = vld [vmem:[%s8419_s15 + $0x8] sm:$0xff]  ;;  %v282_v16 = vld [vmem:[%s8419_s15 + $0x10] sm:$0xff]  ;;  %s10823_s9 = scalar_lea.vmem [#allocation2], %s8180_s23  ;;  %s8299_s20 = smov [#allocation2]  }
  0x1d   : > { %1079 = vperm.xlu1 %8228, %v866_v9   ;;  %6332 = vmatmul.mubr.msk.f32.vlgmr.msra.gmra.mrb[0].mxu0 %vm336_vm1, %v280_v10  ;;  %v283_v19 = vld [vmem:[%s8419_s15 + $0x18] sm:$0xff]  ;;  %v284_v22 = vld [vmem:[%s8419_s15 + $0x20] sm:$0xff]  ;;  %v285_v25 = vld [vmem:[%s8419_s15 + $0x28] sm:$0xff]  ;;  %s5388_s14 = sshll.u32 %s10823_s9, 4  ;;  %s8234_s21 = sshll.u32 %s8299_s20, 4  ;;  %s11631_s14 = int_to_ptr.vmem [resolvable:$true] %s5388_s14  ;;  %s8235_s21 = int_to_ptr.vmem [resolvable:$false] %s8234_s21 }
  0x1e   : > { %6334 = vmatprep.mubr.msk.f32.mxu0 %vm8295_vm0, %v11695_v4  ;;  %v286_v28 = vld [vmem:[%s8419_s15 + $0x30] sm:$0xff]  ;;  %v287_v31 = vld [vmem:[%s8419_s15 + $0x38] sm:$0xff]  ;;  %v841_v32 = vld [vmem:[%s11679_s1 + $0x80] sm:$0xff]  ;;  %s8230_s17 = scalar_lea.vmem %s11631_s14, 5248  ;;  %s8236_s23 = scalar_lea.vmem %s8235_s21, 10496 }
  0x1f   : > { %v842_v33 = vld [vmem:[%s11679_s1 + $0x88] sm:$0xff]  ;;  %v288_v34 = vld [vmem:[%s8419_s15 + $0x40] sm:$0xff]  ;;  %v843_v35 = vld [vmem:[%s11679_s1 + $0x90] sm:$0xff]  ;;  %p8231_p11 = scmp.ne.s32.totalorder %s11631_s14, %s8230_s17  ;;  %p8237_p0 = scmp.lt.s32.totalorder %s11631_s14, %s8235_s21 }
  0x20   : > { %884 = vperm.xlu0 %8227, %v827_v11   ;;  %v844_v36 = vld [vmem:[%s11679_s1 + $0x98] sm:$0xff]  ;;  %v289_v37 = vld [vmem:[%s8419_s15 + $0x48] sm:$0xff]  ;;  %v845_v38 = vld [vmem:[%s11679_s1 + $0xa0] sm:$0xff]  ;;  %p8238_p1 = scmp.lt.s32.totalorder %s8236_s23, %s8230_s17 }
  0x21   : > { %889 = vperm.xlu1 %8228, %v828_v12   ;;  %6335 = vmatmul.mubr.msk.f32.gmra.mrb[2].mxu0 %vm336_vm1, %v281_v13  ;;  %v846_v39 = vld [vmem:[%s11679_s1 + $0xa8] sm:$0xff]  ;;  %v290_v40 = vld [vmem:[%s8419_s15 + $0x50] sm:$0xff]  ;;  %v848_v42 = vld [vmem:[%s11679_s1 + $0xb8] sm:$0xff]  ;;  %p8232_p12 = pnand %p8231_p11, %p8380_p5 }
  0x22   : > { %6337 = vmatprep.mubr.msk.f32.mxu0 %vm8295_vm0, %v11695_v4  ;;  %v847_v41 = vld [vmem:[%s11679_s1 + $0xb0] sm:$0xff]  ;;  %v291_v43 = vld [vmem:[%s8419_s15 + $0x58] sm:$0xff]  ;;  %v849_v44 = vld [vmem:[%s11679_s1 + $0xc0] sm:$0xff]  ;;  %p8239_p2 = por %p8238_p1, %p8237_p0 }
  0x23   : > { %v850_v45 = vld [vmem:[%s11679_s1 + $0xc8] sm:$0xff]  ;;  %v292_v46 = vld [vmem:[%s8419_s15 + $0x60] sm:$0xff]  ;;  %v851_v47 = vld [vmem:[%s11679_s1 + $0xd0] sm:$0xff]  ;;  %p8233_p13 = pneg %p8232_p12 }
  0x24   : > { %894 = vperm.xlu0 %8227, %v829_v14   ;;  %v852_v48 = vld [vmem:[%s11679_s1 + $0xd8] sm:$0xff]  ;;  %v293_v49 = vld [vmem:[%s8419_s15 + $0x68] sm:$0xff]  ;;  %v853_v50 = vld [vmem:[%s11679_s1 + $0xe0] sm:$0xff] }
  0x25   : > { %899 = vperm.xlu1 %8228, %v830_v15   ;;  %6338 = vmatmul.mubr.msk.f32.gmra.mrb[4].mxu0 %vm336_vm1, %v282_v16  ;;  %v854_v51 = vld [vmem:[%s11679_s1 + $0xe8] sm:$0xff]  ;;  %v294_v52 = vld [vmem:[%s8419_s15 + $0x70] sm:$0xff]  ;;  %v856_v54 = vld [vmem:[%s11679_s1 + $0xf8] sm:$0xff]  ;;  %p8240_p3 = pnand %p8239_p2, %p8233_p13 }
  0x26   : > { %6340 = vmatprep.mubr.msk.f32.mxu0 %vm8295_vm0, %v11695_v4  ;;  %v855_v53 = vld [vmem:[%s11679_s1 + $0xf0] sm:$0xff]  ;;  %v295_v55 = vld [vmem:[%s8419_s15 + $0x78] sm:$0xff]  ;;  %v857_v56 = vld [vmem:[%s11679_s1 + $0x100] sm:$0xff] }
  0x27   : > { %v858_v57 = vld [vmem:[%s11679_s1 + $0x108] sm:$0xff]  ;;  %v296_v58 = vld [vmem:[%s8419_s15 + $0x80] sm:$0xff]  ;;  %v859_v59 = vld [vmem:[%s11679_s1 + $0x110] sm:$0xff] }
  0x28   : > { %904 = vperm.xlu0 %8227, %v831_v17   ;;  %v860_v60 = vld [vmem:[%s11679_s1 + $0x118] sm:$0xff]  ;;  %v297_v61 = vld [vmem:[%s8419_s15 + $0x88] sm:$0xff]  ;;  %v861_v62 = vld [vmem:[%s11679_s1 + $0x120] sm:$0xff] }
  0x29   : > { %909 = vperm.xlu1 %8228, %v832_v18   ;;  %6341 = vmatmul.mubr.msk.f32.gmra.mrb[6].mxu0 %vm336_vm1, %v283_v19  ;;  %v862_v63 = vld [vmem:[%s11679_s1 + $0x128] sm:$0xff]  ;;  %v298_v0 = vld [vmem:[%s8419_s15 + $0x90] sm:$0xff]  ;;  %v868_v3 = vld [vmem:[%s11679_s1 + $0x158] sm:$0xff] }
  0x2a   : > { %6343 = vmatprep.mubr.msk.f32.mxu0 %vm8295_vm0, %v11695_v4  ;;  %v867_v1 = vld [vmem:[%s11679_s1 + $0x150] sm:$0xff]  ;;  %v299_v5 = vld [vmem:[%s8419_s15 + $0x98] sm:$0xff]  ;;  %v825_v6 = vld [vmem:[%s11679_s1] sm:$0xff] }
  0x2b   : > { %v826_v7 = vld [vmem:[%s11679_s1 + $0x8] sm:$0xff]  ;;  %v300_v8 = vld [vmem:[%s8419_s15 + $0xa0] sm:$0xff]  ;;  %v302_v10 = vld [vmem:[%s8419_s15 + $0xb0] sm:$0xff] }
  0x2c   : > { %914 = vperm.xlu0 %8227, %v833_v20   ;;  %v301_v9 = vld [vmem:[%s8419_s15 + $0xa8] sm:$0xff]  ;;  %v303_v11 = vld [vmem:[%s8419_s15 + $0xb8] sm:$0xff]  ;;  %v5503_v12 = vld [vmem:[%s11684_s6 + $0x10] sm:$0xff] }
  0x2d   : > { %919 = vperm.xlu1 %8228, %v834_v21   ;;  %6344 = vmatmul.mubr.msk.f32.gmra.mrb[8].mxu0 %vm336_vm1, %v284_v22  ;;  %v5504_v13 = vld [vmem:[%s11684_s6 + $0x18] sm:$0xff]  ;;  %v304_v15 = vld [vmem:[%s8419_s15 + $0xc0] sm:$0xff]  ;;  %v305_v16 = vld [vmem:[%s8419_s15 + $0xc8] sm:$0xff] }
  0x2e   : > { %6346 = vmatprep.mubr.msk.f32.mxu0 %vm8295_vm0, %v11695_v4  ;;  %v7619_v14 = vpack.c.bf16 %v5504_v13, %v5503_v12  ;;  %v306_v17 = vld [vmem:[%s8419_s15 + $0xd0] sm:$0xff]  ;;  %v307_v18 = vld [vmem:[%s8419_s15 + $0xd8] sm:$0xff]  ;;  %v869_v19 = vld [vmem:[%s11679_s1 + $0x160] sm:$0xff] }
  0x2f   : > { %v308_v20 = vld [vmem:[%s8419_s15 + $0xe0] sm:$0xff]  ;;  %v871_v21 = vld [vmem:[%s11679_s1 + $0x170] sm:$0xff]  ;;  %v309_v22 = vld [vmem:[%s8419_s15 + $0xe8] sm:$0xff] }
  0x30   : > { %924 = vperm.xlu0 %8227, %v835_v23   ;;  %7620 = vmatpush3.bf16.msra.mxu0 %v7619_v14  ;;  %v310_v23 = vld [vmem:[%s8419_s15 + $0xf0] sm:$0xff] }
  0x31   : > { %929 = vperm.xlu1 %8228, %v836_v24   ;;  %6347 = vmatmul.mubr.msk.f32.gmra.mrb[10].mxu0 %vm336_vm1, %v285_v25  ;;  %v870_v24 = vld [vmem:[%s11679_s1 + $0x168] sm:$0xff]  ;;  %v311_v25 = vld [vmem:[%s8419_s15 + $0xf8] sm:$0xff] }
  0x32   : > { %6349 = vmatprep.mubr.msk.f32.mxu0 %vm8295_vm0, %v11695_v4  ;;  %7621 = vmatprep.subr.bf16.mxu0 %v11688_v2 }
  0x34   : > { %934 = vperm.xlu0 %8227, %v837_v26  }
  0x35   : > { %939 = vperm.xlu1 %8228, %v838_v27   ;;  %6350 = vmatmul.mubr.msk.f32.gmra.mrb[12].mxu0 %vm336_vm1, %v286_v28  ;;  %v312_v28 = vld [vmem:[%s8419_s15 + $0x100] sm:$0xff] }
  0x36   : > { %6352 = vmatprep.mubr.msk.f32.mxu0 %vm8295_vm0, %v11695_v4 }
  0x38   : > { %944 = vperm.xlu0 %8227, %v839_v29  }
  0x39   : > { %949 = vperm.xlu1 %8228, %v840_v30   ;;  %6353 = vmatmul.mubr.msk.f32.gmra.mrb[14].mxu0 %vm336_vm1, %v287_v31  ;;  %v313_v31 = vld [vmem:[%s8419_s15 + $0x108] sm:$0xff] }
  0x3a   : > { %6355 = vmatprep.mubr.msk.f32.mxu0 %vm8295_vm0, %v11695_v4 }
  0x3c   : > { %954 = vperm.xlu0 %8227, %v841_v32  }
  0x3d   : > { %959 = vperm.xlu1 %8228, %v842_v33   ;;  %6356 = vmatmul.mubr.msk.f32.gmra.mrb[16].mxu0 %vm336_vm1, %v288_v34  ;;  %v314_v34 = vld [vmem:[%s8419_s15 + $0x110] sm:$0xff] }
  0x3e   : > { %6358 = vmatprep.mubr.msk.f32.mxu0 %vm8295_vm0, %v11695_v4 }
  0x40   : > { %964 = vperm.xlu0 %8227, %v843_v35  }
  0x41   : > { %969 = vperm.xlu1 %8228, %v844_v36   ;;  %6359 = vmatmul.mubr.msk.f32.gmra.mrb[18].mxu0 %vm336_vm1, %v289_v37  ;;  %v315_v37 = vld [vmem:[%s8419_s15 + $0x118] sm:$0xff] }
  0x42   : > { %6361 = vmatprep.mubr.msk.f32.mxu0 %vm8295_vm0, %v11695_v4 }
  0x44   : > { %974 = vperm.xlu0 %8227, %v845_v38  }
  0x45   : > { %979 = vperm.xlu1 %8228, %v846_v39   ;;  %6362 = vmatmul.mubr.msk.f32.gmra.mrb[20].mxu0 %vm336_vm1, %v290_v40  ;;  %v316_v40 = vld [vmem:[%s8419_s15 + $0x120] sm:$0xff] }
  0x46   : > { %6364 = vmatprep.mubr.msk.f32.mxu0 %vm8295_vm0, %v11695_v4 }
  0x48   : > { %984 = vperm.xlu0 %8227, %v847_v41  }
  0x49   : > { %989 = vperm.xlu1 %8228, %v848_v42   ;;  %6365 = vmatmul.mubr.msk.f32.gmra.mrb[22].mxu0 %vm336_vm1, %v291_v43  ;;  %v317_v43 = vld [vmem:[%s8419_s15 + $0x128] sm:$0xff] }
  0x4a   : > { %6367 = vmatprep.mubr.msk.f32.mxu0 %vm8295_vm0, %v11695_v4 }
  0x4c   : > { %994 = vperm.xlu0 %8227, %v849_v44  }
  0x4d   : > { %999 = vperm.xlu1 %8228, %v850_v45   ;;  %6368 = vmatmul.mubr.msk.f32.gmra.mrb[24].mxu0 %vm336_vm1, %v292_v46  ;;  %v318_v46 = vld [vmem:[%s8419_s15 + $0x130] sm:$0xff] }
  0x4e   : > { %6370 = vmatprep.mubr.msk.f32.mxu0 %vm8295_vm0, %v11695_v4 }
  0x50   : > { %1004 = vperm.xlu0 %8227, %v851_v47  }
  0x51   : > { %1009 = vperm.xlu1 %8228, %v852_v48   ;;  %6371 = vmatmul.mubr.msk.f32.gmra.mrb[26].mxu0 %vm336_vm1, %v293_v49  ;;  %v319_v49 = vld [vmem:[%s8419_s15 + $0x138] sm:$0xff] }
  0x52   : > { %6373 = vmatprep.mubr.msk.f32.mxu0 %vm8295_vm0, %v11695_v4 }
  0x54   : > { %1014 = vperm.xlu0 %8227, %v853_v50  }
  0x55   : > { %1019 = vperm.xlu1 %8228, %v854_v51   ;;  %6374 = vmatmul.mubr.msk.f32.gmra.mrb[28].mxu0 %vm336_vm1, %v294_v52  ;;  %v320_v52 = vld [vmem:[%s8419_s15 + $0x140] sm:$0xff] }
  0x56   : > { %6376 = vmatprep.mubr.msk.f32.mxu0 %vm8295_vm0, %v11695_v4 }
  0x58   : > { %1024 = vperm.xlu0 %8227, %v855_v53  }
  0x59   : > { %1029 = vperm.xlu1 %8228, %v856_v54   ;;  %6377 = vmatmul.mubr.msk.f32.gmra.mrb[30].mxu0 %vm336_vm1, %v295_v55  ;;  %v321_v55 = vld [vmem:[%s8419_s15 + $0x148] sm:$0xff] }
  0x5a   : > { %6379 = vmatprep.mubr.msk.f32.mxu0 %vm8295_vm0, %v11695_v4 }
  0x5c   : > { %1034 = vperm.xlu0 %8227, %v857_v56  }
  0x5d   : > { %1039 = vperm.xlu1 %8228, %v858_v57   ;;  %6380 = vmatmul.mubr.msk.f32.gmra.mrb[32].mxu0 %vm336_vm1, %v296_v58  ;;  %v322_v58 = vld [vmem:[%s8419_s15 + $0x150] sm:$0xff] }
  0x5e   : > { %6382 = vmatprep.mubr.msk.f32.mxu0 %vm8295_vm0, %v11695_v4 }
  0x60   : > { %1044 = vperm.xlu0 %8227, %v859_v59  }
  0x61   : > { %1049 = vperm.xlu1 %8228, %v860_v60   ;;  %6383 = vmatmul.mubr.msk.f32.gmra.mrb[34].mxu0 %vm336_vm1, %v297_v61  ;;  %v323_v61 = vld [vmem:[%s8419_s15 + $0x158] sm:$0xff] }
  0x62   : > { %6385 = vmatprep.mubr.msk.f32.mxu0 %vm8295_vm0, %v11695_v4 }
  0x64   : > { %1054 = vperm.xlu0 %8227, %v861_v62  }
  0x65   : > { %1059 = vperm.xlu1 %8228, %v862_v63   ;;  %6386 = vmatmul.mubr.msk.f32.gmra.mrb[36].mxu0 %vm336_vm1, %v298_v0  ;;  %v324_v0 = vld [vmem:[%s8419_s15 + $0x160] sm:$0xff] }
  0x66   : > { %6388 = vmatprep.mubr.msk.f32.mxu0 %vm8295_vm0, %v11695_v4 }
  0x68   : > { %1084 = vperm.xlu0 %8227, %v867_v1  }
  0x69   : > { %1089 = vperm.xlu1 %8228, %v868_v3   ;;  %6389 = vmatmul.mubr.msk.f32.gmra.mrb[38].mxu0 %vm336_vm1, %v299_v5  ;;  %v325_v5 = vld [vmem:[%s8419_s15 + $0x168] sm:$0xff] }
  0x6a   : > { %6391 = vmatprep.mubr.msk.f32.mxu0 %vm8295_vm0, %v11695_v4 }
  0x6c   : > { %874 = vperm.xlu0 %8227, %v825_v6  }
  0x6d   : > { %879 = vperm.xlu1 %8228, %v826_v7   ;;  %6392 = vmatmul.mubr.msk.f32.gmra.mrb[40].mxu0 %vm336_vm1, %v300_v8  ;;  %v326_v8 = vld [vmem:[%s8419_s15 + $0x170] sm:$0xff]  ;;  %s5890_s15 = smul.u32 5248, %s8363_s28  ;;  %s11637_s28 = scalar_lea.sflag [#allocation3], %s270_s22 }
  0x6e   : > { %6394 = vmatprep.mubr.msk.f32.mxu0 %vm8295_vm0, %v11695_v4 }
  0x6f   : > { %s11629_s19 = scalar_lea.hbm %s11685_s7, %s5890_s15 }
  0x70   : > { %1094 = vperm.xlu0 %8227, %v869_v19  }
  0x71   : > { %6395 = vmatmul.mubr.msk.f32.gmra.mrb[42].mxu0 %vm336_vm1, %v301_v9  ;;  %1099 = vperm.xlu1 %8228, %v870_v24  }
  0x72   : > { %6397 = vmatprep.mubr.msk.f32.mxu0 %vm8295_vm0, %v11695_v4 }
  0x74   : > { %1104 = vperm.xlu0 %8227, %v871_v21  }
  0x75   : > { %6398 = vmatmul.mubr.msk.f32.gmra.mrb[44].mxu0 %vm336_vm1, %v302_v10 }
  0x76   : > { %6400 = vmatprep.mubr.msk.f32.mxu0 %vm8295_vm0, %v11695_v4 }
  0x79   : > { %6401 = vmatmul.mubr.msk.f32.gmra.mrb[46].mxu0 %vm336_vm1, %v303_v11 }
  0x7a   : > { %6403 = vmatprep.mubr.msk.f32.mxu0 %vm8295_vm0, %v11695_v4 }
  0x7d   : > { %6404 = vmatmul.mubr.msk.f32.gmra.mrb[48].mxu0 %vm336_vm1, %v304_v15 }
  0x7e   : > { %6406 = vmatprep.mubr.msk.f32.mxu0 %vm8295_vm0, %v11695_v4 }
  0x81   : > { %6407 = vmatmul.mubr.msk.f32.gmra.mrb[50].mxu0 %vm336_vm1, %v305_v16 }
  0x82   : > { %6409 = vmatprep.mubr.msk.f32.mxu0 %vm8295_vm0, %v11695_v4 }
  0x85   : > { %6410 = vmatmul.mubr.msk.f32.gmra.mrb[52].mxu0 %vm336_vm1, %v306_v17 }
  0x86   : > { %6412 = vmatprep.mubr.msk.f32.mxu0 %vm8295_vm0, %v11695_v4 }
  0x89   : > { %6413 = vmatmul.mubr.msk.f32.gmra.mrb[54].mxu0 %vm336_vm1, %v307_v18 }
  0x8a   : > { %6415 = vmatprep.mubr.msk.f32.mxu0 %vm8295_vm0, %v11695_v4 }
  0x8d   : > { %6416 = vmatmul.mubr.msk.f32.gmra.mrb[56].mxu0 %vm336_vm1, %v308_v20  ;;  %v8830_v20 = vld [vmem:[%s11681_s3] ss:$0 sm:$0xff] }
  0x8e   : > { %6418 = vmatprep.mubr.msk.f32.mxu0 %vm8295_vm0, %v11695_v4 }
  0x91   : > { %6419 = vmatmul.mubr.msk.f32.gmra.mrb[58].mxu0 %vm336_vm1, %v309_v22 }
  0x92   : > { %6421 = vmatprep.mubr.msk.f32.mxu0 %vm8295_vm0, %v11695_v4 }
  0x95   : > { %6422 = vmatmul.mubr.msk.f32.gmra.mrb[60].mxu0 %vm336_vm1, %v310_v23 }
  0x96   : > { %6424 = vmatprep.mubr.msk.f32.mxu0 %vm8295_vm0, %v11695_v4 }
  0x97   : > { %v8682_v26 = vpop.permute.xlu0 %1064 }
  0x98   : > { %v8684_v27 = vpop.permute.xlu1 %1074 }
  0x99   : > { %6425 = vmatmul.mubr.msk.f32.gmra.mrb[62].mxu0 %vm336_vm1, %v311_v25 }
  0x9a   : > { %6427 = vmatprep.mubr.msk.f32.mxu0 %vm8295_vm0, %v11695_v4 }
  0x9b   : > { %v8690_v29 = vpop.permute.xlu0 %1069 }
  0x9c   : > { %v8692_v30 = vpop.permute.xlu1 %1079 }
  0x9d   : > { %6428 = vmatmul.mubr.msk.f32.gmra.mrb[64].mxu0 %vm336_vm1, %v312_v28 }
  0x9e   : > { %6430 = vmatprep.mubr.msk.f32.mxu0 %vm8295_vm0, %v11695_v4 }
  0x9f   : > { %v8698_v32 = vpop.permute.xlu0 %884 }
  0xa0   : > { %v8700_v33 = vpop.permute.xlu1 %889 }
  0xa1   : > { %6431 = vmatmul.mubr.msk.f32.gmra.mrb[66].mxu0 %vm336_vm1, %v313_v31 }
  0xa2   : > { %6433 = vmatprep.mubr.msk.f32.mxu0 %vm8295_vm0, %v11695_v4 }
  0xa3   : > { %v8706_v35 = vpop.permute.xlu0 %894 }
  0xa4   : > { %v8708_v36 = vpop.permute.xlu1 %899 }
  0xa5   : > { %6434 = vmatmul.mubr.msk.f32.gmra.mrb[68].mxu0 %vm336_vm1, %v314_v34 }
  0xa6   : > { %6436 = vmatprep.mubr.msk.f32.mxu0 %vm8295_vm0, %v11695_v4 }
  0xa7   : > { %v8714_v38 = vpop.permute.xlu0 %904 }
  0xa8   : > { %v8716_v39 = vpop.permute.xlu1 %909 }
  0xa9   : > { %6437 = vmatmul.mubr.msk.f32.gmra.mrb[70].mxu0 %vm336_vm1, %v315_v37 }
  0xaa   : > { %6439 = vmatprep.mubr.msk.f32.mxu0 %vm8295_vm0, %v11695_v4 }
  0xab   : > { %v8722_v41 = vpop.permute.xlu0 %914 }
  0xac   : > { %v8724_v42 = vpop.permute.xlu1 %919 }
  0xad   : > { %6440 = vmatmul.mubr.msk.f32.gmra.mrb[72].mxu0 %vm336_vm1, %v316_v40 }
  0xae   : > { %6442 = vmatprep.mubr.msk.f32.mxu0 %vm8295_vm0, %v11695_v4 }
  0xaf   : > { %v8730_v44 = vpop.permute.xlu0 %924 }
  0xb0   : > { %v8732_v45 = vpop.permute.xlu1 %929 }
  0xb1   : > { %6443 = vmatmul.mubr.msk.f32.gmra.mrb[74].mxu0 %vm336_vm1, %v317_v43 }
  0xb2   : > { %6445 = vmatprep.mubr.msk.f32.mxu0 %vm8295_vm0, %v11695_v4 }
  0xb3   : > { %v8738_v47 = vpop.permute.xlu0 %934 }
  0xb4   : > { %v8740_v48 = vpop.permute.xlu1 %939 }
  0xb5   : > { %6446 = vmatmul.mubr.msk.f32.gmra.mrb[76].mxu0 %vm336_vm1, %v318_v46 }
  0xb6   : > { %6448 = vmatprep.mubr.msk.f32.mxu0 %vm8295_vm0, %v11695_v4 }
  0xb7   : > { %v8746_v50 = vpop.permute.xlu0 %944 }
  0xb8   : > { %v8748_v51 = vpop.permute.xlu1 %949 }
  0xb9   : > { %6449 = vmatmul.mubr.msk.f32.gmra.mrb[78].mxu0 %vm336_vm1, %v319_v49 }
  0xba   : > { %6451 = vmatprep.mubr.msk.f32.mxu0 %vm8295_vm0, %v11695_v4 }
  0xbb   : > { %v8754_v53 = vpop.permute.xlu0 %954 }
  0xbc   : > { %v8756_v54 = vpop.permute.xlu1 %959 }
  0xbd   : > { %6452 = vmatmul.mubr.msk.f32.gmra.mrb[80].mxu0 %vm336_vm1, %v320_v52 }
  0xbe   : > { %6454 = vmatprep.mubr.msk.f32.mxu0 %vm8295_vm0, %v11695_v4 }
  0xbf   : > { %v8762_v56 = vpop.permute.xlu0 %964 }
  0xc0   : > { %v8764_v57 = vpop.permute.xlu1 %969 }
  0xc1   : > { %6455 = vmatmul.mubr.msk.f32.gmra.mrb[82].mxu0 %vm336_vm1, %v321_v55 }
  0xc2   : > { %6457 = vmatprep.mubr.msk.f32.mxu0 %vm8295_vm0, %v11695_v4 }
  0xc3   : > { %v8770_v59 = vpop.permute.xlu0 %974 }
  0xc4   : > { %v8772_v60 = vpop.permute.xlu1 %979 }
  0xc5   : > { %6458 = vmatmul.mubr.msk.f32.gmra.mrb[84].mxu0 %vm336_vm1, %v322_v58 }
  0xc6   : > { %6460 = vmatprep.mubr.msk.f32.mxu0 %vm8295_vm0, %v11695_v4 }
  0xc7   : > { %v8778_v62 = vpop.permute.xlu0 %984 }
  0xc8   : > { %v8780_v63 = vpop.permute.xlu1 %989 }
  0xc9   : > { %6461 = vmatmul.mubr.msk.f32.gmra.mrb[86].mxu0 %vm336_vm1, %v323_v61 }
  0xca   : > { %6463 = vmatprep.mubr.msk.f32.mxu0 %vm8295_vm0, %v11695_v4 }
  0xcb   : > { %v8786_v1 = vpop.permute.xlu0 %994 }
  0xcc   : > { %v8788_v3 = vpop.permute.xlu1 %999 }
  0xcd   : > { %6464 = vmatmul.mubr.msk.f32.gmra.mrb[88].mxu0 %vm336_vm1, %v324_v0 }
  0xce   : > { %6466 = vmatprep.mubr.msk.f32.mxu0 %vm8295_vm0, %v11695_v4 }
  0xcf   : > { %v8794_v6 = vpop.permute.xlu0 %1004 }
  0xd0   : > { %v8796_v7 = vpop.permute.xlu1 %1009 }
  0xd1   : > { %6467 = vmatmul.mubr.msk.f32.gmra.mrb[90].mxu0 %vm336_vm1, %v325_v5 }
  0xd2   : > { %6469 = vmatprep.mubr.msk.f32.mxu0 %vm8295_vm0, %v11695_v4 }
  0xd3   : > { %v8802_v9 = vpop.permute.xlu0 %1014 }
  0xd4   : > { %v8804_v10 = vpop.permute.xlu1 %1019 }
  0xd5   : > { %6470 = vmatmul.mubr.msk.f32.gmra.mrb[92].mxu0 %vm336_vm1, %v326_v8 }
  0xd6   : > { %6476 = vmatprep.mubr.msk.f32.mxu0 %vm8295_vm0, %v11695_v4 }
  0xd7   : > { %v8807_v11 = vpop.permute.xlu0 %1024 }
  0xd8   : > { %v8811_v12 = vpop.permute.xlu1 %1029 }
  0xdb   : > { %v8813_v13 = vpop.permute.xlu0 %1034 }
  0xdc   : > { %v8815_v14 = vpop.permute.xlu1 %1039 }
  0xdf   : > { %v8817_v15 = vpop.permute.xlu0 %1044 }
  0xe0   : > { %v8819_v16 = vpop.permute.xlu1 %1049 }
  0xe3   : > { %v8821_v17 = vpop.permute.xlu0 %1054 }
  0xe4   : > { %v8823_v18 = vpop.permute.xlu1 %1059 }
  0xe7   : > { %v8825_v19 = vpop.permute.xlu0 %1084 }
  0xe8   : > { %v8832_v22 = vpop.permute.xlu1 %1089 }
  0xeb   : > { %v875_v25 = vpop.permute.xlu0 %874 }
  0xec   : > { %v880_v43 = vpop.permute.xlu1 %879 }
  0xf0   : > { %v544_v21 = vpop.f32.mrb[0].mxu0 }
  0xf1   : > { %v6333_v23 = vpop.f32.mrb[1].mxu0  ;;  %v545_v24 = vadd.f32 %v8830_v20, %v544_v21 }
  0xf3   : > { %v778_v28 = vmax.f32 %v545_v24, 0.0 }
  0xf4   : > { %v549_v31 = vpop.f32.mrb[2].mxu0 }
  0xf5   : > { %v550_v34 = vadd.f32 %v8830_v20, %v549_v31  ;;  %v6336_v37 = vpop.f32.mrb[3].mxu0  ;;  %v1107_v40 = vmul.f32 %v875_v25, %v778_v28 }
  0xf7   : > { %v779_v46 = vmax.f32 %v550_v34, 0.0  ;;  %v1202_v61 = vrot.slane %v1107_v40, 6  ;;  %v1638_v0 = vrot.slane %v1107_v40, 5  ;;  %v2077_v24 = vrot.slane %v1107_v40, 7 }
  0xf8   : > { %v554_v49 = vpop.f32.mrb[4].mxu0 }
  0xf9   : > { %v1108_v52 = vmul.f32 %v880_v43, %v779_v46  ;;  %v555_v55 = vadd.f32 %v8830_v20, %v554_v49  ;;  %v6339_v58 = vpop.f32.mrb[5].mxu0 }
  0xfb   : > { %v1203_v5 = vrot.slane %v1108_v52, 6  ;;  %v1639_v8 = vrot.slane %v1108_v52, 5  ;;  %v2078_v21 = vrot.slane %v1108_v52, 7  ;;  %v780_v23 = vmax.f32 %v555_v55, 0.0 }
  0xfc   : > { %v559_v31 = vpop.f32.mrb[6].mxu0 }
  0xfd   : > { %v8838_v25 = vmul.f32 %v8698_v32, %v780_v23  ;;  %v560_v28 = vadd.f32 %v8830_v20, %v559_v31  ;;  %v6342_v34 = vpop.f32.mrb[7].mxu0  ;;  %v1204_v37 = vsel %vm1201_vm2, %v1202_v61, %v1203_v5  ;;  %v8843_v43 = vsel %vm1637_vm4, %v1638_v0, %v1639_v8 }
  0xfe   : > { %6477 = vmatmul.mubr.msk.f32.vlgmr.msra.gmra.mrb[94].mxu0 %vm336_vm1, %v1204_v37  ;;  %v8847_v46 = vsel %vm2076_vm3, %v2077_v24, %v2078_v21 }
  0xff   : > { %11804 = vst [vmem:[#allocation5_spill] sm:$0xff] %v8847_v46  ;;  %v1205_v49 = vrot.slane %v8838_v25, 6  ;;  %v11686_v40 = vrot.slane %v8838_v25, 5  ;;  %v11687_v32 = vrot.slane %v8838_v25, 7  ;;  %v781_v52 = vmax.f32 %v560_v28, 0.0  ;;  %6479 = vmatprep.mubr.msk.f32.mxu0 %vm8295_vm0, %v11695_v4 }
 0x100   : > { %v564_v55 = vpop.f32.mrb[8].mxu0 }
 0x101   : > { %v8855_v58 = vmul.f32 %v8700_v33, %v781_v52  ;;  %v565_v61 = vadd.f32 %v8830_v20, %v564_v55  ;;  %v6345_v0 = vpop.f32.mrb[9].mxu0  ;;  %v1206_v23 = vsel %vm1201_vm2, %v1203_v5, %v1205_v49  ;;  %v8862_v24 = vsel %vm1637_vm4, %v1639_v8, %v11686_v40 }
 0x102   : > { %6480 = vmatmul.mubr.msk.f32.gmra.mrb[96].mxu0 %vm336_vm1, %v1206_v23  ;;  %v8868_v31 = vsel %vm2076_vm3, %v2078_v21, %v11687_v32 }
 0x103   : > { %11805 = vst [vmem:[#allocation6_spill] sm:$0xff] %v8855_v58  ;;  %11806 = vst [vmem:[#allocation7_spill] sm:$0xff] %v8868_v31  ;;  %v782_v28 = vmax.f32 %v565_v61, 0.0  ;;  %6482 = vmatprep.mubr.msk.f32.mxu0 %vm8295_vm0, %v11695_v4  ;;  %v1207_v33 = vrot.slane %v8855_v58, 6 }
 0x104   : > { %v569_v34 = vpop.f32.mrb[10].mxu0 }
 0x105   : > { %v8874_v5 = vmul.f32 %v8706_v35, %v782_v28  ;;  %v570_v8 = vadd.f32 %v8830_v20, %v569_v34  ;;  %v6348_v37 = vpop.f32.mrb[11].mxu0  ;;  %v1208_v52 = vsel %vm1201_vm2, %v1205_v49, %v1207_v33 }
 0x106   : > { %6483 = vmatmul.mubr.msk.f32.gmra.mrb[98].mxu0 %vm336_vm1, %v1208_v52 }
 0x107   : > { %11807 = vst [vmem:[#allocation8_spill] sm:$0xff] %v8874_v5  ;;  %v783_v55 = vmax.f32 %v570_v8, 0.0  ;;  %6485 = vmatprep.mubr.msk.f32.mxu0 %vm8295_vm0, %v11695_v4  ;;  %v1209_v21 = vrot.slane %v8874_v5, 6 }
 0x108   : > { %v574_v61 = vpop.f32.mrb[12].mxu0 }
 0x109   : > { %v8883_v0 = vmul.f32 %v8708_v36, %v783_v55  ;;  %v575_v35 = vadd.f32 %v8830_v20, %v574_v61  ;;  %v6351_v23 = vpop.f32.mrb[13].mxu0  ;;  %v1210_v28 = vsel %vm1201_vm2, %v1207_v33, %v1209_v21 }
 0x10a   : > { %6486 = vmatmul.mubr.msk.f32.gmra.mrb[100].mxu0 %vm336_vm1, %v1210_v28  ;;  %v5587_v23 = vld [vmem:[%s11684_s6 + $0x20] sm:$0xff] }
 0x10b   : > { %11808 = vst [vmem:[#allocation9_spill] sm:$0xff] %v8883_v0  ;;  %v784_v49 = vmax.f32 %v575_v35, 0.0  ;;  %6488 = vmatprep.mubr.msk.f32.mxu0 %vm8295_vm0, %v11695_v4  ;;  %v1211_v34 = vrot.slane %v8883_v0, 6 }
 0x10c   : > { %v579_v8 = vpop.f32.mrb[14].mxu0 }
 0x10d   : > { %v8892_v37 = vmul.f32 %v8714_v38, %v784_v49  ;;  %v580_v36 = vadd.f32 %v8830_v20, %v579_v8  ;;  %v6354_v52 = vpop.f32.mrb[15].mxu0  ;;  %v1212_v55 = vsel %vm1201_vm2, %v1209_v21, %v1211_v34  ;;  %v5588_v38 = vld [vmem:[%s11684_s6 + $0x28] sm:$0xff] }
 0x10e   : > { %6489 = vmatmul.mubr.msk.f32.gmra.mrb[102].mxu0 %vm336_vm1, %v1212_v55 }
 0x10f   : > { %v785_v33 = vmax.f32 %v580_v36, 0.0  ;;  %6491 = vmatprep.mubr.msk.f32.mxu0 %vm8295_vm0, %v11695_v4  ;;  %v1213_v61 = vrot.slane %v8892_v37, 6  ;;  %v8911_v36 = vpack.c.bf16 %v5588_v38, %v5587_v23 }
 0x110   : > { %v584_v35 = vpop.f32.mrb[16].mxu0 }
 0x111   : > { %v8907_v28 = vmul.f32 %v8716_v39, %v785_v33  ;;  %v585_v21 = vadd.f32 %v8830_v20, %v584_v35  ;;  %v6357_v49 = vpop.f32.mrb[17].mxu0  ;;  %v1214_v8 = vsel %vm1201_vm2, %v1211_v34, %v1213_v61  ;;  %7646 = vmatpush3.bf16.msra.mxu1 %v8911_v36 }
 0x112   : > { %6492 = vmatmul.mubr.msk.f32.gmra.mrb[104].mxu0 %vm336_vm1, %v1214_v8  ;;  %7627 = vmatprep.subr.bf16.mxu1 %v11688_v2 }
 0x113   : > { %v786_v52 = vmax.f32 %v585_v21, 0.0  ;;  %6494 = vmatprep.mubr.msk.f32.mxu0 %vm8295_vm0, %v11695_v4  ;;  %v1215_v55 = vrot.slane %v8907_v28, 6 }
 0x114   : > { %v589_v40 = vpop.f32.mrb[18].mxu0 }
 0x115   : > { %v8920_v39 = vmul.f32 %v8722_v41, %v786_v52  ;;  %v590_v34 = vadd.f32 %v8830_v20, %v589_v40  ;;  %v6360_v33 = vpop.f32.mrb[19].mxu0  ;;  %v1216_v35 = vsel %vm1201_vm2, %v1213_v61, %v1215_v55 }
 0x116   : > { %6495 = vmatmul.mubr.msk.f32.gmra.mrb[106].mxu0 %vm336_vm1, %v1216_v35  ;;  %v1154_v33 = vld [vmem:[%s11684_s6] sm:$0xff] }
 0x117   : > { %v787_v23 = vmax.f32 %v590_v34, 0.0  ;;  %6497 = vmatprep.mubr.msk.f32.mxu0 %vm8295_vm0, %v11695_v4  ;;  %v1217_v38 = vrot.slane %v8920_v39, 6 }
 0x118   : > { %v594_v21 = vpop.f32.mrb[20].mxu0 }
 0x119   : > { %v8929_v49 = vmul.f32 %v8724_v42, %v787_v23  ;;  %v595_v41 = vadd.f32 %v8830_v20, %v594_v21  ;;  %v6363_v8 = vpop.f32.mrb[21].mxu0  ;;  %v1218_v40 = vsel %vm1201_vm2, %v1215_v55, %v1217_v38  ;;  %v1155_v42 = vld [vmem:[%s11684_s6 + $0x8] sm:$0xff] }
 0x11a   : > { %6498 = vmatmul.mubr.msk.f32.gmra.mrb[108].mxu0 %vm336_vm1, %v1218_v40 }
 0x11b   : > { %v788_v61 = vmax.f32 %v595_v41, 0.0  ;;  %6500 = vmatprep.mubr.msk.f32.mxu0 %vm8295_vm0, %v11695_v4  ;;  %v1219_v52 = vrot.slane %v8929_v49, 6  ;;  %v7622_v41 = vpack.c.bf16 %v1155_v42, %v1154_v33 }
 0x11c   : > { %v599_v34 = vpop.f32.mrb[22].mxu0 }
 0x11d   : > { %v8944_v35 = vmul.f32 %v8730_v44, %v788_v61  ;;  %v600_v55 = vadd.f32 %v8830_v20, %v599_v34  ;;  %v6366_v23 = vpop.f32.mrb[23].mxu0  ;;  %v1220_v21 = vsel %vm1201_vm2, %v1217_v38, %v1219_v52  ;;  %7623 = vmatpush3.bf16.msra.mxu0 %v7622_v41 }
 0x11e   : > { %6501 = vmatmul.mubr.msk.f32.gmra.mrb[110].mxu0 %vm336_vm1, %v1220_v21  ;;  %7624 = vmatprep.subr.bf16.mxu0 %v11688_v2 }
 0x11f   : > { %11809 = vst [vmem:[#allocation10_spill] sm:$0xff] %v8944_v35  ;;  %v789_v8 = vmax.f32 %v600_v55, 0.0  ;;  %6503 = vmatprep.mubr.msk.f32.mxu0 %vm8295_vm0, %v11695_v4  ;;  %v1221_v40 = vrot.slane %v8944_v35, 6 }
 0x120   : > { %v604_v32 = vpop.f32.mrb[24].mxu0 }
 0x121   : > { %v8954_v44 = vmul.f32 %v8732_v45, %v789_v8  ;;  %v605_v61 = vadd.f32 %v8830_v20, %v604_v32  ;;  %v6369_v34 = vpop.f32.mrb[25].mxu0  ;;  %v1222_v38 = vsel %vm1201_vm2, %v1219_v52, %v1221_v40 }
 0x122   : > { %6504 = vmatmul.mubr.msk.f32.gmra.mrb[112].mxu0 %vm336_vm1, %v1222_v38 }
 0x123   : > { %v790_v33 = vmax.f32 %v605_v61, 0.0  ;;  %6506 = vmatprep.mubr.msk.f32.mxu0 %vm8295_vm0, %v11695_v4  ;;  %v1223_v42 = vrot.slane %v8954_v44, 6 }
 0x124   : > { %v609_v55 = vpop.f32.mrb[26].mxu0 }
 0x125   : > { %v8963_v23 = vmul.f32 %v8738_v47, %v790_v33  ;;  %v610_v45 = vadd.f32 %v8830_v20, %v609_v55  ;;  %v6372_v21 = vpop.f32.mrb[27].mxu0  ;;  %v1224_v32 = vsel %vm1201_vm2, %v1221_v40, %v1223_v42 }
 0x126   : > { %6507 = vmatmul.mubr.msk.f32.gmra.mrb[114].mxu0 %vm336_vm1, %v1224_v32 }
 0x127   : > { %v791_v52 = vmax.f32 %v610_v45, 0.0  ;;  %6509 = vmatprep.mubr.msk.f32.mxu0 %vm8295_vm0, %v11695_v4  ;;  %v1225_v41 = vrot.slane %v8963_v23, 6 }
 0x128   : > { %v614_v8 = vpop.f32.mrb[28].mxu0 }
 0x129   : > { %v8972_v61 = vmul.f32 %v8740_v48, %v791_v52  ;;  %v615_v47 = vadd.f32 %v8830_v20, %v614_v8  ;;  %v6375_v34 = vpop.f32.mrb[29].mxu0  ;;  %v1226_v38 = vsel %vm1201_vm2, %v1223_v42, %v1225_v41 }
 0x12a   : > { %6510 = vmatmul.mubr.msk.f32.gmra.mrb[116].mxu0 %vm336_vm1, %v1226_v38 }
 0x12b   : > { %v792_v40 = vmax.f32 %v615_v47, 0.0  ;;  %6512 = vmatprep.mubr.msk.f32.mxu0 %vm8295_vm0, %v11695_v4  ;;  %v1227_v33 = vrot.slane %v8972_v61, 6 }
 0x12c   : > { %v619_v55 = vpop.f32.mrb[30].mxu0 }
 0x12d   : > { %v8981_v45 = vmul.f32 %v8746_v50, %v792_v40  ;;  %v620_v48 = vadd.f32 %v8830_v20, %v619_v55  ;;  %v6378_v21 = vpop.f32.mrb[31].mxu0  ;;  %v1228_v32 = vsel %vm1201_vm2, %v1225_v41, %v1227_v33 }
 0x12e   : > { %6513 = vmatmul.mubr.msk.f32.gmra.mrb[118].mxu0 %vm336_vm1, %v1228_v32 }
 0x12f   : > { %v793_v42 = vmax.f32 %v620_v48, 0.0  ;;  %6515 = vmatprep.mubr.msk.f32.mxu0 %vm8295_vm0, %v11695_v4  ;;  %v1229_v52 = vrot.slane %v8981_v45, 6 }
 0x130   : > { %v624_v8 = vpop.f32.mrb[32].mxu0 }
 0x131   : > { %v8990_v47 = vmul.f32 %v8748_v51, %v793_v42  ;;  %v625_v50 = vadd.f32 %v8830_v20, %v624_v8  ;;  %v6381_v34 = vpop.f32.mrb[33].mxu0  ;;  %v1230_v38 = vsel %vm1201_vm2, %v1227_v33, %v1229_v52 }
 0x132   : > { %6516 = vmatmul.mubr.msk.f32.gmra.mrb[120].mxu0 %vm336_vm1, %v1230_v38 }
 0x133   : > { %v794_v41 = vmax.f32 %v625_v50, 0.0  ;;  %6518 = vmatprep.mubr.msk.f32.mxu0 %vm8295_vm0, %v11695_v4  ;;  %v1231_v40 = vrot.slane %v8990_v47, 6 }
 0x134   : > { %v629_v55 = vpop.f32.mrb[34].mxu0 }
 0x135   : > { %v8999_v48 = vmul.f32 %v8754_v53, %v794_v41  ;;  %v630_v51 = vadd.f32 %v8830_v20, %v629_v55  ;;  %v6384_v21 = vpop.f32.mrb[35].mxu0  ;;  %v1232_v32 = vsel %vm1201_vm2, %v1229_v52, %v1231_v40 }
 0x136   : > { %6519 = vmatmul.mubr.msk.f32.gmra.mrb[122].mxu0 %vm336_vm1, %v1232_v32 }
 0x137   : > { %v795_v33 = vmax.f32 %v630_v51, 0.0  ;;  %6521 = vmatprep.mubr.msk.f32.mxu0 %vm8295_vm0, %v11695_v4  ;;  %v1233_v42 = vrot.slane %v8999_v48, 6 }
 0x138   : > { %v634_v8 = vpop.f32.mrb[36].mxu0 }
 0x139   : > { %v9008_v50 = vmul.f32 %v8756_v54, %v795_v33  ;;  %v635_v53 = vadd.f32 %v8830_v20, %v634_v8  ;;  %v6387_v34 = vpop.f32.mrb[37].mxu0  ;;  %v1234_v38 = vsel %vm1201_vm2, %v1231_v40, %v1233_v42 }
 0x13a   : > { %6522 = vmatmul.mubr.msk.f32.gmra.mrb[124].mxu0 %vm336_vm1, %v1234_v38 }
 0x13b   : > { %v796_v52 = vmax.f32 %v635_v53, 0.0  ;;  %6524 = vmatprep.mubr.msk.f32.mxu0 %vm8295_vm0, %v11695_v4  ;;  %v1235_v41 = vrot.slane %v9008_v50, 6 }
 0x13c   : > { %v639_v55 = vpop.f32.mrb[38].mxu0 }
 0x13d   : > { %v9017_v51 = vmul.f32 %v8762_v56, %v796_v52  ;;  %v640_v54 = vadd.f32 %v8830_v20, %v639_v55  ;;  %v6390_v21 = vpop.f32.mrb[39].mxu0  ;;  %v1236_v32 = vsel %vm1201_vm2, %v1233_v42, %v1235_v41 }
 0x13e   : > { %6525 = vmatmul.mubr.msk.f32.gmra.mrb[126].mxu0 %vm336_vm1, %v1236_v32 }
 0x13f   : > { %v797_v40 = vmax.f32 %v640_v54, 0.0  ;;  %6527 = vmatprep.mubr.msk.f32.mxu0 %vm8295_vm0, %v11695_v4  ;;  %v1237_v33 = vrot.slane %v9017_v51, 6 }
 0x140   : > { %v644_v8 = vpop.f32.mrb[40].mxu0 }
 0x141   : > { %v9026_v53 = vmul.f32 %v8764_v57, %v797_v40  ;;  %v645_v56 = vadd.f32 %v8830_v20, %v644_v8  ;;  %v6393_v34 = vpop.f32.mrb[41].mxu0  ;;  %v1238_v38 = vsel %vm1201_vm2, %v1235_v41, %v1237_v33 }
 0x142   : > { %6528 = vmatmul.mubr.msk.f32.gmra.mrb[128].mxu0 %vm336_vm1, %v1238_v38 }
 0x143   : > { %v798_v42 = vmax.f32 %v645_v56, 0.0  ;;  %6530 = vmatprep.mubr.msk.f32.mxu0 %vm8295_vm0, %v11695_v4  ;;  %v1239_v52 = vrot.slane %v9026_v53, 6 }
 0x144   : > { %v649_v55 = vpop.f32.mrb[42].mxu0 }
 0x145   : > { %v9035_v54 = vmul.f32 %v8770_v59, %v798_v42  ;;  %v650_v57 = vadd.f32 %v8830_v20, %v649_v55  ;;  %v6396_v21 = vpop.f32.mrb[43].mxu0  ;;  %v1240_v32 = vsel %vm1201_vm2, %v1237_v33, %v1239_v52 }
 0x146   : > { %6531 = vmatmul.mubr.msk.f32.gmra.mrb[130].mxu0 %vm336_vm1, %v1240_v32 }
 0x147   : > { %v799_v41 = vmax.f32 %v650_v57, 0.0  ;;  %6533 = vmatprep.mubr.msk.f32.mxu0 %vm8295_vm0, %v11695_v4  ;;  %v1241_v40 = vrot.slane %v9035_v54, 6 }
 0x148   : > { %v654_v8 = vpop.f32.mrb[44].mxu0 }
 0x149   : > { %v9044_v56 = vmul.f32 %v8772_v60, %v799_v41  ;;  %v655_v59 = vadd.f32 %v8830_v20, %v654_v8  ;;  %v6399_v34 = vpop.f32.mrb[45].mxu0  ;;  %v1242_v38 = vsel %vm1201_vm2, %v1239_v52, %v1241_v40 }
 0x14a   : > { %6534 = vmatmul.mubr.msk.f32.gmra.mrb[132].mxu0 %vm336_vm1, %v1242_v38 }
 0x14b   : > { %11810 = vst [vmem:[#allocation11_spill] sm:$0xff] %v9044_v56  ;;  %v800_v33 = vmax.f32 %v655_v59, 0.0  ;;  %6536 = vmatprep.mubr.msk.f32.mxu0 %vm8295_vm0, %v11695_v4  ;;  %v1243_v42 = vrot.slane %v9044_v56, 6 }
 0x14c   : > { %v659_v55 = vpop.f32.mrb[46].mxu0 }
 0x14d   : > { %v9053_v57 = vmul.f32 %v8778_v62, %v800_v33  ;;  %v660_v60 = vadd.f32 %v8830_v20, %v659_v55  ;;  %v6402_v21 = vpop.f32.mrb[47].mxu0  ;;  %v1244_v32 = vsel %vm1201_vm2, %v1241_v40, %v1243_v42 }
 0x14e   : > { %6537 = vmatmul.mubr.msk.f32.gmra.mrb[134].mxu0 %vm336_vm1, %v1244_v32 }
 0x14f   : > { %11811 = vst [vmem:[#allocation12_spill] sm:$0xff] %v9053_v57  ;;  %v801_v52 = vmax.f32 %v660_v60, 0.0  ;;  %6539 = vmatprep.mubr.msk.f32.mxu0 %vm8295_vm0, %v11695_v4  ;;  %v1245_v41 = vrot.slane %v9053_v57, 6 }
 0x150   : > { %v664_v8 = vpop.f32.mrb[48].mxu0 }
 0x151   : > { %v9062_v59 = vmul.f32 %v8780_v63, %v801_v52  ;;  %v665_v62 = vadd.f32 %v8830_v20, %v664_v8  ;;  %v6405_v34 = vpop.f32.mrb[49].mxu0  ;;  %v1246_v38 = vsel %vm1201_vm2, %v1243_v42, %v1245_v41 }
 0x152   : > { %6540 = vmatmul.mubr.msk.f32.gmra.mrb[136].mxu0 %vm336_vm1, %v1246_v38 }
 0x153   : > { %11812 = vst [vmem:[#allocation13_spill] sm:$0xff] %v9062_v59  ;;  %v802_v40 = vmax.f32 %v665_v62, 0.0  ;;  %6542 = vmatprep.mubr.msk.f32.mxu0 %vm8295_vm0, %v11695_v4  ;;  %v1247_v33 = vrot.slane %v9062_v59, 6 }
 0x154   : > { %v669_v55 = vpop.f32.mrb[50].mxu0 }
 0x155   : > { %v9071_v60 = vmul.f32 %v8786_v1, %v802_v40  ;;  %v670_v63 = vadd.f32 %v8830_v20, %v669_v55  ;;  %v6408_v21 = vpop.f32.mrb[51].mxu0  ;;  %v1248_v32 = vsel %vm1201_vm2, %v1245_v41, %v1247_v33 }
 0x156   : > { %6543 = vmatmul.mubr.msk.f32.gmra.mrb[138].mxu0 %vm336_vm1, %v1248_v32 }
 0x157   : > { %11813 = vst [vmem:[#allocation14_spill] sm:$0xff] %v9071_v60  ;;  %v803_v42 = vmax.f32 %v670_v63, 0.0  ;;  %6545 = vmatprep.mubr.msk.f32.mxu0 %vm8295_vm0, %v11695_v4  ;;  %v1249_v52 = vrot.slane %v9071_v60, 6 }
 0x158   : > { %v674_v8 = vpop.f32.mrb[52].mxu0 }
 0x159   : > { %v9080_v62 = vmul.f32 %v8788_v3, %v803_v42  ;;  %v675_v1 = vadd.f32 %v8830_v20, %v674_v8  ;;  %v6411_v34 = vpop.f32.mrb[53].mxu0  ;;  %v1250_v38 = vsel %vm1201_vm2, %v1247_v33, %v1249_v52 }
 0x15a   : > { %6546 = vmatmul.mubr.msk.f32.gmra.mrb[140].mxu0 %vm336_vm1, %v1250_v38 }
 0x15b   : > { %11814 = vst [vmem:[#allocation15_spill] sm:$0xff] %v9080_v62  ;;  %v804_v41 = vmax.f32 %v675_v1, 0.0  ;;  %6548 = vmatprep.mubr.msk.f32.mxu0 %vm8295_vm0, %v11695_v4  ;;  %v1251_v40 = vrot.slane %v9080_v62, 6 }
 0x15c   : > { %v679_v55 = vpop.f32.mrb[54].mxu0 }
 0x15d   : > { %v9089_v63 = vmul.f32 %v8794_v6, %v804_v41  ;;  %v680_v3 = vadd.f32 %v8830_v20, %v679_v55  ;;  %v6414_v21 = vpop.f32.mrb[55].mxu0  ;;  %v1252_v32 = vsel %vm1201_vm2, %v1249_v52, %v1251_v40 }
 0x15e   : > { %6549 = vmatmul.mubr.msk.f32.gmra.mrb[142].mxu0 %vm336_vm1, %v1252_v32 }
 0x15f   : > { %11815 = vst [vmem:[#allocation16_spill] sm:$0xff] %v9089_v63  ;;  %v805_v33 = vmax.f32 %v680_v3, 0.0  ;;  %6551 = vmatprep.mubr.msk.f32.mxu0 %vm8295_vm0, %v11695_v4  ;;  %v1253_v42 = vrot.slane %v9089_v63, 6 }
 0x160   : > { %v684_v8 = vpop.f32.mrb[56].mxu0 }
 0x161   : > { %v9098_v1 = vmul.f32 %v8796_v7, %v805_v33  ;;  %v685_v6 = vadd.f32 %v8830_v20, %v684_v8  ;;  %v6417_v34 = vpop.f32.mrb[57].mxu0  ;;  %v1254_v38 = vsel %vm1201_vm2, %v1251_v40, %v1253_v42 }
 0x162   : > { %6552 = vmatmul.mubr.msk.f32.gmra.mrb[144].mxu0 %vm336_vm1, %v1254_v38 }
 0x163   : > { %11816 = vst [vmem:[#allocation17_spill] sm:$0xff] %v9098_v1  ;;  %v806_v52 = vmax.f32 %v685_v6, 0.0  ;;  %6554 = vmatprep.mubr.msk.f32.mxu0 %vm8295_vm0, %v11695_v4  ;;  %v1255_v41 = vrot.slane %v9098_v1, 6 }
 0x164   : > { %v689_v55 = vpop.f32.mrb[58].mxu0 }
 0x165   : > { %v9107_v3 = vmul.f32 %v8802_v9, %v806_v52  ;;  %v690_v7 = vadd.f32 %v8830_v20, %v689_v55  ;;  %v6420_v21 = vpop.f32.mrb[59].mxu0  ;;  %v1256_v32 = vsel %vm1201_vm2, %v1253_v42, %v1255_v41 }
 0x166   : > { %6555 = vmatmul.mubr.msk.f32.gmra.mrb[146].mxu0 %vm336_vm1, %v1256_v32 }
 0x167   : > { %11817 = vst [vmem:[#allocation18_spill] sm:$0xff] %v9107_v3  ;;  %v807_v40 = vmax.f32 %v690_v7, 0.0  ;;  %6557 = vmatprep.mubr.msk.f32.mxu0 %vm8295_vm0, %v11695_v4  ;;  %v1257_v33 = vrot.slane %v9107_v3, 6 }
 0x168   : > { %v694_v8 = vpop.f32.mrb[60].mxu0 }
 0x169   : > { %v9116_v6 = vmul.f32 %v8804_v10, %v807_v40  ;;  %v695_v9 = vadd.f32 %v8830_v20, %v694_v8  ;;  %v6423_v34 = vpop.f32.mrb[61].mxu0  ;;  %v1258_v38 = vsel %vm1201_vm2, %v1255_v41, %v1257_v33 }
 0x16a   : > { %6558 = vmatmul.mubr.msk.f32.gmra.mrb[148].mxu0 %vm336_vm1, %v1258_v38 }
 0x16b   : > { %11818 = vst [vmem:[#allocation19_spill] sm:$0xff] %v9116_v6  ;;  %v808_v42 = vmax.f32 %v695_v9, 0.0  ;;  %6560 = vmatprep.mubr.msk.f32.mxu0 %vm8295_vm0, %v11695_v4  ;;  %v1259_v52 = vrot.slane %v9116_v6, 6 }
 0x16c   : > { %v699_v55 = vpop.f32.mrb[62].mxu0 }
 0x16d   : > { %v9125_v7 = vmul.f32 %v8807_v11, %v808_v42  ;;  %v700_v10 = vadd.f32 %v8830_v20, %v699_v55  ;;  %v6426_v21 = vpop.f32.mrb[63].mxu0  ;;  %v1260_v32 = vsel %vm1201_vm2, %v1257_v33, %v1259_v52 }
 0x16e   : > { %6561 = vmatmul.mubr.msk.f32.gmra.mrb[150].mxu0 %vm336_vm1, %v1260_v32 }
 0x16f   : > { %11819 = vst [vmem:[#allocation20_spill] sm:$0xff] %v9125_v7  ;;  %v809_v41 = vmax.f32 %v700_v10, 0.0  ;;  %6563 = vmatprep.mubr.msk.f32.mxu0 %vm8295_vm0, %v11695_v4  ;;  %v1261_v40 = vrot.slane %v9125_v7, 6 }
 0x170   : > { %v704_v8 = vpop.f32.mrb[64].mxu0 }
 0x171   : > { %v9134_v9 = vmul.f32 %v8811_v12, %v809_v41  ;;  %v705_v11 = vadd.f32 %v8830_v20, %v704_v8  ;;  %v6429_v34 = vpop.f32.mrb[65].mxu0  ;;  %v1262_v38 = vsel %vm1201_vm2, %v1259_v52, %v1261_v40 }
 0x172   : > { %6564 = vmatmul.mubr.msk.f32.gmra.mrb[152].mxu0 %vm336_vm1, %v1262_v38 }
 0x173   : > { %11820 = vst [vmem:[#allocation21_spill] sm:$0xff] %v9134_v9  ;;  %v810_v33 = vmax.f32 %v705_v11, 0.0  ;;  %6566 = vmatprep.mubr.msk.f32.mxu0 %vm8295_vm0, %v11695_v4  ;;  %v1263_v42 = vrot.slane %v9134_v9, 6 }
 0x174   : > { %v709_v55 = vpop.f32.mrb[66].mxu0 }
 0x175   : > { %v9143_v10 = vmul.f32 %v8813_v13, %v810_v33  ;;  %v710_v12 = vadd.f32 %v8830_v20, %v709_v55  ;;  %v6432_v21 = vpop.f32.mrb[67].mxu0  ;;  %v1264_v32 = vsel %vm1201_vm2, %v1261_v40, %v1263_v42 }
 0x176   : > { %6567 = vmatmul.mubr.msk.f32.gmra.mrb[154].mxu0 %vm336_vm1, %v1264_v32 }
 0x177   : > { %11821 = vst [vmem:[#allocation22_spill] sm:$0xff] %v9143_v10  ;;  %v811_v52 = vmax.f32 %v710_v12, 0.0  ;;  %6569 = vmatprep.mubr.msk.f32.mxu0 %vm8295_vm0, %v11695_v4  ;;  %v1265_v41 = vrot.slane %v9143_v10, 6 }
 0x178   : > { %v714_v8 = vpop.f32.mrb[68].mxu0 }
 0x179   : > { %v9152_v11 = vmul.f32 %v8815_v14, %v811_v52  ;;  %v715_v13 = vadd.f32 %v8830_v20, %v714_v8  ;;  %v6435_v34 = vpop.f32.mrb[69].mxu0  ;;  %v1266_v38 = vsel %vm1201_vm2, %v1263_v42, %v1265_v41 }
 0x17a   : > { %6570 = vmatmul.mubr.msk.f32.gmra.mrb[156].mxu0 %vm336_vm1, %v1266_v38 }
 0x17b   : > { %11822 = vst [vmem:[#allocation23_spill] sm:$0xff] %v9152_v11  ;;  %v812_v40 = vmax.f32 %v715_v13, 0.0  ;;  %6572 = vmatprep.mubr.msk.f32.mxu0 %vm8295_vm0, %v11695_v4  ;;  %v1267_v33 = vrot.slane %v9152_v11, 6 }
 0x17c   : > { %v719_v55 = vpop.f32.mrb[70].mxu0 }
 0x17d   : > { %v9161_v12 = vmul.f32 %v8817_v15, %v812_v40  ;;  %v720_v14 = vadd.f32 %v8830_v20, %v719_v55  ;;  %v6438_v21 = vpop.f32.mrb[71].mxu0  ;;  %v1268_v32 = vsel %vm1201_vm2, %v1265_v41, %v1267_v33 }
 0x17e   : > { %6573 = vmatmul.mubr.msk.f32.gmra.mrb[158].mxu0 %vm336_vm1, %v1268_v32 }
 0x17f   : > { %11823 = vst [vmem:[#allocation24_spill] sm:$0xff] %v9161_v12  ;;  %v813_v42 = vmax.f32 %v720_v14, 0.0  ;;  %6575 = vmatprep.mubr.msk.f32.mxu0 %vm8295_vm0, %v11695_v4  ;;  %v1269_v52 = vrot.slane %v9161_v12, 6 }
 0x180   : > { %v724_v8 = vpop.f32.mrb[72].mxu0 }
 0x181   : > { %v9170_v13 = vmul.f32 %v8819_v16, %v813_v42  ;;  %v725_v15 = vadd.f32 %v8830_v20, %v724_v8  ;;  %v6441_v34 = vpop.f32.mrb[73].mxu0  ;;  %v1270_v38 = vsel %vm1201_vm2, %v1267_v33, %v1269_v52 }
 0x182   : > { %6576 = vmatmul.mubr.msk.f32.gmra.mrb[160].mxu0 %vm336_vm1, %v1270_v38 }
 0x183   : > { %11824 = vst [vmem:[#allocation25_spill] sm:$0xff] %v9170_v13  ;;  %v814_v41 = vmax.f32 %v725_v15, 0.0  ;;  %6578 = vmatprep.mubr.msk.f32.mxu0 %vm8295_vm0, %v11695_v4  ;;  %v1271_v40 = vrot.slane %v9170_v13, 6 }
 0x184   : > { %v729_v55 = vpop.f32.mrb[74].mxu0 }
 0x185   : > { %v9179_v14 = vmul.f32 %v8821_v17, %v814_v41  ;;  %v730_v16 = vadd.f32 %v8830_v20, %v729_v55  ;;  %v6444_v21 = vpop.f32.mrb[75].mxu0  ;;  %v1272_v32 = vsel %vm1201_vm2, %v1269_v52, %v1271_v40 }
 0x186   : > { %6579 = vmatmul.mubr.msk.f32.gmra.mrb[162].mxu0 %vm336_vm1, %v1272_v32 }
 0x187   : > { %11825 = vst [vmem:[#allocation26_spill] sm:$0xff] %v9179_v14  ;;  %v815_v33 = vmax.f32 %v730_v16, 0.0  ;;  %6581 = vmatprep.mubr.msk.f32.mxu0 %vm8295_vm0, %v11695_v4  ;;  %v1273_v42 = vrot.slane %v9179_v14, 6 }
 0x188   : > { %v734_v8 = vpop.f32.mrb[76].mxu0 }
 0x189   : > { %v9188_v15 = vmul.f32 %v8823_v18, %v815_v33  ;;  %v735_v17 = vadd.f32 %v8830_v20, %v734_v8  ;;  %v6447_v34 = vpop.f32.mrb[77].mxu0  ;;  %v1274_v38 = vsel %vm1201_vm2, %v1271_v40, %v1273_v42  ;;  %v5630_v8 = vld [vmem:[%s11684_s6 + $0x30] sm:$0xff] }
 0x18a   : > { %6582 = vmatmul.mubr.msk.f32.gmra.mrb[164].mxu0 %vm336_vm1, %v1274_v38 }
 0x18b   : > { %11826 = vst [vmem:[#allocation27_spill] sm:$0xff] %v9188_v15  ;;  %v816_v52 = vmax.f32 %v735_v17, 0.0  ;;  %6584 = vmatprep.mubr.msk.f32.mxu0 %vm8295_vm0, %v11695_v4  ;;  %v1275_v41 = vrot.slane %v9188_v15, 6 }
 0x18c   : > { %v739_v55 = vpop.f32.mrb[78].mxu0 }
 0x18d   : > { %v9197_v16 = vmul.f32 %v8682_v26, %v816_v52  ;;  %v740_v18 = vadd.f32 %v8830_v20, %v739_v55  ;;  %v6450_v21 = vpop.f32.mrb[79].mxu0  ;;  %v1276_v32 = vsel %vm1201_vm2, %v1273_v42, %v1275_v41  ;;  %v5631_v26 = vld [vmem:[%s11684_s6 + $0x38] sm:$0xff] }
 0x18e   : > { %6585 = vmatmul.mubr.msk.f32.gmra.mrb[166].mxu0 %vm336_vm1, %v1276_v32  ;;  %v7628_v55 = vpack.c.bf16 %v5631_v26, %v5630_v8 }
 0x18f   : > { %11827 = vst [vmem:[#allocation28_spill] sm:$0xff] %v9197_v16  ;;  %v817_v40 = vmax.f32 %v740_v18, 0.0  ;;  %6587 = vmatprep.mubr.msk.f32.mxu0 %vm8295_vm0, %v11695_v4  ;;  %v1277_v33 = vrot.slane %v9197_v16, 6  ;;  %v11690_v32 = vrot.slane %v9197_v16, 7 }
 0x190   : > { %v744_v17 = vpop.f32.mrb[80].mxu0 }
 0x191   : > { %v9212_v34 = vmul.f32 %v8690_v29, %v817_v40  ;;  %v745_v42 = vadd.f32 %v8830_v20, %v744_v17  ;;  %v6453_v38 = vpop.f32.mrb[81].mxu0  ;;  %v1278_v52 = vsel %vm1201_vm2, %v1275_v41, %v1277_v33 }
 0x192   : > { %6588 = vmatmul.mubr.msk.f32.gmra.mrb[168].mxu0 %vm336_vm1, %v1278_v52  ;;  %v11829_v52 = vmov 0.0|0.0  }
 0x193   : > { %11828 = vst [vmem:[#allocation29_spill] sm:$0xff] %v9212_v34  ;;  %v818_v18 = vmax.f32 %v745_v42, 0.0  ;;  %6590 = vmatprep.mubr.msk.f32.mxu0 %vm8295_vm0, %v11695_v4  ;;  %v1279_v21 = vrot.slane %v9212_v34, 6  ;;  %v2154_v2 = vrot.slane %v9212_v34, 7 }
 0x194   : > { %v749_v29 = vpop.f32.mrb[82].mxu0 }
 0x195   : > { %v9223_v40 = vmul.f32 %v8684_v27, %v818_v18  ;;  %v750_v17 = vadd.f32 %v8830_v20, %v749_v29  ;;  %v6456_v41 = vpop.f32.mrb[83].mxu0  ;;  %v1280_v38 = vsel %vm1201_vm2, %v1277_v33, %v1279_v21  ;;  %v9230_v8 = vsel %vm2076_vm3, %v11690_v32, %v2154_v2 }
 0x196   : > { %6591 = vmatmul.mubr.msk.f32.gmra.mrb[170].mxu0 %vm336_vm1, %v1280_v38  ;;  %6845 = vmatmul.mubr.msk.f32.vlgmr.msra.gmra.mrb[0].mxu1 %vm336_vm1, %v9230_v8  ;;  %v5674_v38 = vld [vmem:[%s11684_s6 + $0x48] sm:$0xff]  ;;  %v2082_v32 = vrot.slane %v8855_v58, 7 }
 0x197   : > { %v819_v26 = vmax.f32 %v750_v17, 0.0  ;;  %7629 = vmatpush3.bf16.msra.mxu1 %v7628_v55  ;;  %6593 = vmatprep.mubr.msk.f32.mxu0 %vm8295_vm0, %v11695_v4  ;;  %v1281_v27 = vrot.slane %v9223_v40, 6  ;;  %v2156_v42 = vrot.slane %v9223_v40, 7 }
 0x198   : > { %v9239_v33 = vpop.f32.mrb[84].mxu0  ;;  %6847 = vmatprep.mubr.msk.f32.mxu1 %vm8295_vm0, %v11695_v4  ;;  %7630 = vmatprep.subr.bf16.mxu1 %v11829_v52 }
 0x199   : > { %v9245_v18 = vmul.f32 %v8692_v30, %v819_v26  ;;  %v1282_v29 = vsel %vm1201_vm2, %v1279_v21, %v1281_v27  ;;  %v9249_v55 = vsel %vm2076_vm3, %v2154_v2, %v2156_v42  ;;  %v6459_v17 = vpop.f32.mrb[85].mxu0  ;;  %v5673_v2 = vld [vmem:[%s11684_s6 + $0x40] sm:$0xff] }
 0x19a   : > { %6594 = vmatmul.mubr.msk.f32.gmra.mrb[172].mxu0 %vm336_vm1, %v1282_v29  ;;  %6848 = vmatmul.mubr.msk.f32.gmra.mrb[2].mxu1 %vm336_vm1, %v9249_v55 }
 0x19b   : > { %6596 = vmatprep.mubr.msk.f32.mxu0 %vm8295_vm0, %v11695_v4  ;;  %6850 = vmatprep.mubr.msk.f32.mxu1 %vm8295_vm0, %v11695_v4  ;;  %v1283_v30 = vrot.slane %v9245_v18, 6  ;;  %v11691_v41 = vrot.slane %v9245_v18, 7 }
 0x19c   : > { %v9260_v21 = vpop.f32.mrb[86].mxu0 }
 0x19d   : > { %v1284_v26 = vsel %vm1201_vm2, %v1281_v27, %v1283_v30  ;;  %v9272_v29 = vsel %vm2076_vm3, %v2156_v42, %v11691_v41  ;;  %v6462_v17 = vpop.f32.mrb[87].mxu0  ;;  %v7631_v27 = vpack.c.bf16 %v5674_v38, %v5673_v2  ;;  %v11830_v42 = vrot.slane %v8838_v25, 7 }
 0x19e   : > { %6597 = vmatmul.mubr.msk.f32.gmra.mrb[174].mxu0 %vm336_vm1, %v1284_v26  ;;  %6851 = vmatmul.mubr.msk.f32.gmra.mrb[4].mxu1 %vm336_vm1, %v9272_v29  ;;  %v2084_v26 = vrot.slane %v8874_v5, 7 }
 0x19f   : > { %6603 = vmatprep.mubr.msk.f32.mxu0 %vm8295_vm0, %v11695_v4  ;;  %6857 = vmatprep.mubr.msk.f32.mxu1 %vm8295_vm0, %v11695_v4  ;;  %v9286_v17 = vsel %vm2076_vm3, %v11830_v42, %v2082_v32  ;;  %v1643_v42 = vrot.slane %v8855_v58, 5 }
 0x1a0   : > { %v764_v30 = vpop.f32.mrb[88].mxu0  ;;  %11831 = vst [vmem:[#allocation30_spill] sm:$0xff] %v9286_v17 }
 0x1a1   : > { %v765_v31 = vadd.f32 %v8830_v20, %v764_v30  ;;  %v6465_v41 = vpop.f32.mrb[89].mxu0  ;;  %v9300_v30 = vsel %vm2076_vm3, %v2082_v32, %v2084_v26  ;;  %v1100_v32 = vpop.permute.xlu1 %1099 }
 0x1a2   : > { %6604 = vmatmul.mubr.msk.f32.vlgmr.msra.gmra.mrb[94].mxu0 %vm336_vm1, %v8843_v43  ;;  %6858 = vmatmul.mubr.msk.f32.vlgmr.msra.gmra.mrb[6].mxu1 %vm336_vm1, %v9286_v17  ;;  %v1095_v41 = vpop.permute.xlu0 %1094  ;;  %11832 = vst [vmem:[#allocation31_spill] sm:$0xff] %v9300_v30 }
 0x1a3   : > { %v822_v46 = vmax.f32 %v765_v31, 0.0  ;;  %7632 = vmatpush3.bf16.msra.mxu1 %v7631_v27  ;;  %6606 = vmatprep.mubr.msk.f32.mxu0 %vm8295_vm0, %v11695_v4  ;;  %v2086_v31 = vrot.slane %v8883_v0, 7 }
 0x1a4   : > { %v769_v2 = vpop.f32.mrb[90].mxu0  ;;  %6860 = vmatprep.mubr.msk.f32.mxu1 %vm8295_vm0, %v11695_v4  ;;  %7626 = vmatpush3.bf16.msra.mxu0 %v8911_v36 }
 0x1a5   : > { %v770_v38 = vadd.f32 %v8830_v20, %v769_v2  ;;  %v6468_v43 = vpop.f32.mrb[91].mxu0  ;;  %7633 = vmatprep.subr.bf16.mxu1 %v11829_v52  ;;  %7642 = vmatprep.subr.bf16.mxu0 %v11829_v52  ;;  %v9306_v27 = vmul.f32 %v1095_v41, %v822_v46  ;;  %v2088_v46 = vrot.slane %v8892_v37, 7  ;;  %v9323_v17 = vsel %vm2076_vm3, %v2084_v26, %v2086_v31 }
 0x1a6   : > { %6607 = vmatmul.mubr.msk.f32.gmra.mrb[96].mxu0 %vm336_vm1, %v8862_v24  ;;  %6861 = vmatmul.mubr.msk.f32.gmra.mrb[8].mxu1 %vm336_vm1, %v9300_v30  ;;  %v1645_v43 = vrot.slane %v8874_v5, 5  ;;  %v11834_v30 = vrot.slane %v8838_v25, 5  ;;  %11835 = vst [vmem:[#allocation33_spill] sm:$0xff] %v9323_v17  ;;  %v2090_v5 = vrot.slane %v8907_v28, 7 }
 0x1a7   : > { %11833 = vst [vmem:[#allocation32_spill] sm:$0xff] %v9306_v27  ;;  %v823_v36 = vmax.f32 %v770_v38, 0.0  ;;  %6609 = vmatprep.mubr.msk.f32.mxu0 %vm8295_vm0, %v11695_v4  ;;  %6863 = vmatprep.mubr.msk.f32.mxu1 %vm8295_vm0, %v11695_v4  ;;  %v11704_v4 = vrot.slane %v9306_v27, 1 }
 0x1a8   : > { %v774_v2 = vpop.f32.mrb[92].mxu0  ;;  %v1644_v38 = vsel %vm1637_vm4, %v11834_v30, %v1643_v42  ;;  %v1646_v26 = vsel %vm1637_vm4, %v1643_v42, %v1645_v43  ;;  %v11840_v42 = vrot.slane %v9306_v27, 3 }
 0x1a9   : > { %v1152_v41 = vmul.f32 %v1100_v32, %v823_v36  ;;  %v775_v24 = vadd.f32 %v8830_v20, %v774_v2  ;;  %v6471_v52 = vpop.f32.mrb[93].mxu0  ;;  %v11836_v32 = vmov 0.0   ;;  %v9337_v2 = vsel %vm2076_vm3, %v2086_v31, %v2088_v46 }
 0x1aa   : > { %6610 = vmatmul.mubr.msk.f32.gmra.mrb[98].mxu0 %vm336_vm1, %v1644_v38  ;;  %6864 = vmatmul.mubr.msk.f32.gmra.mrb[10].mxu1 %vm336_vm1, %v9323_v17  ;;  %v1105_v52 = vpop.permute.xlu0 %1104  ;;  %v1647_v38 = vrot.slane %v8883_v0, 5 }
 0x1ab   : > { %v3363_v20 = vrot.slane %v1152_v41, 1  ;;  %v3765_v25 = vrot.slane %v1152_v41, 2  ;;  %v4245_v36 = vrot.slane %v1152_v41, 3  ;;  %v824_v30 = vmax.f32 %v775_v24, 0.0  ;;  %6612 = vmatprep.mubr.msk.f32.mxu0 %vm8295_vm0, %v11836_v32  ;;  %6866 = vmatprep.mubr.msk.f32.mxu1 %vm8295_vm0, %v11836_v32 }
 0x1ac   : > { %v11838_v24 = vrot.slane %v9306_v27, 2  ;;  %v2112_v27 = vrot.slane %v9017_v51, 7 }
 0x1ad   : > { %v1153_v58 = vmul.f32 %v1105_v52, %v824_v30  ;;  %v9344_v41 = vsel %vm2881_vm5, %v11704_v4, %v3363_v20  ;;  %v9354_v31 = vsel %vm4165_vm7, %v11840_v42, %v4245_v36  ;;  %v9365_v4 = vsel %vm2076_vm3, %v2088_v46, %v2090_v5 }
 0x1ae   : > { %11837 = vst [vmem:[#allocation34_spill] sm:$0xff] %v9344_v41  ;;  %v9349_v17 = vsel %vm3685_vm6, %v11838_v24, %v3765_v25  ;;  %11841 = vst [vmem:[#allocation36_spill] sm:$0xff] %v9354_v31  ;;  %6613 = vmatmul.mubr.msk.f32.gmra.mrb[100].mxu0 %vm336_vm1, %v1646_v26  ;;  %6867 = vmatmul.mubr.msk.f32.gmra.mrb[12].mxu1 %vm336_vm1, %v9337_v2  ;;  %v1648_v24 = vsel %vm1637_vm4, %v1645_v43, %v1647_v38  ;;  %v1649_v42 = vrot.slane %v8892_v37, 5 }
 0x1af   : > { %11839 = vst [vmem:[#allocation35_spill] sm:$0xff] %v9349_v17  ;;  %v3365_v30 = vrot.slane %v1153_v58, 1  ;;  %v3767_v52 = vrot.slane %v1153_v58, 2  ;;  %v4247_v0 = vrot.slane %v1153_v58, 3  ;;  %6615 = vmatprep.mubr.msk.f32.mxu0 %vm8295_vm0, %v11836_v32  ;;  %6869 = vmatprep.mubr.msk.f32.mxu1 %vm8295_vm0, %v11836_v32  ;;  %v2092_v26 = vrot.slane %v8920_v39, 7 }
 0x1b0   : > { %v1650_v43 = vsel %vm1637_vm4, %v1647_v38, %v1649_v42  ;;  %v2096_v38 = vrot.slane %v8944_v35, 7  ;;  %v2110_v41 = vrot.slane %v9008_v50, 7 }
 0x1b1   : > { %v9370_v31 = vsel %vm2881_vm5, %v3363_v20, %v3365_v30  ;;  %v9373_v58 = vsel %vm3685_vm6, %v3765_v25, %v3767_v52  ;;  %v9376_v17 = vsel %vm4165_vm7, %v4245_v36, %v4247_v0  ;;  %v9387_v46 = vsel %vm2076_vm3, %v2090_v5, %v2092_v26 }
 0x1b2   : > { %11842 = vst [vmem:[#allocation37_spill] sm:$0xff] %v9370_v31  ;;  %11843 = vst [vmem:[#allocation38_spill] sm:$0xff] %v9373_v58  ;;  %6616 = vmatmul.mubr.msk.f32.gmra.mrb[102].mxu0 %vm336_vm1, %v1648_v24  ;;  %6870 = vmatmul.mubr.msk.f32.gmra.mrb[14].mxu1 %vm336_vm1, %v9365_v4  ;;  %v1651_v20 = vrot.slane %v8907_v28, 5  ;;  %v2094_v0 = vrot.slane %v8929_v49, 7  ;;  %v1653_v36 = vrot.slane %v8920_v39, 5  ;;  %v1655_v24 = vrot.slane %v8929_v49, 5 }
 0x1b3   : > { %11844 = vst [vmem:[#allocation39_spill] sm:$0xff] %v9376_v17  ;;  %6618 = vmatprep.mubr.msk.f32.mxu0 %vm8295_vm0, %v11836_v32  ;;  %6872 = vmatprep.mubr.msk.f32.mxu1 %vm8295_vm0, %v11836_v32  ;;  %v2104_v17 = vrot.slane %v8981_v45, 7  ;;  %v2106_v58 = vrot.slane %v8990_v47, 7  ;;  %v2108_v31 = vrot.slane %v8999_v48, 7 }
 0x1b4   : > { %v1652_v25 = vsel %vm1637_vm4, %v1649_v42, %v1651_v20  ;;  %v9400_v5 = vsel %vm2076_vm3, %v2092_v26, %v2094_v0  ;;  %v1654_v30 = vsel %vm1637_vm4, %v1651_v20, %v1653_v36  ;;  %v9413_v52 = vsel %vm2076_vm3, %v2094_v0, %v2096_v38 }
 0x1b5   : > { %v2098_v42 = vrot.slane %v8954_v44, 7  ;;  %v1656_v26 = vsel %vm1637_vm4, %v1653_v36, %v1655_v24  ;;  %v1657_v20 = vrot.slane %v8944_v35, 5  ;;  %v2100_v0 = vrot.slane %v8963_v23, 7 }
 0x1b6   : > { %6619 = vmatmul.mubr.msk.f32.gmra.mrb[104].mxu0 %vm336_vm1, %v1650_v43  ;;  %6873 = vmatmul.mubr.msk.f32.gmra.mrb[16].mxu1 %vm336_vm1, %v9387_v46 }
 0x1b7   : > { %6621 = vmatprep.mubr.msk.f32.mxu0 %vm8295_vm0, %v11836_v32  ;;  %6875 = vmatprep.mubr.msk.f32.mxu1 %vm8295_vm0, %v11836_v32  ;;  %v9426_v43 = vsel %vm2076_vm3, %v2096_v38, %v2098_v42  ;;  %v9439_v36 = vsel %vm2076_vm3, %v2098_v42, %v2100_v0  ;;  %v1659_v38 = vrot.slane %v8954_v44, 5 }
 0x1ba   : > { %6622 = vmatmul.mubr.msk.f32.gmra.mrb[106].mxu0 %vm336_vm1, %v1652_v25  ;;  %6876 = vmatmul.mubr.msk.f32.gmra.mrb[18].mxu1 %vm336_vm1, %v9400_v5  ;;  %v1658_v25 = vsel %vm1637_vm4, %v1655_v24, %v1657_v20  ;;  %v1660_v24 = vsel %vm1637_vm4, %v1657_v20, %v1659_v38 }
 0x1bb   : > { %6624 = vmatprep.mubr.msk.f32.mxu0 %vm8295_vm0, %v11836_v32  ;;  %6878 = vmatprep.mubr.msk.f32.mxu1 %vm8295_vm0, %v11836_v32 }
 0x1be   : > { %6625 = vmatmul.mubr.msk.f32.gmra.mrb[108].mxu0 %vm336_vm1, %v1654_v30  ;;  %6879 = vmatmul.mubr.msk.f32.gmra.mrb[20].mxu1 %vm336_vm1, %v9413_v52  ;;  %v2102_v30 = vrot.slane %v8972_v61, 7 }
 0x1bf   : > { %6627 = vmatprep.mubr.msk.f32.mxu0 %vm8295_vm0, %v11836_v32  ;;  %6881 = vmatprep.mubr.msk.f32.mxu1 %vm8295_vm0, %v11836_v32 }
 0x1c0   : > { %v9452_v42 = vsel %vm2076_vm3, %v2100_v0, %v2102_v30  ;;  %v9465_v0 = vsel %vm2076_vm3, %v2102_v30, %v2104_v17  ;;  %v9478_v30 = vsel %vm2076_vm3, %v2104_v17, %v2106_v58  ;;  %v9491_v17 = vsel %vm2076_vm3, %v2106_v58, %v2108_v31 }
 0x1c1   : > { %11845 = vst [vmem:[#allocation40_spill] sm:$0xff] %v9491_v17  ;;  %v9504_v58 = vsel %vm2076_vm3, %v2108_v31, %v2110_v41  ;;  %v9517_v31 = vsel %vm2076_vm3, %v2110_v41, %v2112_v27 }
 0x1c2   : > { %6628 = vmatmul.mubr.msk.f32.gmra.mrb[110].mxu0 %vm336_vm1, %v1656_v26  ;;  %6882 = vmatmul.mubr.msk.f32.gmra.mrb[22].mxu1 %vm336_vm1, %v9426_v43  ;;  %v1661_v26 = vrot.slane %v8963_v23, 5  ;;  %11846 = vst [vmem:[#allocation41_spill] sm:$0xff] %v9504_v58  ;;  %11847 = vst [vmem:[#allocation42_spill] sm:$0xff] %v9517_v31 }
 0x1c3   : > { %6630 = vmatprep.mubr.msk.f32.mxu0 %vm8295_vm0, %v11836_v32  ;;  %6884 = vmatprep.mubr.msk.f32.mxu1 %vm8295_vm0, %v11836_v32 }
 0x1c4   : > { %v1662_v20 = vsel %vm1637_vm4, %v1659_v38, %v1661_v26 }
 0x1c6   : > { %6631 = vmatmul.mubr.msk.f32.gmra.mrb[112].mxu0 %vm336_vm1, %v1658_v25  ;;  %6885 = vmatmul.mubr.msk.f32.gmra.mrb[24].mxu1 %vm336_vm1, %v9439_v36  ;;  %v1663_v25 = vrot.slane %v8972_v61, 5 }
 0x1c7   : > { %6633 = vmatprep.mubr.msk.f32.mxu0 %vm8295_vm0, %v11836_v32  ;;  %6887 = vmatprep.mubr.msk.f32.mxu1 %vm8295_vm0, %v11836_v32 }
 0x1c8   : > { %v1664_v38 = vsel %vm1637_vm4, %v1661_v26, %v1663_v25 }
 0x1ca   : > { %6634 = vmatmul.mubr.msk.f32.gmra.mrb[114].mxu0 %vm336_vm1, %v1660_v24  ;;  %6888 = vmatmul.mubr.msk.f32.gmra.mrb[26].mxu1 %vm336_vm1, %v9452_v42  ;;  %v1665_v24 = vrot.slane %v8981_v45, 5 }
 0x1cb   : > { %6636 = vmatprep.mubr.msk.f32.mxu0 %vm8295_vm0, %v11836_v32  ;;  %6890 = vmatprep.mubr.msk.f32.mxu1 %vm8295_vm0, %v11836_v32 }
 0x1cc   : > { %v1666_v26 = vsel %vm1637_vm4, %v1663_v25, %v1665_v24 }
 0x1ce   : > { %6637 = vmatmul.mubr.msk.f32.gmra.mrb[116].mxu0 %vm336_vm1, %v1662_v20  ;;  %6891 = vmatmul.mubr.msk.f32.gmra.mrb[28].mxu1 %vm336_vm1, %v9465_v0  ;;  %v1667_v20 = vrot.slane %v8990_v47, 5 }
 0x1cf   : > { %6639 = vmatprep.mubr.msk.f32.mxu0 %vm8295_vm0, %v11836_v32  ;;  %6893 = vmatprep.mubr.msk.f32.mxu1 %vm8295_vm0, %v11836_v32 }
 0x1d0   : > { %v1668_v25 = vsel %vm1637_vm4, %v1665_v24, %v1667_v20 }
 0x1d2   : > { %6640 = vmatmul.mubr.msk.f32.gmra.mrb[118].mxu0 %vm336_vm1, %v1664_v38  ;;  %6894 = vmatmul.mubr.msk.f32.gmra.mrb[30].mxu1 %vm336_vm1, %v9478_v30  ;;  %v1669_v38 = vrot.slane %v8999_v48, 5 }
 0x1d3   : > { %6642 = vmatprep.mubr.msk.f32.mxu0 %vm8295_vm0, %v11836_v32  ;;  %6896 = vmatprep.mubr.msk.f32.mxu1 %vm8295_vm0, %v11836_v32 }
 0x1d4   : > { %v1670_v24 = vsel %vm1637_vm4, %v1667_v20, %v1669_v38 }
 0x1d6   : > { %6643 = vmatmul.mubr.msk.f32.gmra.mrb[120].mxu0 %vm336_vm1, %v1666_v26  ;;  %6897 = vmatmul.mubr.msk.f32.gmra.mrb[32].mxu1 %vm336_vm1, %v9491_v17  ;;  %v1671_v26 = vrot.slane %v9008_v50, 5  ;;  %v2114_v17 = vrot.slane %v9026_v53, 7 }
 0x1d7   : > { %6645 = vmatprep.mubr.msk.f32.mxu0 %vm8295_vm0, %v11836_v32  ;;  %6899 = vmatprep.mubr.msk.f32.mxu1 %vm8295_vm0, %v11836_v32 }
 0x1d8   : > { %v1672_v20 = vsel %vm1637_vm4, %v1669_v38, %v1671_v26  ;;  %v9530_v41 = vsel %vm2076_vm3, %v2112_v27, %v2114_v17 }
 0x1d9   : > { %11848 = vst [vmem:[#allocation43_spill] sm:$0xff] %v9530_v41 }
 0x1da   : > { %6646 = vmatmul.mubr.msk.f32.gmra.mrb[122].mxu0 %vm336_vm1, %v1668_v25  ;;  %6900 = vmatmul.mubr.msk.f32.gmra.mrb[34].mxu1 %vm336_vm1, %v9504_v58  ;;  %v1673_v25 = vrot.slane %v9017_v51, 5  ;;  %v2116_v58 = vrot.slane %v9035_v54, 7 }
 0x1db   : > { %6648 = vmatprep.mubr.msk.f32.mxu0 %vm8295_vm0, %v11836_v32  ;;  %6902 = vmatprep.mubr.msk.f32.mxu1 %vm8295_vm0, %v11836_v32 }
 0x1dc   : > { %v1674_v38 = vsel %vm1637_vm4, %v1671_v26, %v1673_v25  ;;  %v9543_v27 = vsel %vm2076_vm3, %v2114_v17, %v2116_v58 }
 0x1dd   : > { %11849 = vst [vmem:[#allocation44_spill] sm:$0xff] %v9543_v27 }
 0x1de   : > { %6649 = vmatmul.mubr.msk.f32.gmra.mrb[124].mxu0 %vm336_vm1, %v1670_v24  ;;  %6903 = vmatmul.mubr.msk.f32.gmra.mrb[36].mxu1 %vm336_vm1, %v9517_v31  ;;  %v1675_v24 = vrot.slane %v9026_v53, 5  ;;  %v2118_v31 = vrot.slane %v9044_v56, 7 }
 0x1df   : > { %6651 = vmatprep.mubr.msk.f32.mxu0 %vm8295_vm0, %v11836_v32  ;;  %6905 = vmatprep.mubr.msk.f32.mxu1 %vm8295_vm0, %v11836_v32 }
 0x1e0   : > { %v1676_v26 = vsel %vm1637_vm4, %v1673_v25, %v1675_v24  ;;  %v9556_v17 = vsel %vm2076_vm3, %v2116_v58, %v2118_v31 }
 0x1e1   : > { %11850 = vst [vmem:[#allocation45_spill] sm:$0xff] %v9556_v17 }
 0x1e2   : > { %6652 = vmatmul.mubr.msk.f32.gmra.mrb[126].mxu0 %vm336_vm1, %v1672_v20  ;;  %6906 = vmatmul.mubr.msk.f32.gmra.mrb[38].mxu1 %vm336_vm1, %v9530_v41  ;;  %v1677_v20 = vrot.slane %v9035_v54, 5  ;;  %v2120_v41 = vrot.slane %v9053_v57, 7 }
 0x1e3   : > { %6654 = vmatprep.mubr.msk.f32.mxu0 %vm8295_vm0, %v11836_v32  ;;  %6908 = vmatprep.mubr.msk.f32.mxu1 %vm8295_vm0, %v11836_v32 }
 0x1e4   : > { %v1678_v25 = vsel %vm1637_vm4, %v1675_v24, %v1677_v20  ;;  %v9569_v58 = vsel %vm2076_vm3, %v2118_v31, %v2120_v41 }
 0x1e5   : > { %11851 = vst [vmem:[#allocation46_spill] sm:$0xff] %v9569_v58 }
 0x1e6   : > { %6655 = vmatmul.mubr.msk.f32.gmra.mrb[128].mxu0 %vm336_vm1, %v1674_v38  ;;  %6909 = vmatmul.mubr.msk.f32.gmra.mrb[40].mxu1 %vm336_vm1, %v9543_v27  ;;  %v1679_v38 = vrot.slane %v9044_v56, 5  ;;  %v2122_v27 = vrot.slane %v9062_v59, 7 }
 0x1e7   : > { %6657 = vmatprep.mubr.msk.f32.mxu0 %vm8295_vm0, %v11836_v32  ;;  %6911 = vmatprep.mubr.msk.f32.mxu1 %vm8295_vm0, %v11836_v32 }
 0x1e8   : > { %v1680_v24 = vsel %vm1637_vm4, %v1677_v20, %v1679_v38  ;;  %v9582_v31 = vsel %vm2076_vm3, %v2120_v41, %v2122_v27 }
 0x1e9   : > { %11852 = vst [vmem:[#allocation47_spill] sm:$0xff] %v9582_v31 }
 0x1ea   : > { %6658 = vmatmul.mubr.msk.f32.gmra.mrb[130].mxu0 %vm336_vm1, %v1676_v26  ;;  %6912 = vmatmul.mubr.msk.f32.gmra.mrb[42].mxu1 %vm336_vm1, %v9556_v17  ;;  %v1681_v26 = vrot.slane %v9053_v57, 5  ;;  %v2124_v17 = vrot.slane %v9071_v60, 7 }
 0x1eb   : > { %6660 = vmatprep.mubr.msk.f32.mxu0 %vm8295_vm0, %v11836_v32  ;;  %6914 = vmatprep.mubr.msk.f32.mxu1 %vm8295_vm0, %v11836_v32 }
 0x1ec   : > { %v1682_v20 = vsel %vm1637_vm4, %v1679_v38, %v1681_v26  ;;  %v9595_v41 = vsel %vm2076_vm3, %v2122_v27, %v2124_v17 }
 0x1ed   : > { %11853 = vst [vmem:[#allocation48_spill] sm:$0xff] %v9595_v41 }
 0x1ee   : > { %6661 = vmatmul.mubr.msk.f32.gmra.mrb[132].mxu0 %vm336_vm1, %v1678_v25  ;;  %6915 = vmatmul.mubr.msk.f32.gmra.mrb[44].mxu1 %vm336_vm1, %v9569_v58  ;;  %v1683_v25 = vrot.slane %v9062_v59, 5  ;;  %v2126_v58 = vrot.slane %v9080_v62, 7 }
 0x1ef   : > { %6663 = vmatprep.mubr.msk.f32.mxu0 %vm8295_vm0, %v11836_v32  ;;  %6917 = vmatprep.mubr.msk.f32.mxu1 %vm8295_vm0, %v11836_v32 }
 0x1f0   : > { %v1684_v38 = vsel %vm1637_vm4, %v1681_v26, %v1683_v25  ;;  %v9608_v27 = vsel %vm2076_vm3, %v2124_v17, %v2126_v58 }
 0x1f1   : > { %11854 = vst [vmem:[#allocation49_spill] sm:$0xff] %v9608_v27 }
 0x1f2   : > { %6664 = vmatmul.mubr.msk.f32.gmra.mrb[134].mxu0 %vm336_vm1, %v1680_v24  ;;  %6918 = vmatmul.mubr.msk.f32.gmra.mrb[46].mxu1 %vm336_vm1, %v9582_v31  ;;  %v1685_v24 = vrot.slane %v9071_v60, 5  ;;  %v2128_v31 = vrot.slane %v9089_v63, 7 }
 0x1f3   : > { %6666 = vmatprep.mubr.msk.f32.mxu0 %vm8295_vm0, %v11836_v32  ;;  %6920 = vmatprep.mubr.msk.f32.mxu1 %vm8295_vm0, %v11836_v32 }
 0x1f4   : > { %v1686_v26 = vsel %vm1637_vm4, %v1683_v25, %v1685_v24  ;;  %v9621_v17 = vsel %vm2076_vm3, %v2126_v58, %v2128_v31 }
 0x1f5   : > { %11855 = vst [vmem:[#allocation50_spill] sm:$0xff] %v9621_v17 }
 0x1f6   : > { %6667 = vmatmul.mubr.msk.f32.gmra.mrb[136].mxu0 %vm336_vm1, %v1682_v20  ;;  %6921 = vmatmul.mubr.msk.f32.gmra.mrb[48].mxu1 %vm336_vm1, %v9595_v41  ;;  %v1687_v20 = vrot.slane %v9080_v62, 5  ;;  %v2130_v41 = vrot.slane %v9098_v1, 7 }
 0x1f7   : > { %6669 = vmatprep.mubr.msk.f32.mxu0 %vm8295_vm0, %v11836_v32  ;;  %6923 = vmatprep.mubr.msk.f32.mxu1 %vm8295_vm0, %v11836_v32 }
 0x1f8   : > { %v1688_v25 = vsel %vm1637_vm4, %v1685_v24, %v1687_v20  ;;  %v9634_v58 = vsel %vm2076_vm3, %v2128_v31, %v2130_v41 }
 0x1f9   : > { %11856 = vst [vmem:[#allocation51_spill] sm:$0xff] %v9634_v58 }
 0x1fa   : > { %6670 = vmatmul.mubr.msk.f32.gmra.mrb[138].mxu0 %vm336_vm1, %v1684_v38  ;;  %6924 = vmatmul.mubr.msk.f32.gmra.mrb[50].mxu1 %vm336_vm1, %v9608_v27  ;;  %v1689_v38 = vrot.slane %v9089_v63, 5  ;;  %v2132_v27 = vrot.slane %v9107_v3, 7 }
 0x1fb   : > { %6672 = vmatprep.mubr.msk.f32.mxu0 %vm8295_vm0, %v11836_v32  ;;  %6926 = vmatprep.mubr.msk.f32.mxu1 %vm8295_vm0, %v11836_v32 }
 0x1fc   : > { %v1690_v24 = vsel %vm1637_vm4, %v1687_v20, %v1689_v38  ;;  %v9647_v31 = vsel %vm2076_vm3, %v2130_v41, %v2132_v27 }
 0x1fd   : > { %11857 = vst [vmem:[#allocation52_spill] sm:$0xff] %v9647_v31 }
 0x1fe   : > { %6673 = vmatmul.mubr.msk.f32.gmra.mrb[140].mxu0 %vm336_vm1, %v1686_v26  ;;  %6927 = vmatmul.mubr.msk.f32.gmra.mrb[52].mxu1 %vm336_vm1, %v9621_v17  ;;  %v1691_v26 = vrot.slane %v9098_v1, 5  ;;  %v2134_v17 = vrot.slane %v9116_v6, 7 }
 0x1ff   : > { %6675 = vmatprep.mubr.msk.f32.mxu0 %vm8295_vm0, %v11836_v32  ;;  %6929 = vmatprep.mubr.msk.f32.mxu1 %vm8295_vm0, %v11836_v32 }
 0x200   : > { %v1692_v20 = vsel %vm1637_vm4, %v1689_v38, %v1691_v26  ;;  %v9660_v41 = vsel %vm2076_vm3, %v2132_v27, %v2134_v17 }
 0x201   : > { %11858 = vst [vmem:[#allocation53_spill] sm:$0xff] %v9660_v41 }
 0x202   : > { %6676 = vmatmul.mubr.msk.f32.gmra.mrb[142].mxu0 %vm336_vm1, %v1688_v25  ;;  %6930 = vmatmul.mubr.msk.f32.gmra.mrb[54].mxu1 %vm336_vm1, %v9634_v58  ;;  %v1693_v25 = vrot.slane %v9107_v3, 5  ;;  %v2136_v58 = vrot.slane %v9125_v7, 7 }
 0x203   : > { %6678 = vmatprep.mubr.msk.f32.mxu0 %vm8295_vm0, %v11836_v32  ;;  %6932 = vmatprep.mubr.msk.f32.mxu1 %vm8295_vm0, %v11836_v32 }
 0x204   : > { %v1694_v38 = vsel %vm1637_vm4, %v1691_v26, %v1693_v25  ;;  %v9673_v27 = vsel %vm2076_vm3, %v2134_v17, %v2136_v58 }
 0x205   : > { %11859 = vst [vmem:[#allocation54_spill] sm:$0xff] %v9673_v27 }
 0x206   : > { %6679 = vmatmul.mubr.msk.f32.gmra.mrb[144].mxu0 %vm336_vm1, %v1690_v24  ;;  %6933 = vmatmul.mubr.msk.f32.gmra.mrb[56].mxu1 %vm336_vm1, %v9647_v31  ;;  %v1695_v24 = vrot.slane %v9116_v6, 5  ;;  %v2138_v31 = vrot.slane %v9134_v9, 7 }
 0x207   : > { %6681 = vmatprep.mubr.msk.f32.mxu0 %vm8295_vm0, %v11836_v32  ;;  %6935 = vmatprep.mubr.msk.f32.mxu1 %vm8295_vm0, %v11836_v32 }
 0x208   : > { %v1696_v26 = vsel %vm1637_vm4, %v1693_v25, %v1695_v24  ;;  %v9686_v17 = vsel %vm2076_vm3, %v2136_v58, %v2138_v31 }
 0x209   : > { %11860 = vst [vmem:[#allocation55_spill] sm:$0xff] %v9686_v17 }
 0x20a   : > { %6682 = vmatmul.mubr.msk.f32.gmra.mrb[146].mxu0 %vm336_vm1, %v1692_v20  ;;  %6936 = vmatmul.mubr.msk.f32.gmra.mrb[58].mxu1 %vm336_vm1, %v9660_v41  ;;  %v1697_v20 = vrot.slane %v9125_v7, 5  ;;  %v2140_v41 = vrot.slane %v9143_v10, 7 }
 0x20b   : > { %6684 = vmatprep.mubr.msk.f32.mxu0 %vm8295_vm0, %v11836_v32  ;;  %6938 = vmatprep.mubr.msk.f32.mxu1 %vm8295_vm0, %v11836_v32 }
 0x20c   : > { %v1698_v25 = vsel %vm1637_vm4, %v1695_v24, %v1697_v20  ;;  %v9699_v58 = vsel %vm2076_vm3, %v2138_v31, %v2140_v41 }
 0x20d   : > { %11861 = vst [vmem:[#allocation56_spill] sm:$0xff] %v9699_v58 }
 0x20e   : > { %6685 = vmatmul.mubr.msk.f32.gmra.mrb[148].mxu0 %vm336_vm1, %v1694_v38  ;;  %6939 = vmatmul.mubr.msk.f32.gmra.mrb[60].mxu1 %vm336_vm1, %v9673_v27  ;;  %v1699_v38 = vrot.slane %v9134_v9, 5  ;;  %v2142_v27 = vrot.slane %v9152_v11, 7 }
 0x20f   : > { %6687 = vmatprep.mubr.msk.f32.mxu0 %vm8295_vm0, %v11836_v32  ;;  %6941 = vmatprep.mubr.msk.f32.mxu1 %vm8295_vm0, %v11836_v32 }
 0x210   : > { %v1700_v24 = vsel %vm1637_vm4, %v1697_v20, %v1699_v38  ;;  %v9712_v31 = vsel %vm2076_vm3, %v2140_v41, %v2142_v27 }
 0x211   : > { %11862 = vst [vmem:[#allocation57_spill] sm:$0xff] %v9712_v31 }
 0x212   : > { %6688 = vmatmul.mubr.msk.f32.gmra.mrb[150].mxu0 %vm336_vm1, %v1696_v26  ;;  %6942 = vmatmul.mubr.msk.f32.gmra.mrb[62].mxu1 %vm336_vm1, %v9686_v17  ;;  %v1701_v26 = vrot.slane %v9143_v10, 5  ;;  %v2144_v17 = vrot.slane %v9161_v12, 7 }
 0x213   : > { %6690 = vmatprep.mubr.msk.f32.mxu0 %vm8295_vm0, %v11836_v32  ;;  %6944 = vmatprep.mubr.msk.f32.mxu1 %vm8295_vm0, %v11836_v32 }
 0x214   : > { %v1702_v20 = vsel %vm1637_vm4, %v1699_v38, %v1701_v26  ;;  %v9725_v41 = vsel %vm2076_vm3, %v2142_v27, %v2144_v17 }
 0x215   : > { %11863 = vst [vmem:[#allocation58_spill] sm:$0xff] %v9725_v41 }
 0x216   : > { %6691 = vmatmul.mubr.msk.f32.gmra.mrb[152].mxu0 %vm336_vm1, %v1698_v25  ;;  %6945 = vmatmul.mubr.msk.f32.gmra.mrb[64].mxu1 %vm336_vm1, %v9699_v58  ;;  %v1703_v25 = vrot.slane %v9152_v11, 5  ;;  %v2146_v58 = vrot.slane %v9170_v13, 7 }
 0x217   : > { %6693 = vmatprep.mubr.msk.f32.mxu0 %vm8295_vm0, %v11836_v32  ;;  %6947 = vmatprep.mubr.msk.f32.mxu1 %vm8295_vm0, %v11836_v32 }
 0x218   : > { %v1704_v38 = vsel %vm1637_vm4, %v1701_v26, %v1703_v25  ;;  %v9738_v27 = vsel %vm2076_vm3, %v2144_v17, %v2146_v58 }
 0x219   : > { %11864 = vst [vmem:[#allocation59_spill] sm:$0xff] %v9738_v27 }
 0x21a   : > { %6694 = vmatmul.mubr.msk.f32.gmra.mrb[154].mxu0 %vm336_vm1, %v1700_v24  ;;  %6948 = vmatmul.mubr.msk.f32.gmra.mrb[66].mxu1 %vm336_vm1, %v9712_v31  ;;  %v1705_v24 = vrot.slane %v9161_v12, 5  ;;  %v2148_v31 = vrot.slane %v9179_v14, 7 }
 0x21b   : > { %6696 = vmatprep.mubr.msk.f32.mxu0 %vm8295_vm0, %v11836_v32  ;;  %6950 = vmatprep.mubr.msk.f32.mxu1 %vm8295_vm0, %v11836_v32 }
 0x21c   : > { %v1706_v26 = vsel %vm1637_vm4, %v1703_v25, %v1705_v24  ;;  %v9751_v17 = vsel %vm2076_vm3, %v2146_v58, %v2148_v31 }
 0x21d   : > { %11865 = vst [vmem:[#allocation60_spill] sm:$0xff] %v9751_v17 }
 0x21e   : > { %6697 = vmatmul.mubr.msk.f32.gmra.mrb[156].mxu0 %vm336_vm1, %v1702_v20  ;;  %6951 = vmatmul.mubr.msk.f32.gmra.mrb[68].mxu1 %vm336_vm1, %v9725_v41  ;;  %v1707_v20 = vrot.slane %v9170_v13, 5  ;;  %v2150_v41 = vrot.slane %v9188_v15, 7 }
 0x21f   : > { %6699 = vmatprep.mubr.msk.f32.mxu0 %vm8295_vm0, %v11836_v32  ;;  %6953 = vmatprep.mubr.msk.f32.mxu1 %vm8295_vm0, %v11836_v32 }
 0x220   : > { %v1708_v25 = vsel %vm1637_vm4, %v1705_v24, %v1707_v20  ;;  %v9764_v58 = vsel %vm2076_vm3, %v2148_v31, %v2150_v41  ;;  %v8229_v24 = vld [vmem:[%s11681_s3] ss:$0 sm:$0xff] }
 0x221   : > { %11866 = vst [vmem:[#allocation61_spill] sm:$0xff] %v9764_v58  ;;  %v755_v31 = vadd.f32 %v8229_v24, %v9239_v33 }
 0x222   : > { %6700 = vmatmul.mubr.msk.f32.gmra.mrb[158].mxu0 %vm336_vm1, %v1704_v38  ;;  %6954 = vmatmul.mubr.msk.f32.gmra.mrb[70].mxu1 %vm336_vm1, %v9738_v27  ;;  %v1709_v38 = vrot.slane %v9179_v14, 5 }
 0x223   : > { %6702 = vmatprep.mubr.msk.f32.mxu0 %vm8295_vm0, %v11836_v32  ;;  %6956 = vmatprep.mubr.msk.f32.mxu1 %vm8295_vm0, %v11836_v32  ;;  %v820_v33 = vmax.f32 %v755_v31, 0.0 }
 0x226   : > { %6703 = vmatmul.mubr.msk.f32.gmra.mrb[160].mxu0 %vm336_vm1, %v1706_v26  ;;  %6957 = vmatmul.mubr.msk.f32.gmra.mrb[72].mxu1 %vm336_vm1, %v9751_v17  ;;  %v1710_v26 = vsel %vm1637_vm4, %v1707_v20, %v1709_v38  ;;  %v11867_v17 = vrot.slane %v9197_v16, 7  ;;  %v760_v20 = vadd.f32 %v8229_v24, %v9260_v21 }
 0x227   : > { %6705 = vmatprep.mubr.msk.f32.mxu0 %vm8295_vm0, %v11836_v32  ;;  %6959 = vmatprep.mubr.msk.f32.mxu1 %vm8295_vm0, %v11836_v32 }
 0x228   : > { %v821_v31 = vmax.f32 %v760_v20, 0.0  ;;  %v5717_v20 = vld [vmem:[%s11684_s6 + $0x58] sm:$0xff] }
 0x22a   : > { %6706 = vmatmul.mubr.msk.f32.gmra.mrb[162].mxu0 %vm336_vm1, %v1708_v25  ;;  %6960 = vmatmul.mubr.msk.f32.gmra.mrb[74].mxu1 %vm336_vm1, %v9764_v58  ;;  %v9782_v25 = vsel %vm2076_vm3, %v2150_v41, %v11867_v17  ;;  %v1711_v58 = vrot.slane %v9188_v15, 5  ;;  %v1713_v41 = vrot.slane %v9197_v16, 5  ;;  %v9803_v17 = vmul.f32 %v8825_v19, %v820_v33 }
 0x22b   : > { %6708 = vmatprep.mubr.msk.f32.mxu0 %vm8295_vm0, %v11836_v32  ;;  %6962 = vmatprep.mubr.msk.f32.mxu1 %vm8295_vm0, %v11836_v32 }
 0x22c   : > { %v1712_v27 = vsel %vm1637_vm4, %v1709_v38, %v1711_v58  ;;  %v1714_v21 = vsel %vm1637_vm4, %v1711_v58, %v1713_v41  ;;  %v1715_v38 = vrot.slane %v9212_v34, 5  ;;  %v2558_v58 = vrot.slane %v9803_v17, 7 }
 0x22e   : > { %6709 = vmatmul.mubr.msk.f32.gmra.mrb[164].mxu0 %vm336_vm1, %v1710_v26  ;;  %6963 = vmatmul.mubr.msk.f32.gmra.mrb[76].mxu1 %vm336_vm1, %v9782_v25  ;;  %v1716_v19 = vsel %vm1637_vm4, %v1713_v41, %v1715_v38  ;;  %v1719_v26 = vrot.slane %v9245_v18, 5 }
 0x22f   : > { %6711 = vmatprep.mubr.msk.f32.mxu0 %vm8295_vm0, %v11836_v32  ;;  %6965 = vmatprep.mubr.msk.f32.mxu1 %vm8295_vm0, %v11836_v32 }
 0x232   : > { %6712 = vmatmul.mubr.msk.f32.gmra.mrb[166].mxu0 %vm336_vm1, %v1712_v27  ;;  %6966 = vmatmul.mubr.msk.f32.gmra.mrb[78].mxu1 %vm336_vm1, %v9230_v8  ;;  %v9815_v8 = vmul.f32 %v8832_v22, %v821_v31  ;;  %v1717_v27 = vrot.slane %v9223_v40, 5 }
 0x233   : > { %6714 = vmatprep.mubr.msk.f32.mxu0 %vm8295_vm0, %v11836_v32  ;;  %6968 = vmatprep.mubr.msk.f32.mxu1 %vm8295_vm0, %v11836_v32 }
 0x234   : > { %11868 = vst [vmem:[#allocation62_spill] sm:$0xff] %v9815_v8  ;;  %v1718_v22 = vsel %vm1637_vm4, %v1715_v38, %v1717_v27  ;;  %v2560_v33 = vrot.slane %v9815_v8, 7  ;;  %v1720_v41 = vsel %vm1637_vm4, %v1717_v27, %v1719_v26  ;;  %v11872_v27 = vld [vmem:[#allocation9_spill] sm:$0xff] }
 0x235   : > { %v2885_v26 = vrot.slane %v11872_v27, 1 }
 0x236   : > { %6715 = vmatmul.mubr.msk.f32.gmra.mrb[168].mxu0 %vm336_vm1, %v1714_v21  ;;  %6969 = vmatmul.mubr.msk.f32.gmra.mrb[80].mxu1 %vm336_vm1, %v9249_v55  ;;  %v11869_v55 = vrot.slane %v9245_v18, 7  ;;  %v2561_v31 = vsel %vm2076_vm3, %v2558_v58, %v2560_v33  ;;  %v11870_v21 = vld [vmem:[#allocation8_spill] sm:$0xff]  ;;  %v11874_v33 = vmov 0.0|0.0  }
 0x237   : > { %6717 = vmatprep.mubr.msk.f32.mxu0 %vm8295_vm0, %v11836_v32  ;;  %6971 = vmatprep.mubr.msk.f32.mxu1 %vm8295_vm0, %v11836_v32  ;;  %v2883_v38 = vrot.slane %v11870_v21, 1 }
 0x238   : > { %v2559_v24 = vsel %vm2076_vm3, %v11869_v55, %v2558_v58  ;;  %v11873_v58 = vld [vmem:[#allocation5_spill] sm:$0xff] }
 0x23a   : > { %6718 = vmatmul.mubr.msk.f32.gmra.mrb[170].mxu0 %vm336_vm1, %v1716_v19  ;;  %6972 = vmatmul.mubr.msk.f32.gmra.mrb[0].mxu1 %vm336_vm1, %v9272_v29  ;;  %v5716_v29 = vld [vmem:[%s11684_s6 + $0x50] sm:$0xff]  ;;  %v11871_v19 = vld [vmem:[#allocation6_spill] sm:$0xff] }
 0x23b   : > { %6720 = vmatprep.mubr.msk.f32.mxu0 %vm8295_vm0, %v11836_v32  ;;  %6974 = vmatprep.mubr.msk.f32.mxu1 %vm8295_vm0, %v11836_v32  ;;  %v7634_v55 = vpack.c.bf16 %v5717_v20, %v5716_v29  ;;  %v2886_v29 = vsel %vm2881_vm5, %v2883_v38, %v2885_v26  ;;  %v2887_v20 = vrot.slane %v8892_v37, 1 }
 0x23e   : > { %6721 = vmatmul.mubr.msk.f32.gmra.mrb[172].mxu0 %vm336_vm1, %v1718_v22  ;;  %6975 = vmatmul.mubr.msk.f32.gmra.mrb[2].mxu1 %vm336_vm1, %v2559_v24  ;;  %v2882_v22 = vrot.slane %v11871_v19, 1 }
 0x23f   : > { %6723 = vmatprep.mubr.msk.f32.mxu0 %vm8295_vm0, %v11836_v32  ;;  %6977 = vmatprep.mubr.msk.f32.mxu1 %vm8295_vm0, %v11836_v32 }
 0x240   : > { %v2884_v24 = vsel %vm2881_vm5, %v2882_v22, %v2883_v38  ;;  %v2889_v22 = vrot.slane %v8907_v28, 1 }
 0x242   : > { %6724 = vmatmul.mubr.msk.f32.gmra.mrb[174].mxu0 %vm336_vm1, %v1720_v41  ;;  %6978 = vmatmul.mubr.msk.f32.gmra.mrb[4].mxu1 %vm336_vm1, %v2561_v31  ;;  %v11875_v41 = vld [vmem:[#allocation7_spill] sm:$0xff]  ;;  %v9875_v31 = vsel %vm2881_vm5, %v2885_v26, %v2887_v20  ;;  %v9887_v38 = vsel %vm2881_vm5, %v2887_v20, %v2889_v22  ;;  %v11878_v20 = vld [vmem:[#allocation33_spill] sm:$0xff] }
 0x243   : > { %6730 = vmatprep.mubr.msk.f32.mxu0 %vm8295_vm0, %v11836_v32  ;;  %6984 = vmatprep.mubr.msk.f32.mxu1 %vm8295_vm0, %v11836_v32  ;;  %v11877_v26 = vld [vmem:[#allocation31_spill] sm:$0xff] }
 0x246   : > { %6731 = vmatmul.mubr.msk.f32.vlgmr.msra.gmra.mrb[94].mxu0 %vm336_vm1, %v11873_v58  ;;  %6985 = vmatmul.mubr.msk.f32.vlgmr.msra.gmra.mrb[6].mxu1 %vm336_vm1, %v2884_v24  ;;  %v2891_v24 = vrot.slane %v8920_v39, 1 }
 0x247   : > { %7635 = vmatpush3.bf16.msra.mxu1 %v7634_v55  ;;  %6733 = vmatprep.mubr.msk.f32.mxu0 %vm8295_vm0, %v11836_v32  ;;  %v11876_v55 = vld [vmem:[#allocation30_spill] sm:$0xff] }
 0x248   : > { %6987 = vmatprep.mubr.msk.f32.mxu1 %vm8295_vm0, %v11836_v32  ;;  %7636 = vmatprep.subr.bf16.mxu1 %v11874_v33  ;;  %v9899_v58 = vsel %vm2881_vm5, %v2889_v22, %v2891_v24  ;;  %v2895_v22 = vrot.slane %v8944_v35, 1  ;;  %v2897_v35 = vrot.slane %v8954_v44, 1 }
 0x24a   : > { %6734 = vmatmul.mubr.msk.f32.gmra.mrb[96].mxu0 %vm336_vm1, %v11875_v41  ;;  %6988 = vmatmul.mubr.msk.f32.gmra.mrb[8].mxu1 %vm336_vm1, %v2886_v29  ;;  %v2893_v29 = vrot.slane %v8929_v49, 1 }
 0x24b   : > { %6736 = vmatprep.mubr.msk.f32.mxu0 %vm8295_vm0, %v11836_v32  ;;  %6990 = vmatprep.mubr.msk.f32.mxu1 %vm8295_vm0, %v11836_v32 }
 0x24c   : > { %v9911_v41 = vsel %vm2881_vm5, %v2891_v24, %v2893_v29  ;;  %v9929_v24 = vsel %vm2881_vm5, %v2893_v29, %v2895_v22  ;;  %v2899_v29 = vrot.slane %v8963_v23, 1 }
 0x24e   : > { %6737 = vmatmul.mubr.msk.f32.gmra.mrb[98].mxu0 %vm336_vm1, %v11876_v55  ;;  %6991 = vmatmul.mubr.msk.f32.gmra.mrb[10].mxu1 %vm336_vm1, %v9875_v31  ;;  %v4642_v55 = vld [vmem:[%s11682_s4] sm:$0xff] }
 0x24f   : > { %6739 = vmatprep.mubr.msk.f32.mxu0 %vm8295_vm0, %v11836_v32  ;;  %6993 = vmatprep.mubr.msk.f32.mxu1 %vm8295_vm0, %v11836_v32 }
 0x252   : > { %6740 = vmatmul.mubr.msk.f32.gmra.mrb[100].mxu0 %vm336_vm1, %v11877_v26  ;;  %6994 = vmatmul.mubr.msk.f32.gmra.mrb[12].mxu1 %vm336_vm1, %v9887_v38  ;;  %v4643_v26 = vld [vmem:[%s11682_s4 + $0x8] sm:$0xff] }
 0x253   : > { %6742 = vmatprep.mubr.msk.f32.mxu0 %vm8295_vm0, %v11836_v32  ;;  %6996 = vmatprep.mubr.msk.f32.mxu1 %vm8295_vm0, %v11836_v32 }
 0x256   : > { %6743 = vmatmul.mubr.msk.f32.gmra.mrb[102].mxu0 %vm336_vm1, %v11878_v20  ;;  %6997 = vmatmul.mubr.msk.f32.gmra.mrb[14].mxu1 %vm336_vm1, %v9899_v58  ;;  %v7643_v20 = vpack.c.bf16 %v4643_v26, %v4642_v55  ;;  %v2905_v55 = vrot.slane %v8990_v47, 1  ;;  %v2907_v26 = vrot.slane %v8999_v48, 1 }
 0x257   : > { %6745 = vmatprep.mubr.msk.f32.mxu0 %vm8295_vm0, %v11836_v32  ;;  %6999 = vmatprep.mubr.msk.f32.mxu1 %vm8295_vm0, %v11836_v32 }
 0x258   : > { %7644 = vmatpush3.bf16.msra.mxu0 %v7643_v20  ;;  %v2909_v20 = vrot.slane %v9008_v50, 1 }
 0x25a   : > { %6746 = vmatmul.mubr.msk.f32.gmra.mrb[104].mxu0 %vm336_vm1, %v9337_v2  ;;  %7000 = vmatmul.mubr.msk.f32.gmra.mrb[16].mxu1 %vm336_vm1, %v9911_v41  ;;  %v9941_v2 = vsel %vm2881_vm5, %v2895_v22, %v2897_v35  ;;  %v2901_v22 = vrot.slane %v8972_v61, 1 }
 0x25b   : > { %6748 = vmatprep.mubr.msk.f32.mxu0 %vm8295_vm0, %v11836_v32  ;;  %7002 = vmatprep.mubr.msk.f32.mxu1 %vm8295_vm0, %v11836_v32 }
 0x25e   : > { %6749 = vmatmul.mubr.msk.f32.gmra.mrb[106].mxu0 %vm336_vm1, %v9365_v4  ;;  %7003 = vmatmul.mubr.msk.f32.gmra.mrb[18].mxu1 %vm336_vm1, %v9929_v24  ;;  %v9953_v4 = vsel %vm2881_vm5, %v2897_v35, %v2899_v29  ;;  %v2903_v35 = vrot.slane %v8981_v45, 1 }
 0x25f   : > { %6751 = vmatprep.mubr.msk.f32.mxu0 %vm8295_vm0, %v11836_v32  ;;  %7005 = vmatprep.mubr.msk.f32.mxu1 %vm8295_vm0, %v11836_v32 }
 0x262   : > { %6752 = vmatmul.mubr.msk.f32.gmra.mrb[108].mxu0 %vm336_vm1, %v9387_v46  ;;  %7006 = vmatmul.mubr.msk.f32.gmra.mrb[20].mxu1 %vm336_vm1, %v9941_v2  ;;  %v9965_v46 = vsel %vm2881_vm5, %v2899_v29, %v2901_v22  ;;  %v2911_v29 = vrot.slane %v9017_v51, 1 }
 0x263   : > { %6754 = vmatprep.mubr.msk.f32.mxu0 %vm8295_vm0, %v11836_v32  ;;  %7008 = vmatprep.mubr.msk.f32.mxu1 %vm8295_vm0, %v11836_v32 }
 0x266   : > { %6755 = vmatmul.mubr.msk.f32.gmra.mrb[110].mxu0 %vm336_vm1, %v9400_v5  ;;  %7009 = vmatmul.mubr.msk.f32.gmra.mrb[22].mxu1 %vm336_vm1, %v9953_v4  ;;  %v9977_v5 = vsel %vm2881_vm5, %v2901_v22, %v2903_v35  ;;  %v2913_v22 = vrot.slane %v9026_v53, 1 }
 0x267   : > { %6757 = vmatprep.mubr.msk.f32.mxu0 %vm8295_vm0, %v11836_v32  ;;  %7011 = vmatprep.mubr.msk.f32.mxu1 %vm8295_vm0, %v11836_v32 }
 0x26a   : > { %6758 = vmatmul.mubr.msk.f32.gmra.mrb[112].mxu0 %vm336_vm1, %v9413_v52  ;;  %7012 = vmatmul.mubr.msk.f32.gmra.mrb[24].mxu1 %vm336_vm1, %v9965_v46  ;;  %v9989_v52 = vsel %vm2881_vm5, %v2903_v35, %v2905_v55  ;;  %v2915_v35 = vrot.slane %v9035_v54, 1 }
 0x26b   : > { %6760 = vmatprep.mubr.msk.f32.mxu0 %vm8295_vm0, %v11836_v32  ;;  %7014 = vmatprep.mubr.msk.f32.mxu1 %vm8295_vm0, %v11836_v32 }
 0x26e   : > { %6761 = vmatmul.mubr.msk.f32.gmra.mrb[114].mxu0 %vm336_vm1, %v9426_v43  ;;  %7015 = vmatmul.mubr.msk.f32.gmra.mrb[26].mxu1 %vm336_vm1, %v9977_v5  ;;  %v10001_v43 = vsel %vm2881_vm5, %v2905_v55, %v2907_v26  ;;  %v11879_v55 = vld [vmem:[#allocation40_spill] sm:$0xff] }
 0x26f   : > { %6763 = vmatprep.mubr.msk.f32.mxu0 %vm8295_vm0, %v11836_v32  ;;  %7017 = vmatprep.mubr.msk.f32.mxu1 %vm8295_vm0, %v11836_v32 }
 0x272   : > { %6764 = vmatmul.mubr.msk.f32.gmra.mrb[116].mxu0 %vm336_vm1, %v9439_v36  ;;  %7018 = vmatmul.mubr.msk.f32.gmra.mrb[28].mxu1 %vm336_vm1, %v9989_v52  ;;  %v10013_v36 = vsel %vm2881_vm5, %v2907_v26, %v2909_v20  ;;  %v2917_v26 = vrot.slane %v9044_v56, 1  ;;  %v11882_v56 = vld [vmem:[#allocation43_spill] sm:$0xff] }
 0x273   : > { %6766 = vmatprep.mubr.msk.f32.mxu0 %vm8295_vm0, %v11836_v32  ;;  %7020 = vmatprep.mubr.msk.f32.mxu1 %vm8295_vm0, %v11836_v32 }
 0x276   : > { %6767 = vmatmul.mubr.msk.f32.gmra.mrb[118].mxu0 %vm336_vm1, %v9452_v42  ;;  %7021 = vmatmul.mubr.msk.f32.gmra.mrb[30].mxu1 %vm336_vm1, %v10001_v43  ;;  %v10025_v42 = vsel %vm2881_vm5, %v2909_v20, %v2911_v29  ;;  %v11880_v20 = vld [vmem:[#allocation41_spill] sm:$0xff] }
 0x277   : > { %6769 = vmatprep.mubr.msk.f32.mxu0 %vm8295_vm0, %v11836_v32  ;;  %7023 = vmatprep.mubr.msk.f32.mxu1 %vm8295_vm0, %v11836_v32 }
 0x27a   : > { %6770 = vmatmul.mubr.msk.f32.gmra.mrb[120].mxu0 %vm336_vm1, %v9465_v0  ;;  %7024 = vmatmul.mubr.msk.f32.gmra.mrb[32].mxu1 %vm336_vm1, %v10013_v36  ;;  %v10037_v0 = vsel %vm2881_vm5, %v2911_v29, %v2913_v22  ;;  %v10061_v29 = vsel %vm2881_vm5, %v2915_v35, %v2917_v26 }
 0x27b   : > { %6772 = vmatprep.mubr.msk.f32.mxu0 %vm8295_vm0, %v11836_v32  ;;  %7026 = vmatprep.mubr.msk.f32.mxu1 %vm8295_vm0, %v11836_v32 }
 0x27e   : > { %6773 = vmatmul.mubr.msk.f32.gmra.mrb[122].mxu0 %vm336_vm1, %v9478_v30  ;;  %7027 = vmatmul.mubr.msk.f32.gmra.mrb[34].mxu1 %vm336_vm1, %v10025_v42  ;;  %v10049_v30 = vsel %vm2881_vm5, %v2913_v22, %v2915_v35  ;;  %v2919_v22 = vrot.slane %v9053_v57, 1  ;;  %v2921_v35 = vrot.slane %v9062_v59, 1  ;;  %v11883_v57 = vld [vmem:[#allocation44_spill] sm:$0xff]  ;;  %v11884_v59 = vld [vmem:[#allocation45_spill] sm:$0xff] }
 0x27f   : > { %6775 = vmatprep.mubr.msk.f32.mxu0 %vm8295_vm0, %v11836_v32  ;;  %7029 = vmatprep.mubr.msk.f32.mxu1 %vm8295_vm0, %v11836_v32 }
 0x282   : > { %6776 = vmatmul.mubr.msk.f32.gmra.mrb[124].mxu0 %vm336_vm1, %v11879_v55  ;;  %7030 = vmatmul.mubr.msk.f32.gmra.mrb[36].mxu1 %vm336_vm1, %v10037_v0  ;;  %v11881_v55 = vld [vmem:[#allocation42_spill] sm:$0xff] }
 0x283   : > { %6778 = vmatprep.mubr.msk.f32.mxu0 %vm8295_vm0, %v11836_v32  ;;  %7032 = vmatprep.mubr.msk.f32.mxu1 %vm8295_vm0, %v11836_v32 }
 0x286   : > { %6779 = vmatmul.mubr.msk.f32.gmra.mrb[126].mxu0 %vm336_vm1, %v11880_v20  ;;  %7033 = vmatmul.mubr.msk.f32.gmra.mrb[38].mxu1 %vm336_vm1, %v10049_v30  ;;  %v10073_v20 = vsel %vm2881_vm5, %v2917_v26, %v2919_v22  ;;  %v2923_v26 = vrot.slane %v9071_v60, 1  ;;  %v11885_v60 = vld [vmem:[#allocation46_spill] sm:$0xff] }
 0x287   : > { %6781 = vmatprep.mubr.msk.f32.mxu0 %vm8295_vm0, %v11836_v32  ;;  %7035 = vmatprep.mubr.msk.f32.mxu1 %vm8295_vm0, %v11836_v32 }
 0x28a   : > { %6782 = vmatmul.mubr.msk.f32.gmra.mrb[128].mxu0 %vm336_vm1, %v11881_v55  ;;  %7036 = vmatmul.mubr.msk.f32.gmra.mrb[40].mxu1 %vm336_vm1, %v10061_v29  ;;  %v10085_v55 = vsel %vm2881_vm5, %v2919_v22, %v2921_v35  ;;  %v2925_v22 = vrot.slane %v9080_v62, 1  ;;  %v11886_v62 = vld [vmem:[#allocation47_spill] sm:$0xff] }
 0x28b   : > { %6784 = vmatprep.mubr.msk.f32.mxu0 %vm8295_vm0, %v11836_v32  ;;  %7038 = vmatprep.mubr.msk.f32.mxu1 %vm8295_vm0, %v11836_v32 }
 0x28e   : > { %6785 = vmatmul.mubr.msk.f32.gmra.mrb[130].mxu0 %vm336_vm1, %v11882_v56  ;;  %7039 = vmatmul.mubr.msk.f32.gmra.mrb[42].mxu1 %vm336_vm1, %v10073_v20  ;;  %v10097_v56 = vsel %vm2881_vm5, %v2921_v35, %v2923_v26  ;;  %v2927_v35 = vrot.slane %v9089_v63, 1  ;;  %v11887_v63 = vld [vmem:[#allocation48_spill] sm:$0xff] }
 0x28f   : > { %6787 = vmatprep.mubr.msk.f32.mxu0 %vm8295_vm0, %v11836_v32  ;;  %7041 = vmatprep.mubr.msk.f32.mxu1 %vm8295_vm0, %v11836_v32 }
 0x292   : > { %6788 = vmatmul.mubr.msk.f32.gmra.mrb[132].mxu0 %vm336_vm1, %v11883_v57  ;;  %7042 = vmatmul.mubr.msk.f32.gmra.mrb[44].mxu1 %vm336_vm1, %v10085_v55  ;;  %v10109_v57 = vsel %vm2881_vm5, %v2923_v26, %v2925_v22  ;;  %v2929_v26 = vrot.slane %v9098_v1, 1  ;;  %v11888_v1 = vld [vmem:[#allocation49_spill] sm:$0xff] }
 0x293   : > { %6790 = vmatprep.mubr.msk.f32.mxu0 %vm8295_vm0, %v11836_v32  ;;  %7044 = vmatprep.mubr.msk.f32.mxu1 %vm8295_vm0, %v11836_v32 }
 0x296   : > { %6791 = vmatmul.mubr.msk.f32.gmra.mrb[134].mxu0 %vm336_vm1, %v11884_v59  ;;  %7045 = vmatmul.mubr.msk.f32.gmra.mrb[46].mxu1 %vm336_vm1, %v10097_v56  ;;  %v10121_v59 = vsel %vm2881_vm5, %v2925_v22, %v2927_v35  ;;  %v2931_v22 = vrot.slane %v9107_v3, 1  ;;  %v11889_v3 = vld [vmem:[#allocation50_spill] sm:$0xff] }
 0x297   : > { %6793 = vmatprep.mubr.msk.f32.mxu0 %vm8295_vm0, %v11836_v32  ;;  %7047 = vmatprep.mubr.msk.f32.mxu1 %vm8295_vm0, %v11836_v32 }
 0x29a   : > { %6794 = vmatmul.mubr.msk.f32.gmra.mrb[136].mxu0 %vm336_vm1, %v11885_v60  ;;  %7048 = vmatmul.mubr.msk.f32.gmra.mrb[48].mxu1 %vm336_vm1, %v10109_v57  ;;  %v10133_v60 = vsel %vm2881_vm5, %v2927_v35, %v2929_v26  ;;  %v2933_v35 = vrot.slane %v9116_v6, 1  ;;  %v11890_v6 = vld [vmem:[#allocation51_spill] sm:$0xff] }
 0x29b   : > { %6796 = vmatprep.mubr.msk.f32.mxu0 %vm8295_vm0, %v11836_v32  ;;  %7050 = vmatprep.mubr.msk.f32.mxu1 %vm8295_vm0, %v11836_v32 }
 0x29e   : > { %6797 = vmatmul.mubr.msk.f32.gmra.mrb[138].mxu0 %vm336_vm1, %v11886_v62  ;;  %7051 = vmatmul.mubr.msk.f32.gmra.mrb[50].mxu1 %vm336_vm1, %v10121_v59  ;;  %v10145_v62 = vsel %vm2881_vm5, %v2929_v26, %v2931_v22  ;;  %v2935_v26 = vrot.slane %v9125_v7, 1  ;;  %v11891_v7 = vld [vmem:[#allocation52_spill] sm:$0xff] }
 0x29f   : > { %6799 = vmatprep.mubr.msk.f32.mxu0 %vm8295_vm0, %v11836_v32  ;;  %7053 = vmatprep.mubr.msk.f32.mxu1 %vm8295_vm0, %v11836_v32 }
 0x2a2   : > { %6800 = vmatmul.mubr.msk.f32.gmra.mrb[140].mxu0 %vm336_vm1, %v11887_v63  ;;  %7054 = vmatmul.mubr.msk.f32.gmra.mrb[52].mxu1 %vm336_vm1, %v10133_v60  ;;  %v10157_v63 = vsel %vm2881_vm5, %v2931_v22, %v2933_v35  ;;  %v2937_v22 = vrot.slane %v9134_v9, 1  ;;  %v11892_v9 = vld [vmem:[#allocation53_spill] sm:$0xff] }
 0x2a3   : > { %6802 = vmatprep.mubr.msk.f32.mxu0 %vm8295_vm0, %v11836_v32  ;;  %7056 = vmatprep.mubr.msk.f32.mxu1 %vm8295_vm0, %v11836_v32 }
 0x2a6   : > { %6803 = vmatmul.mubr.msk.f32.gmra.mrb[142].mxu0 %vm336_vm1, %v11888_v1  ;;  %7057 = vmatmul.mubr.msk.f32.gmra.mrb[54].mxu1 %vm336_vm1, %v10145_v62  ;;  %v10169_v1 = vsel %vm2881_vm5, %v2933_v35, %v2935_v26  ;;  %v2939_v35 = vrot.slane %v9143_v10, 1  ;;  %v11893_v10 = vld [vmem:[#allocation54_spill] sm:$0xff] }
 0x2a7   : > { %6805 = vmatprep.mubr.msk.f32.mxu0 %vm8295_vm0, %v11836_v32  ;;  %7059 = vmatprep.mubr.msk.f32.mxu1 %vm8295_vm0, %v11836_v32 }
 0x2aa   : > { %6806 = vmatmul.mubr.msk.f32.gmra.mrb[144].mxu0 %vm336_vm1, %v11889_v3  ;;  %7060 = vmatmul.mubr.msk.f32.gmra.mrb[56].mxu1 %vm336_vm1, %v10157_v63  ;;  %v10181_v3 = vsel %vm2881_vm5, %v2935_v26, %v2937_v22  ;;  %v2941_v26 = vrot.slane %v9152_v11, 1  ;;  %v11894_v11 = vld [vmem:[#allocation55_spill] sm:$0xff] }
 0x2ab   : > { %6808 = vmatprep.mubr.msk.f32.mxu0 %vm8295_vm0, %v11836_v32  ;;  %7062 = vmatprep.mubr.msk.f32.mxu1 %vm8295_vm0, %v11836_v32 }
 0x2ae   : > { %6809 = vmatmul.mubr.msk.f32.gmra.mrb[146].mxu0 %vm336_vm1, %v11890_v6  ;;  %7063 = vmatmul.mubr.msk.f32.gmra.mrb[58].mxu1 %vm336_vm1, %v10169_v1  ;;  %v10193_v6 = vsel %vm2881_vm5, %v2937_v22, %v2939_v35  ;;  %v2943_v22 = vrot.slane %v9161_v12, 1  ;;  %v11895_v12 = vld [vmem:[#allocation56_spill] sm:$0xff] }
 0x2af   : > { %6811 = vmatprep.mubr.msk.f32.mxu0 %vm8295_vm0, %v11836_v32  ;;  %7065 = vmatprep.mubr.msk.f32.mxu1 %vm8295_vm0, %v11836_v32 }
 0x2b2   : > { %6812 = vmatmul.mubr.msk.f32.gmra.mrb[148].mxu0 %vm336_vm1, %v11891_v7  ;;  %7066 = vmatmul.mubr.msk.f32.gmra.mrb[60].mxu1 %vm336_vm1, %v10181_v3  ;;  %v10205_v7 = vsel %vm2881_vm5, %v2939_v35, %v2941_v26  ;;  %v2945_v35 = vrot.slane %v9170_v13, 1  ;;  %v11896_v13 = vld [vmem:[#allocation57_spill] sm:$0xff] }
 0x2b3   : > { %6814 = vmatprep.mubr.msk.f32.mxu0 %vm8295_vm0, %v11836_v32  ;;  %7068 = vmatprep.mubr.msk.f32.mxu1 %vm8295_vm0, %v11836_v32 }
 0x2b6   : > { %6815 = vmatmul.mubr.msk.f32.gmra.mrb[150].mxu0 %vm336_vm1, %v11892_v9  ;;  %7069 = vmatmul.mubr.msk.f32.gmra.mrb[62].mxu1 %vm336_vm1, %v10193_v6  ;;  %v10217_v9 = vsel %vm2881_vm5, %v2941_v26, %v2943_v22  ;;  %v2947_v26 = vrot.slane %v9179_v14, 1  ;;  %v11897_v14 = vld [vmem:[#allocation58_spill] sm:$0xff] }
 0x2b7   : > { %6817 = vmatprep.mubr.msk.f32.mxu0 %vm8295_vm0, %v11836_v32  ;;  %7071 = vmatprep.mubr.msk.f32.mxu1 %vm8295_vm0, %v11836_v32 }
 0x2ba   : > { %6818 = vmatmul.mubr.msk.f32.gmra.mrb[152].mxu0 %vm336_vm1, %v11893_v10  ;;  %7072 = vmatmul.mubr.msk.f32.gmra.mrb[64].mxu1 %vm336_vm1, %v10205_v7  ;;  %v10229_v10 = vsel %vm2881_vm5, %v2943_v22, %v2945_v35  ;;  %v2949_v22 = vrot.slane %v9188_v15, 1  ;;  %v11898_v15 = vld [vmem:[#allocation59_spill] sm:$0xff] }
 0x2bb   : > { %6820 = vmatprep.mubr.msk.f32.mxu0 %vm8295_vm0, %v11836_v32  ;;  %7074 = vmatprep.mubr.msk.f32.mxu1 %vm8295_vm0, %v11836_v32 }
 0x2be   : > { %6821 = vmatmul.mubr.msk.f32.gmra.mrb[154].mxu0 %vm336_vm1, %v11894_v11  ;;  %7075 = vmatmul.mubr.msk.f32.gmra.mrb[66].mxu1 %vm336_vm1, %v10217_v9  ;;  %v10241_v11 = vsel %vm2881_vm5, %v2945_v35, %v2947_v26  ;;  %v2951_v35 = vrot.slane %v9197_v16, 1  ;;  %v11899_v16 = vld [vmem:[#allocation60_spill] sm:$0xff] }
 0x2bf   : > { %6823 = vmatprep.mubr.msk.f32.mxu0 %vm8295_vm0, %v11836_v32  ;;  %7077 = vmatprep.mubr.msk.f32.mxu1 %vm8295_vm0, %v11836_v32 }
 0x2c2   : > { %6824 = vmatmul.mubr.msk.f32.gmra.mrb[156].mxu0 %vm336_vm1, %v11895_v12  ;;  %7078 = vmatmul.mubr.msk.f32.gmra.mrb[68].mxu1 %vm336_vm1, %v10229_v10  ;;  %v10253_v12 = vsel %vm2881_vm5, %v2947_v26, %v2949_v22  ;;  %v2953_v26 = vrot.slane %v9212_v34, 1  ;;  %v11900_v34 = vld [vmem:[#allocation61_spill] sm:$0xff] }
 0x2c3   : > { %6826 = vmatprep.mubr.msk.f32.mxu0 %vm8295_vm0, %v11836_v32  ;;  %7080 = vmatprep.mubr.msk.f32.mxu1 %vm8295_vm0, %v11836_v32 }
 0x2c6   : > { %6827 = vmatmul.mubr.msk.f32.gmra.mrb[158].mxu0 %vm336_vm1, %v11896_v13  ;;  %7081 = vmatmul.mubr.msk.f32.gmra.mrb[70].mxu1 %vm336_vm1, %v10241_v11  ;;  %v10265_v13 = vsel %vm2881_vm5, %v2949_v22, %v2951_v35  ;;  %v2955_v22 = vrot.slane %v9223_v40, 1 }
 0x2c7   : > { %6829 = vmatprep.mubr.msk.f32.mxu0 %vm8295_vm0, %v11836_v32  ;;  %7083 = vmatprep.mubr.msk.f32.mxu1 %vm8295_vm0, %v11836_v32 }
 0x2ca   : > { %6830 = vmatmul.mubr.msk.f32.gmra.mrb[160].mxu0 %vm336_vm1, %v11897_v14  ;;  %7084 = vmatmul.mubr.msk.f32.gmra.mrb[72].mxu1 %vm336_vm1, %v10253_v12  ;;  %v10277_v14 = vsel %vm2881_vm5, %v2951_v35, %v2953_v26  ;;  %v2957_v35 = vrot.slane %v9245_v18, 1 }
 0x2cb   : > { %6832 = vmatprep.mubr.msk.f32.mxu0 %vm8295_vm0, %v11836_v32  ;;  %7086 = vmatprep.mubr.msk.f32.mxu1 %vm8295_vm0, %v11836_v32 }
 0x2ce   : > { %6833 = vmatmul.mubr.msk.f32.gmra.mrb[162].mxu0 %vm336_vm1, %v11898_v15  ;;  %7087 = vmatmul.mubr.msk.f32.gmra.mrb[74].mxu1 %vm336_vm1, %v10265_v13  ;;  %v10289_v15 = vsel %vm2881_vm5, %v2953_v26, %v2955_v22  ;;  %v2959_v26 = vrot.slane %v9803_v17, 1 }
 0x2cf   : > { %6835 = vmatprep.mubr.msk.f32.mxu0 %vm8295_vm0, %v11836_v32  ;;  %7089 = vmatprep.mubr.msk.f32.mxu1 %vm8295_vm0, %v11836_v32 }
 0x2d2   : > { %6836 = vmatmul.mubr.msk.f32.gmra.mrb[164].mxu0 %vm336_vm1, %v11899_v16  ;;  %7090 = vmatmul.mubr.msk.f32.gmra.mrb[76].mxu1 %vm336_vm1, %v10277_v14  ;;  %v10301_v16 = vsel %vm2881_vm5, %v2955_v22, %v2957_v35  ;;  %v2961_v22 = vrot.slane %v9815_v8, 1 }
 0x2d3   : > { %6838 = vmatprep.mubr.msk.f32.mxu0 %vm8295_vm0, %v11836_v32  ;;  %7092 = vmatprep.mubr.msk.f32.mxu1 %vm8295_vm0, %v11836_v32 }
 0x2d6   : > { %6839 = vmatmul.mubr.msk.f32.gmra.mrb[166].mxu0 %vm336_vm1, %v11900_v34  ;;  %7093 = vmatmul.mubr.msk.f32.gmra.mrb[78].mxu1 %vm336_vm1, %v10289_v15  ;;  %v10313_v34 = vsel %vm2881_vm5, %v2957_v35, %v2959_v26  ;;  %v5760_v35 = vld [vmem:[%s11684_s6 + $0x68] sm:$0xff] }
 0x2d7   : > { %6841 = vmatprep.mubr.msk.f32.mxu0 %vm8295_vm0, %v11836_v32  ;;  %7095 = vmatprep.mubr.msk.f32.mxu1 %vm8295_vm0, %v11836_v32 }
 0x2da   : > { %6842 = vmatmul.mubr.msk.f32.gmra.mrb[168].mxu0 %vm336_vm1, %v9782_v25  ;;  %7096 = vmatmul.mubr.msk.f32.gmra.mrb[80].mxu1 %vm336_vm1, %v10301_v16  ;;  %v10325_v25 = vsel %vm2881_vm5, %v2959_v26, %v2961_v22  ;;  %v11902_v26 = vld [vmem:[#allocation32_spill] sm:$0xff] }
 0x2db   : > { %7098 = vmatprep.mubr.msk.f32.mxu1 %vm8295_vm0, %v11836_v32  ;;  %7492 = vmatprep.mubr.msk.f32.mxu0 %vm8295_vm0, %v11836_v32  ;;  %11901 = vst [vmem:[#allocation8_spill] sm:$0xff] %v10325_v25  ;;  %v11903_v8 = vrot.slane %v11902_v26, 1 }
 0x2de   : > { %7099 = vmatmul.mubr.msk.f32.gmra.mrb[0].mxu1 %vm336_vm1, %v10313_v34  ;;  %7493 = vmatmul.mubr.msk.f32.vlgmr.msra.gmra.mrb[176].mxu0 %vm336_vm1, %v11871_v19  ;;  %v5759_v19 = vld [vmem:[%s11684_s6 + $0x60] sm:$0xff] }
 0x2df   : > { %7101 = vmatprep.mubr.msk.f32.mxu1 %vm8295_vm0, %v11836_v32  ;;  %7495 = vmatprep.mubr.msk.f32.mxu0 %vm8295_vm0, %v11836_v32 }
 0x2e2   : > { %7102 = vmatmul.mubr.msk.f32.gmra.mrb[2].mxu1 %vm336_vm1, %v10325_v25  ;;  %7496 = vmatmul.mubr.msk.f32.gmra.mrb[178].mxu0 %vm336_vm1, %v11870_v21  ;;  %v10344_v25 = vsel %vm2881_vm5, %v2961_v22, %v11903_v8  ;;  %v7637_v21 = vpack.c.bf16 %v5760_v35, %v5759_v19  ;;  %v11904_v8 = vld [vmem:[#allocation10_spill] sm:$0xff]  ;;  %v11909_v19 = vld [vmem:[#allocation12_spill] sm:$0xff] }
 0x2e3   : > { %7104 = vmatprep.mubr.msk.f32.mxu1 %vm8295_vm0, %v11836_v32  ;;  %7498 = vmatprep.mubr.msk.f32.mxu0 %vm8295_vm0, %v11836_v32 }
 0x2e6   : > { %7105 = vmatmul.mubr.msk.f32.gmra.mrb[4].mxu1 %vm336_vm1, %v10344_v25  ;;  %7499 = vmatmul.mubr.msk.f32.gmra.mrb[180].mxu0 %vm336_vm1, %v11872_v27 }
 0x2e7   : > { %7111 = vmatprep.mubr.msk.f32.mxu1 %vm8295_vm0, %v11836_v32  ;;  %7501 = vmatprep.mubr.msk.f32.mxu0 %vm8295_vm0, %v11836_v32 }
 0x2ea   : > { %7112 = vmatmul.mubr.msk.f32.vlgmr.msra.gmra.mrb[6].mxu1 %vm336_vm1, %v9875_v31  ;;  %7502 = vmatmul.mubr.msk.f32.gmra.mrb[182].mxu0 %vm336_vm1, %v8892_v37 }
 0x2eb   : > { %7638 = vmatpush3.bf16.msra.mxu1 %v7637_v21  ;;  %7114 = vmatprep.mubr.msk.f32.mxu1 %vm8295_vm0, %v11836_v32  ;;  %v11910_v21 = vld [vmem:[#allocation13_spill] sm:$0xff] }
 0x2ec   : > { %7504 = vmatprep.mubr.msk.f32.mxu0 %vm8295_vm0, %v11836_v32  ;;  %7639 = vmatprep.subr.bf16.mxu1 %v11874_v33 }
 0x2ee   : > { %7115 = vmatmul.mubr.msk.f32.gmra.mrb[8].mxu1 %vm336_vm1, %v9887_v38  ;;  %7505 = vmatmul.mubr.msk.f32.gmra.mrb[184].mxu0 %vm336_vm1, %v8907_v28 }
 0x2ef   : > { %7117 = vmatprep.mubr.msk.f32.mxu1 %vm8295_vm0, %v11836_v32  ;;  %7507 = vmatprep.mubr.msk.f32.mxu0 %vm8295_vm0, %v11836_v32 }
 0x2f2   : > { %7118 = vmatmul.mubr.msk.f32.gmra.mrb[10].mxu1 %vm336_vm1, %v9899_v58  ;;  %7508 = vmatmul.mubr.msk.f32.gmra.mrb[186].mxu0 %vm336_vm1, %v8920_v39 }
 0x2f3   : > { %7120 = vmatprep.mubr.msk.f32.mxu1 %vm8295_vm0, %v11836_v32  ;;  %7510 = vmatprep.mubr.msk.f32.mxu0 %vm8295_vm0, %v11836_v32 }
 0x2f6   : > { %7121 = vmatmul.mubr.msk.f32.gmra.mrb[12].mxu1 %vm336_vm1, %v9911_v41  ;;  %7511 = vmatmul.mubr.msk.f32.gmra.mrb[188].mxu0 %vm336_vm1, %v8929_v49 }
 0x2f7   : > { %7123 = vmatprep.mubr.msk.f32.mxu1 %vm8295_vm0, %v11836_v32  ;;  %7513 = vmatprep.mubr.msk.f32.mxu0 %vm8295_vm0, %v11836_v32 }
 0x2fa   : > { %7124 = vmatmul.mubr.msk.f32.gmra.mrb[14].mxu1 %vm336_vm1, %v9929_v24  ;;  %7514 = vmatmul.mubr.msk.f32.gmra.mrb[190].mxu0 %vm336_vm1, %v11904_v8 }
 0x2fb   : > { %7126 = vmatprep.mubr.msk.f32.mxu1 %vm8295_vm0, %v11836_v32  ;;  %7516 = vmatprep.mubr.msk.f32.mxu0 %vm8295_vm0, %v11836_v32 }
 0x2fe   : > { %7127 = vmatmul.mubr.msk.f32.gmra.mrb[16].mxu1 %vm336_vm1, %v9941_v2  ;;  %7517 = vmatmul.mubr.msk.f32.gmra.mrb[192].mxu0 %vm336_vm1, %v8954_v44 }
 0x2ff   : > { %7129 = vmatprep.mubr.msk.f32.mxu1 %vm8295_vm0, %v11836_v32  ;;  %7519 = vmatprep.mubr.msk.f32.mxu0 %vm8295_vm0, %v11836_v32 }
 0x302   : > { %7130 = vmatmul.mubr.msk.f32.gmra.mrb[18].mxu1 %vm336_vm1, %v9953_v4  ;;  %7520 = vmatmul.mubr.msk.f32.gmra.mrb[194].mxu0 %vm336_vm1, %v8963_v23 }
 0x303   : > { %7132 = vmatprep.mubr.msk.f32.mxu1 %vm8295_vm0, %v11836_v32  ;;  %7522 = vmatprep.mubr.msk.f32.mxu0 %vm8295_vm0, %v11836_v32 }
 0x306   : > { %7133 = vmatmul.mubr.msk.f32.gmra.mrb[20].mxu1 %vm336_vm1, %v9965_v46  ;;  %7523 = vmatmul.mubr.msk.f32.gmra.mrb[196].mxu0 %vm336_vm1, %v8972_v61 }
 0x307   : > { %7135 = vmatprep.mubr.msk.f32.mxu1 %vm8295_vm0, %v11836_v32  ;;  %7525 = vmatprep.mubr.msk.f32.mxu0 %vm8295_vm0, %v11836_v32 }
 0x30a   : > { %7136 = vmatmul.mubr.msk.f32.gmra.mrb[22].mxu1 %vm336_vm1, %v9977_v5  ;;  %7526 = vmatmul.mubr.msk.f32.gmra.mrb[198].mxu0 %vm336_vm1, %v8981_v45 }
 0x30b   : > { %7138 = vmatprep.mubr.msk.f32.mxu1 %vm8295_vm0, %v11836_v32  ;;  %7528 = vmatprep.mubr.msk.f32.mxu0 %vm8295_vm0, %v11836_v32 }
 0x30d   : > { %v10427_v33 = vpop.f32.mrb[170].mxu0 }
 0x30e   : > { %11905 = vst [vmem:[#allocation6_spill] sm:$0xff] %v10427_v33  ;;  %v6719_v31 = vpop.f32.mrb[171].mxu0  ;;  %7139 = vmatmul.mubr.msk.f32.gmra.mrb[24].mxu1 %vm336_vm1, %v9989_v52  ;;  %7529 = vmatmul.mubr.msk.f32.gmra.mrb[200].mxu0 %vm336_vm1, %v8990_v47  ;;  %v11925_v33 = vld [vmem:[#allocation23_spill] sm:$0xff] }
 0x30f   : > { %7141 = vmatprep.mubr.msk.f32.mxu1 %vm8295_vm0, %v11836_v32  ;;  %7531 = vmatprep.mubr.msk.f32.mxu0 %vm8295_vm0, %v11836_v32 }
 0x311   : > { %v10437_v38 = vpop.f32.mrb[172].mxu0 }
 0x312   : > { %11906 = vst [vmem:[#allocation9_spill] sm:$0xff] %v10437_v38  ;;  %v6722_v58 = vpop.f32.mrb[173].mxu0  ;;  %7142 = vmatmul.mubr.msk.f32.gmra.mrb[26].mxu1 %vm336_vm1, %v10001_v43  ;;  %7532 = vmatmul.mubr.msk.f32.gmra.mrb[202].mxu0 %vm336_vm1, %v8999_v48  ;;  %v11923_v38 = vld [vmem:[#allocation22_spill] sm:$0xff] }
 0x313   : > { %7144 = vmatprep.mubr.msk.f32.mxu1 %vm8295_vm0, %v11836_v32  ;;  %7534 = vmatprep.mubr.msk.f32.mxu0 %vm8295_vm0, %v11836_v32  ;;  %v11911_v58 = vld [vmem:[#allocation14_spill] sm:$0xff] }
 0x315   : > { %v10447_v41 = vpop.f32.mrb[174].mxu0 }
 0x316   : > { %11907 = vst [vmem:[#allocation5_spill] sm:$0xff] %v10447_v41  ;;  %v6725_v24 = vpop.f32.mrb[175].mxu0  ;;  %7145 = vmatmul.mubr.msk.f32.gmra.mrb[28].mxu1 %vm336_vm1, %v10013_v36  ;;  %7535 = vmatmul.mubr.msk.f32.gmra.mrb[204].mxu0 %vm336_vm1, %v9008_v50  ;;  %v11921_v41 = vld [vmem:[#allocation21_spill] sm:$0xff] }
 0x317   : > { %7147 = vmatprep.mubr.msk.f32.mxu1 %vm8295_vm0, %v11836_v32  ;;  %7537 = vmatprep.mubr.msk.f32.mxu0 %vm8295_vm0, %v11836_v32 }
 0x319   : > { %v10457_v2 = vpop.f32.mrb[94].mxu0 }
 0x31a   : > { %v6732_v4 = vpop.f32.mrb[95].mxu0  ;;  %7148 = vmatmul.mubr.msk.f32.gmra.mrb[30].mxu1 %vm336_vm1, %v10025_v42  ;;  %7538 = vmatmul.mubr.msk.f32.gmra.mrb[206].mxu0 %vm336_vm1, %v9017_v51 }
 0x31b   : > { %7150 = vmatprep.mubr.msk.f32.mxu1 %vm8295_vm0, %v11836_v32  ;;  %7540 = vmatprep.mubr.msk.f32.mxu0 %vm8295_vm0, %v11836_v32  ;;  %v11912_v4 = vld [vmem:[#allocation15_spill] sm:$0xff] }
 0x31d   : > { %v10467_v46 = vpop.f32.mrb[96].mxu0 }
 0x31e   : > { %v6735_v5 = vpop.f32.mrb[97].mxu0  ;;  %7151 = vmatmul.mubr.msk.f32.gmra.mrb[32].mxu1 %vm336_vm1, %v10037_v0  ;;  %7541 = vmatmul.mubr.msk.f32.gmra.mrb[208].mxu0 %vm336_vm1, %v9026_v53  ;;  %v11908_v0 = vld [vmem:[#allocation11_spill] sm:$0xff] }
 0x31f   : > { %7153 = vmatprep.mubr.msk.f32.mxu1 %vm8295_vm0, %v11836_v32  ;;  %7543 = vmatprep.mubr.msk.f32.mxu0 %vm8295_vm0, %v11836_v32 }
 0x321   : > { %v10477_v52 = vpop.f32.mrb[98].mxu0 }
 0x322   : > { %v6738_v43 = vpop.f32.mrb[99].mxu0  ;;  %7154 = vmatmul.mubr.msk.f32.gmra.mrb[34].mxu1 %vm336_vm1, %v10049_v30  ;;  %7544 = vmatmul.mubr.msk.f32.gmra.mrb[210].mxu0 %vm336_vm1, %v9035_v54 }
 0x323   : > { %7156 = vmatprep.mubr.msk.f32.mxu1 %vm8295_vm0, %v11836_v32  ;;  %7546 = vmatprep.mubr.msk.f32.mxu0 %vm8295_vm0, %v11836_v32  ;;  %v11913_v43 = vld [vmem:[#allocation16_spill] sm:$0xff] }
 0x325   : > { %v10487_v36 = vpop.f32.mrb[100].mxu0 }
 0x326   : > { %v6741_v42 = vpop.f32.mrb[101].mxu0  ;;  %7157 = vmatmul.mubr.msk.f32.gmra.mrb[36].mxu1 %vm336_vm1, %v10061_v29  ;;  %7547 = vmatmul.mubr.msk.f32.gmra.mrb[212].mxu0 %vm336_vm1, %v11908_v0 }
 0x327   : > { %7159 = vmatprep.mubr.msk.f32.mxu1 %vm8295_vm0, %v11836_v32  ;;  %7549 = vmatprep.mubr.msk.f32.mxu0 %vm8295_vm0, %v11836_v32 }
 0x329   : > { %v10497_v30 = vpop.f32.mrb[102].mxu0 }
 0x32a   : > { %v6744_v22 = vpop.f32.mrb[103].mxu0  ;;  %7160 = vmatmul.mubr.msk.f32.gmra.mrb[38].mxu1 %vm336_vm1, %v10073_v20  ;;  %7550 = vmatmul.mubr.msk.f32.gmra.mrb[214].mxu0 %vm336_vm1, %v11909_v19 }
 0x32b   : > { %7162 = vmatprep.mubr.msk.f32.mxu1 %vm8295_vm0, %v11836_v32  ;;  %7552 = vmatprep.mubr.msk.f32.mxu0 %vm8295_vm0, %v11836_v32  ;;  %v11914_v22 = vld [vmem:[#allocation17_spill] sm:$0xff] }
 0x32d   : > { %v10507_v29 = vpop.f32.mrb[104].mxu0 }
 0x32e   : > { %v6747_v35 = vpop.f32.mrb[105].mxu0  ;;  %7163 = vmatmul.mubr.msk.f32.gmra.mrb[40].mxu1 %vm336_vm1, %v10085_v55  ;;  %7553 = vmatmul.mubr.msk.f32.gmra.mrb[216].mxu0 %vm336_vm1, %v11910_v21 }
 0x32f   : > { %7165 = vmatprep.mubr.msk.f32.mxu1 %vm8295_vm0, %v11836_v32  ;;  %7555 = vmatprep.mubr.msk.f32.mxu0 %vm8295_vm0, %v11836_v32 }
 0x331   : > { %v10517_v20 = vpop.f32.mrb[106].mxu0 }
 0x332   : > { %v6750_v31 = vpop.f32.mrb[107].mxu0  ;;  %7166 = vmatmul.mubr.msk.f32.gmra.mrb[42].mxu1 %vm336_vm1, %v10097_v56  ;;  %7556 = vmatmul.mubr.msk.f32.gmra.mrb[218].mxu0 %vm336_vm1, %v11911_v58 }
 0x333   : > { %7168 = vmatprep.mubr.msk.f32.mxu1 %vm8295_vm0, %v11836_v32  ;;  %7558 = vmatprep.mubr.msk.f32.mxu0 %vm8295_vm0, %v11836_v32  ;;  %v11915_v31 = vld [vmem:[#allocation18_spill] sm:$0xff] }
 0x335   : > { %v10527_v55 = vpop.f32.mrb[108].mxu0 }
 0x336   : > { %v6753_v24 = vpop.f32.mrb[109].mxu0  ;;  %7169 = vmatmul.mubr.msk.f32.gmra.mrb[44].mxu1 %vm336_vm1, %v10109_v57  ;;  %7559 = vmatmul.mubr.msk.f32.gmra.mrb[220].mxu0 %vm336_vm1, %v11912_v4 }
 0x337   : > { %7171 = vmatprep.mubr.msk.f32.mxu1 %vm8295_vm0, %v11836_v32  ;;  %7561 = vmatprep.mubr.msk.f32.mxu0 %vm8295_vm0, %v11836_v32 }
 0x339   : > { %v10537_v56 = vpop.f32.mrb[110].mxu0 }
 0x33a   : > { %v6756_v5 = vpop.f32.mrb[111].mxu0  ;;  %7172 = vmatmul.mubr.msk.f32.gmra.mrb[46].mxu1 %vm336_vm1, %v10121_v59  ;;  %7562 = vmatmul.mubr.msk.f32.gmra.mrb[222].mxu0 %vm336_vm1, %v11913_v43 }
 0x33b   : > { %7174 = vmatprep.mubr.msk.f32.mxu1 %vm8295_vm0, %v11836_v32  ;;  %7564 = vmatprep.mubr.msk.f32.mxu0 %vm8295_vm0, %v11836_v32  ;;  %v11917_v5 = vld [vmem:[#allocation19_spill] sm:$0xff] }
 0x33d   : > { %v10547_v57 = vpop.f32.mrb[112].mxu0 }
 0x33e   : > { %v6759_v42 = vpop.f32.mrb[113].mxu0  ;;  %7175 = vmatmul.mubr.msk.f32.gmra.mrb[48].mxu1 %vm336_vm1, %v10133_v60  ;;  %7565 = vmatmul.mubr.msk.f32.gmra.mrb[224].mxu0 %vm336_vm1, %v11914_v22 }
 0x33f   : > { %7177 = vmatprep.mubr.msk.f32.mxu1 %vm8295_vm0, %v11836_v32  ;;  %7567 = vmatprep.mubr.msk.f32.mxu0 %vm8295_vm0, %v11836_v32 }
 0x341   : > { %v10557_v59 = vpop.f32.mrb[114].mxu0 }
 0x342   : > { %v6762_v35 = vpop.f32.mrb[115].mxu0  ;;  %7178 = vmatmul.mubr.msk.f32.gmra.mrb[50].mxu1 %vm336_vm1, %v10145_v62  ;;  %7568 = vmatmul.mubr.msk.f32.gmra.mrb[226].mxu0 %vm336_vm1, %v11915_v31 }
 0x343   : > { %7180 = vmatprep.mubr.msk.f32.mxu1 %vm8295_vm0, %v11836_v32  ;;  %7570 = vmatprep.mubr.msk.f32.mxu0 %vm8295_vm0, %v11836_v32  ;;  %v11919_v35 = vld [vmem:[#allocation20_spill] sm:$0xff] }
 0x345   : > { %v10567_v60 = vpop.f32.mrb[116].mxu0 }
 0x346   : > { %11916 = vst [vmem:[#allocation7_spill] sm:$0xff] %v10567_v60  ;;  %v6765_v24 = vpop.f32.mrb[117].mxu0  ;;  %7181 = vmatmul.mubr.msk.f32.gmra.mrb[52].mxu1 %vm336_vm1, %v10157_v63  ;;  %7571 = vmatmul.mubr.msk.f32.gmra.mrb[228].mxu0 %vm336_vm1, %v11917_v5 }
 0x347   : > { %7183 = vmatprep.mubr.msk.f32.mxu1 %vm8295_vm0, %v11836_v32  ;;  %7573 = vmatprep.mubr.msk.f32.mxu0 %vm8295_vm0, %v11836_v32 }
 0x349   : > { %v10577_v62 = vpop.f32.mrb[118].mxu0 }
 0x34a   : > { %11918 = vst [vmem:[#allocation30_spill] sm:$0xff] %v10577_v62  ;;  %v6768_v42 = vpop.f32.mrb[119].mxu0  ;;  %7184 = vmatmul.mubr.msk.f32.gmra.mrb[54].mxu1 %vm336_vm1, %v10169_v1  ;;  %7574 = vmatmul.mubr.msk.f32.gmra.mrb[230].mxu0 %vm336_vm1, %v11919_v35  ;;  %v3689_v62 = vrot.slane %v8907_v28, 2 }
 0x34b   : > { %7186 = vmatprep.mubr.msk.f32.mxu1 %vm8295_vm0, %v11836_v32  ;;  %7576 = vmatprep.mubr.msk.f32.mxu0 %vm8295_vm0, %v11836_v32 }
 0x34d   : > { %v10587_v63 = vpop.f32.mrb[120].mxu0 }
 0x34e   : > { %11920 = vst [vmem:[#allocation31_spill] sm:$0xff] %v10587_v63  ;;  %v6771_v24 = vpop.f32.mrb[121].mxu0  ;;  %7187 = vmatmul.mubr.msk.f32.gmra.mrb[56].mxu1 %vm336_vm1, %v10181_v3  ;;  %7577 = vmatmul.mubr.msk.f32.gmra.mrb[232].mxu0 %vm336_vm1, %v11921_v41 }
 0x34f   : > { %7189 = vmatprep.mubr.msk.f32.mxu1 %vm8295_vm0, %v11836_v32  ;;  %7579 = vmatprep.mubr.msk.f32.mxu0 %vm8295_vm0, %v11836_v32 }
 0x351   : > { %v10597_v1 = vpop.f32.mrb[122].mxu0 }
 0x352   : > { %11922 = vst [vmem:[#allocation33_spill] sm:$0xff] %v10597_v1  ;;  %v6774_v42 = vpop.f32.mrb[123].mxu0  ;;  %7190 = vmatmul.mubr.msk.f32.gmra.mrb[58].mxu1 %vm336_vm1, %v10193_v6  ;;  %7580 = vmatmul.mubr.msk.f32.gmra.mrb[234].mxu0 %vm336_vm1, %v11923_v38 }
 0x353   : > { %7192 = vmatprep.mubr.msk.f32.mxu1 %vm8295_vm0, %v11836_v32  ;;  %7582 = vmatprep.mubr.msk.f32.mxu0 %vm8295_vm0, %v11836_v32 }
 0x355   : > { %v10607_v3 = vpop.f32.mrb[124].mxu0 }
 0x356   : > { %11924 = vst [vmem:[#allocation40_spill] sm:$0xff] %v10607_v3  ;;  %v6777_v24 = vpop.f32.mrb[125].mxu0  ;;  %7193 = vmatmul.mubr.msk.f32.gmra.mrb[60].mxu1 %vm336_vm1, %v10205_v7  ;;  %7583 = vmatmul.mubr.msk.f32.gmra.mrb[236].mxu0 %vm336_vm1, %v11925_v33  ;;  %v11927_v3 = vld [vmem:[#allocation24_spill] sm:$0xff] }
 0x357   : > { %7195 = vmatprep.mubr.msk.f32.mxu1 %vm8295_vm0, %v11836_v32  ;;  %7585 = vmatprep.mubr.msk.f32.mxu0 %vm8295_vm0, %v11836_v32 }
 0x359   : > { %v10617_v6 = vpop.f32.mrb[126].mxu0 }
 0x35a   : > { %11926 = vst [vmem:[#allocation41_spill] sm:$0xff] %v10617_v6  ;;  %v6780_v42 = vpop.f32.mrb[127].mxu0  ;;  %7196 = vmatmul.mubr.msk.f32.gmra.mrb[62].mxu1 %vm336_vm1, %v10217_v9  ;;  %7586 = vmatmul.mubr.msk.f32.gmra.mrb[238].mxu0 %vm336_vm1, %v11927_v3  ;;  %v11929_v6 = vld [vmem:[#allocation25_spill] sm:$0xff] }
 0x35b   : > { %7198 = vmatprep.mubr.msk.f32.mxu1 %vm8295_vm0, %v11836_v32  ;;  %7588 = vmatprep.mubr.msk.f32.mxu0 %vm8295_vm0, %v11836_v32 }
 0x35d   : > { %v10627_v7 = vpop.f32.mrb[128].mxu0 }
 0x35e   : > { %11928 = vst [vmem:[#allocation42_spill] sm:$0xff] %v10627_v7  ;;  %v6783_v24 = vpop.f32.mrb[129].mxu0  ;;  %7199 = vmatmul.mubr.msk.f32.gmra.mrb[64].mxu1 %vm336_vm1, %v10229_v10  ;;  %7589 = vmatmul.mubr.msk.f32.gmra.mrb[240].mxu0 %vm336_vm1, %v11929_v6  ;;  %v11931_v7 = vld [vmem:[#allocation26_spill] sm:$0xff] }
 0x35f   : > { %7201 = vmatprep.mubr.msk.f32.mxu1 %vm8295_vm0, %v11836_v32  ;;  %7591 = vmatprep.mubr.msk.f32.mxu0 %vm8295_vm0, %v11836_v32 }
 0x361   : > { %v10637_v9 = vpop.f32.mrb[130].mxu0 }
 0x362   : > { %11930 = vst [vmem:[#allocation43_spill] sm:$0xff] %v10637_v9  ;;  %v6786_v42 = vpop.f32.mrb[131].mxu0  ;;  %7202 = vmatmul.mubr.msk.f32.gmra.mrb[66].mxu1 %vm336_vm1, %v10241_v11  ;;  %7592 = vmatmul.mubr.msk.f32.gmra.mrb[242].mxu0 %vm336_vm1, %v11931_v7  ;;  %v11933_v9 = vld [vmem:[#allocation27_spill] sm:$0xff] }
 0x363   : > { %7204 = vmatprep.mubr.msk.f32.mxu1 %vm8295_vm0, %v11836_v32  ;;  %7594 = vmatprep.mubr.msk.f32.mxu0 %vm8295_vm0, %v11836_v32 }
 0x365   : > { %v10647_v10 = vpop.f32.mrb[132].mxu0 }
 0x366   : > { %11932 = vst [vmem:[#allocation44_spill] sm:$0xff] %v10647_v10  ;;  %v6789_v24 = vpop.f32.mrb[133].mxu0  ;;  %7205 = vmatmul.mubr.msk.f32.gmra.mrb[68].mxu1 %vm336_vm1, %v10253_v12  ;;  %7595 = vmatmul.mubr.msk.f32.gmra.mrb[244].mxu0 %vm336_vm1, %v11933_v9  ;;  %v11935_v10 = vld [vmem:[#allocation28_spill] sm:$0xff] }
 0x367   : > { %7207 = vmatprep.mubr.msk.f32.mxu1 %vm8295_vm0, %v11836_v32  ;;  %7597 = vmatprep.mubr.msk.f32.mxu0 %vm8295_vm0, %v11836_v32 }
 0x369   : > { %v10657_v11 = vpop.f32.mrb[134].mxu0 }
 0x36a   : > { %11934 = vst [vmem:[#allocation45_spill] sm:$0xff] %v10657_v11  ;;  %v6792_v42 = vpop.f32.mrb[135].mxu0  ;;  %7208 = vmatmul.mubr.msk.f32.gmra.mrb[70].mxu1 %vm336_vm1, %v10265_v13  ;;  %7598 = vmatmul.mubr.msk.f32.gmra.mrb[246].mxu0 %vm336_vm1, %v11935_v10  ;;  %v11937_v11 = vld [vmem:[#allocation29_spill] sm:$0xff] }
 0x36b   : > { %7210 = vmatprep.mubr.msk.f32.mxu1 %vm8295_vm0, %v11836_v32  ;;  %7600 = vmatprep.mubr.msk.f32.mxu0 %vm8295_vm0, %v11836_v32 }
 0x36d   : > { %v10667_v12 = vpop.f32.mrb[136].mxu0 }
 0x36e   : > { %11936 = vst [vmem:[#allocation46_spill] sm:$0xff] %v10667_v12  ;;  %v6795_v24 = vpop.f32.mrb[137].mxu0  ;;  %7211 = vmatmul.mubr.msk.f32.gmra.mrb[72].mxu1 %vm336_vm1, %v10277_v14  ;;  %7601 = vmatmul.mubr.msk.f32.gmra.mrb[248].mxu0 %vm336_vm1, %v11937_v11 }
 0x36f   : > { %7213 = vmatprep.mubr.msk.f32.mxu1 %vm8295_vm0, %v11836_v32  ;;  %7603 = vmatprep.mubr.msk.f32.mxu0 %vm8295_vm0, %v11836_v32 }
 0x371   : > { %v10677_v13 = vpop.f32.mrb[138].mxu0 }
 0x372   : > { %11938 = vst [vmem:[#allocation47_spill] sm:$0xff] %v10677_v13  ;;  %v6798_v42 = vpop.f32.mrb[139].mxu0  ;;  %7214 = vmatmul.mubr.msk.f32.gmra.mrb[74].mxu1 %vm336_vm1, %v10289_v15  ;;  %7604 = vmatmul.mubr.msk.f32.gmra.mrb[250].mxu0 %vm336_vm1, %v9223_v40  ;;  %v11946_v13 = vld [vmem:[#allocation34_spill] sm:$0xff] }
 0x373   : > { %7216 = vmatprep.mubr.msk.f32.mxu1 %vm8295_vm0, %v11836_v32  ;;  %7606 = vmatprep.mubr.msk.f32.mxu0 %vm8295_vm0, %v11836_v32 }
 0x375   : > { %v10687_v14 = vpop.f32.mrb[140].mxu0 }
 0x376   : > { %11939 = vst [vmem:[#allocation48_spill] sm:$0xff] %v10687_v14  ;;  %v6801_v24 = vpop.f32.mrb[141].mxu0  ;;  %7217 = vmatmul.mubr.msk.f32.gmra.mrb[76].mxu1 %vm336_vm1, %v10301_v16  ;;  %7607 = vmatmul.mubr.msk.f32.gmra.mrb[252].mxu0 %vm336_vm1, %v9245_v18  ;;  %v11942_v14 = vld [vmem:[#allocation8_spill] sm:$0xff] }
 0x377   : > { %7219 = vmatprep.mubr.msk.f32.mxu1 %vm8295_vm0, %v11836_v32  ;;  %7609 = vmatprep.mubr.msk.f32.mxu0 %vm8295_vm0, %v11836_v32 }
 0x379   : > { %v10697_v15 = vpop.f32.mrb[142].mxu0 }
 0x37a   : > { %11940 = vst [vmem:[#allocation49_spill] sm:$0xff] %v10697_v15  ;;  %v6804_v42 = vpop.f32.mrb[143].mxu0  ;;  %7220 = vmatmul.mubr.msk.f32.gmra.mrb[78].mxu1 %vm336_vm1, %v10313_v34  ;;  %7610 = vmatmul.mubr.msk.f32.gmra.mrb[254].mxu0 %vm336_vm1, %v9803_v17  ;;  %v11943_v15 = vld [vmem:[#allocation62_spill] sm:$0xff] }
 0x37b   : > { %7222 = vmatprep.mubr.msk.f32.mxu1 %vm8295_vm0, %v11836_v32  ;;  %7612 = vmatprep.mubr.msk.f32.mxu0 %vm8295_vm0, %v11836_v32 }
 0x37d   : > { %v10707_v16 = vpop.f32.mrb[144].mxu0 }
 0x37e   : > { %11941 = vst [vmem:[#allocation50_spill] sm:$0xff] %v10707_v16  ;;  %v6807_v24 = vpop.f32.mrb[145].mxu0  ;;  %7223 = vmatmul.mubr.msk.f32.gmra.mrb[80].mxu1 %vm336_vm1, %v11942_v14  ;;  %7613 = vmatmul.mubr.msk.f32.gmra.mrb[0].mxu0 %vm336_vm1, %v11943_v15  ;;  %v5802_v14 = vld [vmem:[%s11684_s6 + $0x70] sm:$0xff] }
 0x37f   : > { %7225 = vmatprep.mubr.msk.f32.mxu1 %vm8295_vm0, %v11836_v32 }
 0x381   : > { %v10715_v34 = vpop.f32.mrb[146].mxu0 }
 0x382   : > { %11944 = vst [vmem:[#allocation51_spill] sm:$0xff] %v10715_v34  ;;  %v6810_v42 = vpop.f32.mrb[147].mxu0  ;;  %7226 = vmatmul.mubr.msk.f32.gmra.mrb[0].mxu1 %vm336_vm1, %v10344_v25  ;;  %v5803_v25 = vld [vmem:[%s11684_s6 + $0x78] sm:$0xff]  ;;  %v3687_v34 = vrot.slane %v8892_v37, 2 }
 0x383   : > { %7228 = vmatprep.mubr.msk.f32.mxu1 %vm8295_vm0, %v11836_v32  ;;  %v7640_v12 = vpack.c.bf16 %v5803_v25, %v5802_v14 }
 0x385   : > { %v10721_v16 = vpop.f32.mrb[148].mxu0 }
 0x386   : > { %11945 = vst [vmem:[#allocation52_spill] sm:$0xff] %v10721_v16  ;;  %v6813_v24 = vpop.f32.mrb[149].mxu0  ;;  %7229 = vmatmul.mubr.msk.f32.gmra.mrb[2].mxu1 %vm336_vm1, %v11946_v13  ;;  %v3686_v13 = vrot.slane %v11872_v27, 2 }
 0x387   : > { %7231 = vmatprep.mubr.msk.f32.mxu1 %vm8295_vm0, %v11836_v32  ;;  %v11948_v24 = vld [vmem:[#allocation37_spill] sm:$0xff] }
 0x388   : > { %v3688_v63 = vsel %vm3685_vm6, %v3686_v13, %v3687_v34 }
 0x389   : > { %v10733_v42 = vpop.f32.mrb[150].mxu0 }
 0x38a   : > { %11947 = vst [vmem:[#allocation53_spill] sm:$0xff] %v10733_v42  ;;  %v6816_v16 = vpop.f32.mrb[151].mxu0  ;;  %7232 = vmatmul.mubr.msk.f32.gmra.mrb[4].mxu1 %vm336_vm1, %v11948_v24  ;;  %v3690_v24 = vsel %vm3685_vm6, %v3687_v34, %v3689_v62  ;;  %v3691_v42 = vrot.slane %v8920_v39, 2 }
 0x38b   : > { %7238 = vmatprep.mubr.msk.f32.mxu1 %vm8295_vm0, %v11836_v32 }
 0x38d   : > { %v10741_v1 = vpop.f32.mrb[152].mxu0 }
 0x38e   : > { %11949 = vst [vmem:[#allocation54_spill] sm:$0xff] %v10741_v1  ;;  %v6819_v60 = vpop.f32.mrb[153].mxu0  ;;  %7239 = vmatmul.mubr.msk.f32.vlgmr.msra.gmra.mrb[6].mxu1 %vm336_vm1, %v3688_v63  ;;  %v3693_v63 = vrot.slane %v8929_v49, 2  ;;  %v3709_v1 = vrot.slane %v9008_v50, 2 }
 0x38f   : > { %7641 = vmatpush3.bf16.msra.mxu1 %v7640_v12  ;;  %7241 = vmatprep.mubr.msk.f32.mxu1 %vm8295_vm0, %v11836_v32  ;;  %v3692_v60 = vsel %vm3685_vm6, %v3689_v62, %v3691_v42 }
 0x390   : > { %v3694_v13 = vsel %vm3685_vm6, %v3691_v42, %v3693_v63 }
 0x391   : > { %v10748_v16 = vpop.f32.mrb[154].mxu0 }
 0x392   : > { %11950 = vst [vmem:[#allocation55_spill] sm:$0xff] %v10748_v16  ;;  %v6822_v14 = vpop.f32.mrb[155].mxu0  ;;  %7242 = vmatmul.mubr.msk.f32.gmra.mrb[8].mxu1 %vm336_vm1, %v3690_v24  ;;  %v3695_v24 = vrot.slane %v11904_v8, 2 }
 0x393   : > { %7244 = vmatprep.mubr.msk.f32.mxu1 %vm8295_vm0, %v11836_v32 }
 0x395   : > { %v10755_v25 = vpop.f32.mrb[156].mxu0 }
 0x396   : > { %11951 = vst [vmem:[#allocation56_spill] sm:$0xff] %v10755_v25  ;;  %v6825_v12 = vpop.f32.mrb[157].mxu0  ;;  %7245 = vmatmul.mubr.msk.f32.gmra.mrb[10].mxu1 %vm336_vm1, %v3692_v60  ;;  %v3697_v60 = vrot.slane %v8954_v44, 2 }
 0x397   : > { %7247 = vmatprep.mubr.msk.f32.mxu1 %vm8295_vm0, %v11836_v32  ;;  %v3696_v12 = vsel %vm3685_vm6, %v3693_v63, %v3695_v24 }
 0x399   : > { %v10762_v34 = vpop.f32.mrb[158].mxu0 }
 0x39a   : > { %11952 = vst [vmem:[#allocation57_spill] sm:$0xff] %v10762_v34  ;;  %v6828_v14 = vpop.f32.mrb[159].mxu0  ;;  %7248 = vmatmul.mubr.msk.f32.gmra.mrb[12].mxu1 %vm336_vm1, %v3694_v13  ;;  %v3699_v13 = vrot.slane %v8963_v23, 2 }
 0x39b   : > { %7250 = vmatprep.mubr.msk.f32.mxu1 %vm8295_vm0, %v11836_v32  ;;  %v3698_v14 = vsel %vm3685_vm6, %v3695_v24, %v3697_v60 }
 0x39d   : > { %v10769_v62 = vpop.f32.mrb[160].mxu0 }
 0x39e   : > { %11953 = vst [vmem:[#allocation58_spill] sm:$0xff] %v10769_v62  ;;  %v6831_v25 = vpop.f32.mrb[161].mxu0  ;;  %7251 = vmatmul.mubr.msk.f32.gmra.mrb[14].mxu1 %vm336_vm1, %v3696_v12  ;;  %v3701_v12 = vrot.slane %v8972_v61, 2 }
 0x39f   : > { %7253 = vmatprep.mubr.msk.f32.mxu1 %vm8295_vm0, %v11836_v32  ;;  %v3700_v25 = vsel %vm3685_vm6, %v3697_v60, %v3699_v13 }
 0x3a1   : > { %v10776_v42 = vpop.f32.mrb[162].mxu0 }
 0x3a2   : > { %11954 = vst [vmem:[#allocation59_spill] sm:$0xff] %v10776_v42  ;;  %v6834_v34 = vpop.f32.mrb[163].mxu0  ;;  %7254 = vmatmul.mubr.msk.f32.gmra.mrb[16].mxu1 %vm336_vm1, %v3698_v14  ;;  %v3703_v14 = vrot.slane %v8981_v45, 2 }
 0x3a3   : > { %7256 = vmatprep.mubr.msk.f32.mxu1 %vm8295_vm0, %v11836_v32  ;;  %v3702_v34 = vsel %vm3685_vm6, %v3699_v13, %v3701_v12 }
 0x3a4   : > { %v3704_v60 = vsel %vm3685_vm6, %v3701_v12, %v3703_v14  ;;  %v3707_v12 = vrot.slane %v8999_v48, 2 }
 0x3a5   : > { %v10783_v63 = vpop.f32.mrb[164].mxu0 }
 0x3a6   : > { %11955 = vst [vmem:[#allocation60_spill] sm:$0xff] %v10783_v63  ;;  %v6837_v62 = vpop.f32.mrb[165].mxu0  ;;  %7257 = vmatmul.mubr.msk.f32.gmra.mrb[18].mxu1 %vm336_vm1, %v3700_v25  ;;  %v3705_v25 = vrot.slane %v8990_v47, 2 }
 0x3a7   : > { %7259 = vmatprep.mubr.msk.f32.mxu1 %vm8295_vm0, %v11836_v32 }
 0x3a8   : > { %v3708_v16 = vsel %vm3685_vm6, %v3705_v25, %v3707_v12 }
 0x3a9   : > { %v10790_v24 = vpop.f32.mrb[166].mxu0 }
 0x3aa   : > { %11956 = vst [vmem:[#allocation61_spill] sm:$0xff] %v10790_v24  ;;  %v6840_v42 = vpop.f32.mrb[167].mxu0  ;;  %7260 = vmatmul.mubr.msk.f32.gmra.mrb[20].mxu1 %vm336_vm1, %v3702_v34  ;;  %v3706_v34 = vsel %vm3685_vm6, %v3703_v14, %v3705_v25 }
 0x3ab   : > { %7262 = vmatprep.mubr.msk.f32.mxu1 %vm8295_vm0, %v11836_v32  ;;  %v10810_v42 = vld [vmem:[%s11683_s5] ss:$0 sm:$0xff] }
 0x3ad   : > { %v10798_v62 = vpop.f32.mrb[168].mxu0 }
 0x3ae   : > { %11957 = vst [vmem:[#allocation32_spill] sm:$0xff] %v10798_v62  ;;  %v6843_v63 = vpop.f32.mrb[169].mxu0  ;;  %7263 = vmatmul.mubr.msk.f32.gmra.mrb[22].mxu1 %vm336_vm1, %v3704_v60 }
 0x3af   : > { %7265 = vmatprep.mubr.msk.f32.mxu1 %vm8295_vm0, %v11836_v32 }
 0x3b1   : > { %v4799_v13 = vpop.f32.mrb[176].mxu0 }
 0x3b2   : > { %v10815_v62 = vadd.f32 %v10810_v42, %v4799_v13  ;;  %7266 = vmatmul.mubr.msk.f32.gmra.mrb[24].mxu1 %vm336_vm1, %v3706_v34  ;;  %v7494_v63 = vpop.f32.mrb[177].mxu0 }
 0x3b3   : > { %7268 = vmatprep.mubr.msk.f32.mxu1 %vm8295_vm0, %v11836_v32  ;;  %v3710_v63 = vsel %vm3685_vm6, %v3707_v12, %v3709_v1  ;;  %v3713_v12 = vrot.slane %v9026_v53, 2 }
 0x3b4   : > { %11958 = vst [vmem:[#allocation10_spill] sm:$0xff] %v10815_v62  ;;  %v5003_v60 = vmax.f32 %v10815_v62, 0.0  ;;  %v3711_v62 = vrot.slane %v9017_v51, 2 }
 0x3b5   : > { %v4804_v24 = vpop.f32.mrb[178].mxu0 }
 0x3b6   : > { %5045 = vst.msk [vmem:[%s10823_s9] sm:$0xff] %vm5044_vm8, %v5003_v60  ;;  %v10828_v14 = vadd.f32 %v10810_v42, %v4804_v24  ;;  %7269 = vmatmul.mubr.msk.f32.gmra.mrb[26].mxu1 %vm336_vm1, %v3708_v16  ;;  %v7497_v13 = vpop.f32.mrb[179].mxu0 }
 0x3b7   : > { %7271 = vmatprep.mubr.msk.f32.mxu1 %vm8295_vm0, %v11836_v32 }
 0x3b8   : > { %11959 = vst [vmem:[#allocation11_spill] sm:$0xff] %v10828_v14  ;;  %v5004_v25 = vmax.f32 %v10828_v14, 0.0  ;;  %v3712_v14 = vsel %vm3685_vm6, %v3709_v1, %v3711_v62  ;;  %v3715_v1 = vrot.slane %v9035_v54, 2 }
 0x3b9   : > { %v4809_v34 = vpop.f32.mrb[180].mxu0 }
 0x3ba   : > { %5046 = vst.msk [vmem:[%s10823_s9 + $0x8] sm:$0xff] %vm5044_vm8, %v5004_v25  ;;  %v10839_v60 = vadd.f32 %v10810_v42, %v4809_v34  ;;  %7272 = vmatmul.mubr.msk.f32.gmra.mrb[28].mxu1 %vm336_vm1, %v3710_v63  ;;  %v7500_v16 = vpop.f32.mrb[181].mxu0 }
 0x3bb   : > { %7274 = vmatprep.mubr.msk.f32.mxu1 %vm8295_vm0, %v11836_v32 }
 0x3bc   : > { %11960 = vst [vmem:[#allocation12_spill] sm:$0xff] %v10839_v60  ;;  %v5005_v24 = vmax.f32 %v10839_v60, 0.0  ;;  %v3714_v60 = vsel %vm3685_vm6, %v3711_v62, %v3713_v12  ;;  %v3717_v62 = vrot.slane %v11908_v0, 2 }
 0x3bd   : > { %v4814_v13 = vpop.f32.mrb[182].mxu0 }
 0x3be   : > { %5047 = vst.msk [vmem:[%s10823_s9 + $0x10] sm:$0xff] %vm5044_vm8, %v5005_v24  ;;  %v10850_v25 = vadd.f32 %v10810_v42, %v4814_v13  ;;  %7275 = vmatmul.mubr.msk.f32.gmra.mrb[30].mxu1 %vm336_vm1, %v3712_v14  ;;  %v7503_v34 = vpop.f32.mrb[183].mxu0 }
 0x3bf   : > { %7277 = vmatprep.mubr.msk.f32.mxu1 %vm8295_vm0, %v11836_v32 }
 0x3c0   : > { %11961 = vst [vmem:[#allocation13_spill] sm:$0xff] %v10850_v25  ;;  %v5006_v63 = vmax.f32 %v10850_v25, 0.0  ;;  %v3716_v25 = vsel %vm3685_vm6, %v3713_v12, %v3715_v1  ;;  %v3719_v12 = vrot.slane %v11909_v19, 2 }
 0x3c1   : > { %v4819_v16 = vpop.f32.mrb[184].mxu0 }
 0x3c2   : > { %5048 = vst.msk [vmem:[%s10823_s9 + $0x18] sm:$0xff] %vm5044_vm8, %v5006_v63  ;;  %v10861_v24 = vadd.f32 %v10810_v42, %v4819_v16  ;;  %7278 = vmatmul.mubr.msk.f32.gmra.mrb[32].mxu1 %vm336_vm1, %v3714_v60  ;;  %v7506_v14 = vpop.f32.mrb[185].mxu0 }
 0x3c3   : > { %7280 = vmatprep.mubr.msk.f32.mxu1 %vm8295_vm0, %v11836_v32 }
 0x3c4   : > { %11962 = vst [vmem:[#allocation14_spill] sm:$0xff] %v10861_v24  ;;  %v5007_v13 = vmax.f32 %v10861_v24, 0.0  ;;  %v3718_v24 = vsel %vm3685_vm6, %v3715_v1, %v3717_v62  ;;  %v3721_v1 = vrot.slane %v11910_v21, 2 }
 0x3c5   : > { %v4824_v34 = vpop.f32.mrb[186].mxu0 }
 0x3c6   : > { %5049 = vst.msk [vmem:[%s10823_s9 + $0x20] sm:$0xff] %vm5044_vm8, %v5007_v13  ;;  %v10872_v63 = vadd.f32 %v10810_v42, %v4824_v34  ;;  %7281 = vmatmul.mubr.msk.f32.gmra.mrb[34].mxu1 %vm336_vm1, %v3716_v25  ;;  %v7509_v60 = vpop.f32.mrb[187].mxu0 }
 0x3c7   : > { %7283 = vmatprep.mubr.msk.f32.mxu1 %vm8295_vm0, %v11836_v32 }
 0x3c8   : > { %11963 = vst [vmem:[#allocation15_spill] sm:$0xff] %v10872_v63  ;;  %v5008_v16 = vmax.f32 %v10872_v63, 0.0  ;;  %v3720_v63 = vsel %vm3685_vm6, %v3717_v62, %v3719_v12  ;;  %v3723_v62 = vrot.slane %v11911_v58, 2 }
 0x3c9   : > { %v4829_v14 = vpop.f32.mrb[188].mxu0 }
 0x3ca   : > { %5050 = vst.msk [vmem:[%s10823_s9 + $0x28] sm:$0xff] %vm5044_vm8, %v5008_v16  ;;  %v10883_v13 = vadd.f32 %v10810_v42, %v4829_v14  ;;  %7284 = vmatmul.mubr.msk.f32.gmra.mrb[36].mxu1 %vm336_vm1, %v3718_v24  ;;  %v7512_v25 = vpop.f32.mrb[189].mxu0 }
 0x3cb   : > { %7286 = vmatprep.mubr.msk.f32.mxu1 %vm8295_vm0, %v11836_v32 }
 0x3cc   : > { %11964 = vst [vmem:[#allocation16_spill] sm:$0xff] %v10883_v13  ;;  %v5009_v34 = vmax.f32 %v10883_v13, 0.0  ;;  %v3722_v13 = vsel %vm3685_vm6, %v3719_v12, %v3721_v1  ;;  %v3725_v12 = vrot.slane %v11912_v4, 2 }
 0x3cd   : > { %v4834_v60 = vpop.f32.mrb[190].mxu0 }
 0x3ce   : > { %5051 = vst.msk [vmem:[%s10823_s9 + $0x30] sm:$0xff] %vm5044_vm8, %v5009_v34  ;;  %v10894_v16 = vadd.f32 %v10810_v42, %v4834_v60  ;;  %7287 = vmatmul.mubr.msk.f32.gmra.mrb[38].mxu1 %vm336_vm1, %v3720_v63  ;;  %v7515_v24 = vpop.f32.mrb[191].mxu0 }
 0x3cf   : > { %7289 = vmatprep.mubr.msk.f32.mxu1 %vm8295_vm0, %v11836_v32 }
 0x3d0   : > { %11965 = vst [vmem:[#allocation17_spill] sm:$0xff] %v10894_v16  ;;  %v5010_v14 = vmax.f32 %v10894_v16, 0.0  ;;  %v3724_v16 = vsel %vm3685_vm6, %v3721_v1, %v3723_v62  ;;  %v3727_v1 = vrot.slane %v11913_v43, 2 }
 0x3d1   : > { %v4839_v25 = vpop.f32.mrb[192].mxu0 }
 0x3d2   : > { %5052 = vst.msk [vmem:[%s10823_s9 + $0x38] sm:$0xff] %vm5044_vm8, %v5010_v14  ;;  %v10905_v34 = vadd.f32 %v10810_v42, %v4839_v25  ;;  %7290 = vmatmul.mubr.msk.f32.gmra.mrb[40].mxu1 %vm336_vm1, %v3722_v13  ;;  %v7518_v63 = vpop.f32.mrb[193].mxu0 }
 0x3d3   : > { %7292 = vmatprep.mubr.msk.f32.mxu1 %vm8295_vm0, %v11836_v32 }
 0x3d4   : > { %11966 = vst [vmem:[#allocation18_spill] sm:$0xff] %v10905_v34  ;;  %v5011_v60 = vmax.f32 %v10905_v34, 0.0  ;;  %v3726_v34 = vsel %vm3685_vm6, %v3723_v62, %v3725_v12  ;;  %v3729_v62 = vrot.slane %v11914_v22, 2 }
 0x3d5   : > { %v4844_v24 = vpop.f32.mrb[194].mxu0 }
 0x3d6   : > { %5053 = vst.msk [vmem:[%s10823_s9 + $0x40] sm:$0xff] %vm5044_vm8, %v5011_v60  ;;  %v10916_v14 = vadd.f32 %v10810_v42, %v4844_v24  ;;  %7293 = vmatmul.mubr.msk.f32.gmra.mrb[42].mxu1 %vm336_vm1, %v3724_v16  ;;  %v7521_v13 = vpop.f32.mrb[195].mxu0 }
 0x3d7   : > { %7295 = vmatprep.mubr.msk.f32.mxu1 %vm8295_vm0, %v11836_v32 }
 0x3d8   : > { %11967 = vst [vmem:[#allocation19_spill] sm:$0xff] %v10916_v14  ;;  %v5012_v25 = vmax.f32 %v10916_v14, 0.0  ;;  %v3728_v14 = vsel %vm3685_vm6, %v3725_v12, %v3727_v1  ;;  %v3731_v12 = vrot.slane %v11915_v31, 2 }
 0x3d9   : > { %v4849_v63 = vpop.f32.mrb[196].mxu0 }
 0x3da   : > { %5054 = vst.msk [vmem:[%s10823_s9 + $0x48] sm:$0xff] %vm5044_vm8, %v5012_v25  ;;  %v10927_v60 = vadd.f32 %v10810_v42, %v4849_v63  ;;  %7296 = vmatmul.mubr.msk.f32.gmra.mrb[44].mxu1 %vm336_vm1, %v3726_v34  ;;  %v7524_v16 = vpop.f32.mrb[197].mxu0 }
 0x3db   : > { %7298 = vmatprep.mubr.msk.f32.mxu1 %vm8295_vm0, %v11836_v32 }
 0x3dc   : > { %11968 = vst [vmem:[#allocation20_spill] sm:$0xff] %v10927_v60  ;;  %v5013_v24 = vmax.f32 %v10927_v60, 0.0  ;;  %v3730_v60 = vsel %vm3685_vm6, %v3727_v1, %v3729_v62  ;;  %v3733_v1 = vrot.slane %v11917_v5, 2 }
 0x3dd   : > { %v4854_v13 = vpop.f32.mrb[198].mxu0 }
 0x3de   : > { %5055 = vst.msk [vmem:[%s10823_s9 + $0x50] sm:$0xff] %vm5044_vm8, %v5013_v24  ;;  %v10938_v25 = vadd.f32 %v10810_v42, %v4854_v13  ;;  %7299 = vmatmul.mubr.msk.f32.gmra.mrb[46].mxu1 %vm336_vm1, %v3728_v14  ;;  %v7527_v34 = vpop.f32.mrb[199].mxu0 }
 0x3df   : > { %7301 = vmatprep.mubr.msk.f32.mxu1 %vm8295_vm0, %v11836_v32 }
 0x3e0   : > { %11969 = vst [vmem:[#allocation21_spill] sm:$0xff] %v10938_v25  ;;  %v5014_v63 = vmax.f32 %v10938_v25, 0.0  ;;  %v3732_v25 = vsel %vm3685_vm6, %v3729_v62, %v3731_v12  ;;  %v3735_v62 = vrot.slane %v11919_v35, 2 }
 0x3e1   : > { %v4859_v16 = vpop.f32.mrb[200].mxu0 }
 0x3e2   : > { %5056 = vst.msk [vmem:[%s10823_s9 + $0x58] sm:$0xff] %vm5044_vm8, %v5014_v63  ;;  %v10949_v24 = vadd.f32 %v10810_v42, %v4859_v16  ;;  %7302 = vmatmul.mubr.msk.f32.gmra.mrb[48].mxu1 %vm336_vm1, %v3730_v60  ;;  %v7530_v14 = vpop.f32.mrb[201].mxu0 }
 0x3e3   : > { %7304 = vmatprep.mubr.msk.f32.mxu1 %vm8295_vm0, %v11836_v32 }
 0x3e4   : > { %11970 = vst [vmem:[#allocation22_spill] sm:$0xff] %v10949_v24  ;;  %v5015_v13 = vmax.f32 %v10949_v24, 0.0  ;;  %v3734_v24 = vsel %vm3685_vm6, %v3731_v12, %v3733_v1  ;;  %v3737_v12 = vrot.slane %v11921_v41, 2 }
 0x3e5   : > { %v4864_v34 = vpop.f32.mrb[202].mxu0 }
 0x3e6   : > { %5057 = vst.msk [vmem:[%s10823_s9 + $0x60] sm:$0xff] %vm5044_vm8, %v5015_v13  ;;  %v10960_v63 = vadd.f32 %v10810_v42, %v4864_v34  ;;  %7305 = vmatmul.mubr.msk.f32.gmra.mrb[50].mxu1 %vm336_vm1, %v3732_v25  ;;  %v7533_v60 = vpop.f32.mrb[203].mxu0 }
 0x3e7   : > { %7307 = vmatprep.mubr.msk.f32.mxu1 %vm8295_vm0, %v11836_v32 }
 0x3e8   : > { %11971 = vst [vmem:[#allocation23_spill] sm:$0xff] %v10960_v63  ;;  %v5016_v16 = vmax.f32 %v10960_v63, 0.0  ;;  %v3736_v63 = vsel %vm3685_vm6, %v3733_v1, %v3735_v62  ;;  %v3739_v1 = vrot.slane %v11923_v38, 2 }
 0x3e9   : > { %v4869_v14 = vpop.f32.mrb[204].mxu0 }
 0x3ea   : > { %5058 = vst.msk [vmem:[%s10823_s9 + $0x68] sm:$0xff] %vm5044_vm8, %v5016_v16  ;;  %v10971_v13 = vadd.f32 %v10810_v42, %v4869_v14  ;;  %7308 = vmatmul.mubr.msk.f32.gmra.mrb[52].mxu1 %vm336_vm1, %v3734_v24  ;;  %v7536_v25 = vpop.f32.mrb[205].mxu0 }
 0x3eb   : > { %7310 = vmatprep.mubr.msk.f32.mxu1 %vm8295_vm0, %v11836_v32 }
 0x3ec   : > { %11972 = vst [vmem:[#allocation24_spill] sm:$0xff] %v10971_v13  ;;  %v5017_v34 = vmax.f32 %v10971_v13, 0.0  ;;  %v3738_v13 = vsel %vm3685_vm6, %v3735_v62, %v3737_v12  ;;  %v3741_v62 = vrot.slane %v11925_v33, 2 }
 0x3ed   : > { %v4874_v60 = vpop.f32.mrb[206].mxu0 }
 0x3ee   : > { %5059 = vst.msk [vmem:[%s10823_s9 + $0x70] sm:$0xff] %vm5044_vm8, %v5017_v34  ;;  %v10982_v16 = vadd.f32 %v10810_v42, %v4874_v60  ;;  %7311 = vmatmul.mubr.msk.f32.gmra.mrb[54].mxu1 %vm336_vm1, %v3736_v63  ;;  %v7539_v24 = vpop.f32.mrb[207].mxu0 }
 0x3ef   : > { %7313 = vmatprep.mubr.msk.f32.mxu1 %vm8295_vm0, %v11836_v32 }
 0x3f0   : > { %11973 = vst [vmem:[#allocation25_spill] sm:$0xff] %v10982_v16  ;;  %v5018_v14 = vmax.f32 %v10982_v16, 0.0  ;;  %v3740_v16 = vsel %vm3685_vm6, %v3737_v12, %v3739_v1  ;;  %v3743_v12 = vrot.slane %v11927_v3, 2 }
 0x3f1   : > { %v4879_v25 = vpop.f32.mrb[208].mxu0 }
 0x3f2   : > { %5060 = vst.msk [vmem:[%s10823_s9 + $0x78] sm:$0xff] %vm5044_vm8, %v5018_v14  ;;  %v10993_v34 = vadd.f32 %v10810_v42, %v4879_v25  ;;  %7314 = vmatmul.mubr.msk.f32.gmra.mrb[56].mxu1 %vm336_vm1, %v3738_v13  ;;  %v7542_v63 = vpop.f32.mrb[209].mxu0 }
 0x3f3   : > { %7316 = vmatprep.mubr.msk.f32.mxu1 %vm8295_vm0, %v11836_v32 }
 0x3f4   : > { %11974 = vst [vmem:[#allocation26_spill] sm:$0xff] %v10993_v34  ;;  %v5019_v60 = vmax.f32 %v10993_v34, 0.0  ;;  %v3742_v34 = vsel %vm3685_vm6, %v3739_v1, %v3741_v62  ;;  %v3745_v1 = vrot.slane %v11929_v6, 2 }
 0x3f5   : > { %v4884_v24 = vpop.f32.mrb[210].mxu0 }
 0x3f6   : > { %5061 = vst.msk [vmem:[%s10823_s9 + $0x80] sm:$0xff] %vm5044_vm8, %v5019_v60  ;;  %v11004_v14 = vadd.f32 %v10810_v42, %v4884_v24  ;;  %7317 = vmatmul.mubr.msk.f32.gmra.mrb[58].mxu1 %vm336_vm1, %v3740_v16  ;;  %v7545_v13 = vpop.f32.mrb[211].mxu0 }
 0x3f7   : > { %7319 = vmatprep.mubr.msk.f32.mxu1 %vm8295_vm0, %v11836_v32 }
 0x3f8   : > { %11975 = vst [vmem:[#allocation27_spill] sm:$0xff] %v11004_v14  ;;  %v5020_v25 = vmax.f32 %v11004_v14, 0.0  ;;  %v3744_v14 = vsel %vm3685_vm6, %v3741_v62, %v3743_v12  ;;  %v3747_v62 = vrot.slane %v11931_v7, 2 }
 0x3f9   : > { %v4889_v63 = vpop.f32.mrb[212].mxu0 }
 0x3fa   : > { %5062 = vst.msk [vmem:[%s10823_s9 + $0x88] sm:$0xff] %vm5044_vm8, %v5020_v25  ;;  %v11015_v60 = vadd.f32 %v10810_v42, %v4889_v63  ;;  %7320 = vmatmul.mubr.msk.f32.gmra.mrb[60].mxu1 %vm336_vm1, %v3742_v34  ;;  %v7548_v16 = vpop.f32.mrb[213].mxu0 }
 0x3fb   : > { %7322 = vmatprep.mubr.msk.f32.mxu1 %vm8295_vm0, %v11836_v32 }
 0x3fc   : > { %11976 = vst [vmem:[#allocation28_spill] sm:$0xff] %v11015_v60  ;;  %v5021_v24 = vmax.f32 %v11015_v60, 0.0  ;;  %v3746_v60 = vsel %vm3685_vm6, %v3743_v12, %v3745_v1  ;;  %v3749_v12 = vrot.slane %v11933_v9, 2 }
 0x3fd   : > { %v4894_v13 = vpop.f32.mrb[214].mxu0 }
 0x3fe   : > { %5063 = vst.msk [vmem:[%s10823_s9 + $0x90] sm:$0xff] %vm5044_vm8, %v5021_v24  ;;  %v11026_v25 = vadd.f32 %v10810_v42, %v4894_v13  ;;  %7323 = vmatmul.mubr.msk.f32.gmra.mrb[62].mxu1 %vm336_vm1, %v3744_v14  ;;  %v7551_v34 = vpop.f32.mrb[215].mxu0 }
 0x3ff   : > { %7325 = vmatprep.mubr.msk.f32.mxu1 %vm8295_vm0, %v11836_v32 }
 0x400   : > { %11977 = vst [vmem:[#allocation29_spill] sm:$0xff] %v11026_v25  ;;  %v5022_v63 = vmax.f32 %v11026_v25, 0.0  ;;  %v3748_v25 = vsel %vm3685_vm6, %v3745_v1, %v3747_v62  ;;  %v3751_v1 = vrot.slane %v11935_v10, 2 }
 0x401   : > { %v4899_v16 = vpop.f32.mrb[216].mxu0 }
 0x402   : > { %5064 = vst.msk [vmem:[%s10823_s9 + $0x98] sm:$0xff] %vm5044_vm8, %v5022_v63  ;;  %v11037_v24 = vadd.f32 %v10810_v42, %v4899_v16  ;;  %7326 = vmatmul.mubr.msk.f32.gmra.mrb[64].mxu1 %vm336_vm1, %v3746_v60  ;;  %v7554_v14 = vpop.f32.mrb[217].mxu0 }
 0x403   : > { %7328 = vmatprep.mubr.msk.f32.mxu1 %vm8295_vm0, %v11836_v32 }
 0x404   : > { %11978 = vst [vmem:[#allocation8_spill] sm:$0xff] %v11037_v24  ;;  %v5023_v13 = vmax.f32 %v11037_v24, 0.0  ;;  %v3750_v24 = vsel %vm3685_vm6, %v3747_v62, %v3749_v12  ;;  %v3753_v62 = vrot.slane %v11937_v11, 2 }
 0x405   : > { %v4904_v34 = vpop.f32.mrb[218].mxu0 }
 0x406   : > { %5065 = vst.msk [vmem:[%s10823_s9 + $0xa0] sm:$0xff] %vm5044_vm8, %v5023_v13  ;;  %v11048_v63 = vadd.f32 %v10810_v42, %v4904_v34  ;;  %7329 = vmatmul.mubr.msk.f32.gmra.mrb[66].mxu1 %vm336_vm1, %v3748_v25  ;;  %v7557_v60 = vpop.f32.mrb[219].mxu0 }
 0x407   : > { %7331 = vmatprep.mubr.msk.f32.mxu1 %vm8295_vm0, %v11836_v32 }
 0x408   : > { %11979 = vst [vmem:[#allocation62_spill] sm:$0xff] %v11048_v63  ;;  %v5024_v16 = vmax.f32 %v11048_v63, 0.0  ;;  %v3752_v63 = vsel %vm3685_vm6, %v3749_v12, %v3751_v1  ;;  %v3755_v12 = vrot.slane %v9223_v40, 2 }
 0x409   : > { %v4909_v14 = vpop.f32.mrb[220].mxu0 }
 0x40a   : > { %5066 = vst.msk [vmem:[%s10823_s9 + $0xa8] sm:$0xff] %vm5044_vm8, %v5024_v16  ;;  %v11059_v13 = vadd.f32 %v10810_v42, %v4909_v14  ;;  %7332 = vmatmul.mubr.msk.f32.gmra.mrb[68].mxu1 %vm336_vm1, %v3750_v24  ;;  %v7560_v25 = vpop.f32.mrb[221].mxu0 }
 0x40b   : > { %7334 = vmatprep.mubr.msk.f32.mxu1 %vm8295_vm0, %v11836_v32 }
 0x40c   : > { %11980 = vst [vmem:[#allocation34_spill] sm:$0xff] %v11059_v13  ;;  %v5025_v34 = vmax.f32 %v11059_v13, 0.0  ;;  %v3754_v13 = vsel %vm3685_vm6, %v3751_v1, %v3753_v62  ;;  %v3757_v1 = vrot.slane %v9245_v18, 2 }
 0x40d   : > { %v4914_v60 = vpop.f32.mrb[222].mxu0 }
 0x40e   : > { %5067 = vst.msk [vmem:[%s10823_s9 + $0xb0] sm:$0xff] %vm5044_vm8, %v5025_v34  ;;  %v11070_v16 = vadd.f32 %v10810_v42, %v4914_v60  ;;  %7335 = vmatmul.mubr.msk.f32.gmra.mrb[70].mxu1 %vm336_vm1, %v3752_v63  ;;  %v7563_v24 = vpop.f32.mrb[223].mxu0 }
 0x40f   : > { %7337 = vmatprep.mubr.msk.f32.mxu1 %vm8295_vm0, %v11836_v32 }
 0x410   : > { %11981 = vst [vmem:[#allocation37_spill] sm:$0xff] %v11070_v16  ;;  %v5026_v14 = vmax.f32 %v11070_v16, 0.0  ;;  %v3756_v16 = vsel %vm3685_vm6, %v3753_v62, %v3755_v12  ;;  %v3759_v62 = vrot.slane %v9803_v17, 2 }
 0x411   : > { %v4919_v25 = vpop.f32.mrb[224].mxu0 }
 0x412   : > { %5068 = vst.msk [vmem:[%s10823_s9 + $0xb8] sm:$0xff] %vm5044_vm8, %v5026_v14  ;;  %v11081_v34 = vadd.f32 %v10810_v42, %v4919_v25  ;;  %7338 = vmatmul.mubr.msk.f32.gmra.mrb[72].mxu1 %vm336_vm1, %v3754_v13  ;;  %v7566_v63 = vpop.f32.mrb[225].mxu0 }
 0x413   : > { %7340 = vmatprep.mubr.msk.f32.mxu1 %vm8295_vm0, %v11836_v32 }
 0x414   : > { %11982 = vst [vmem:[#allocation63_spill] sm:$0xff] %v11081_v34  ;;  %v5027_v60 = vmax.f32 %v11081_v34, 0.0  ;;  %v3758_v34 = vsel %vm3685_vm6, %v3755_v12, %v3757_v1  ;;  %v3761_v12 = vrot.slane %v11943_v15, 2 }
 0x415   : > { %v4924_v24 = vpop.f32.mrb[226].mxu0 }
 0x416   : > { %5069 = vst.msk [vmem:[%s10823_s9 + $0xc0] sm:$0xff] %vm5044_vm8, %v5027_v60  ;;  %v11092_v14 = vadd.f32 %v10810_v42, %v4924_v24  ;;  %7341 = vmatmul.mubr.msk.f32.gmra.mrb[74].mxu1 %vm336_vm1, %v3756_v16  ;;  %v7569_v13 = vpop.f32.mrb[227].mxu0 }
 0x417   : > { %7343 = vmatprep.mubr.msk.f32.mxu1 %vm8295_vm0, %v11836_v32 }
 0x418   : > { %11983 = vst [vmem:[#allocation64_spill] sm:$0xff] %v11092_v14  ;;  %v5028_v25 = vmax.f32 %v11092_v14, 0.0  ;;  %v3760_v14 = vsel %vm3685_vm6, %v3757_v1, %v3759_v62 }
 0x419   : > { %v4929_v63 = vpop.f32.mrb[228].mxu0 }
 0x41a   : > { %5070 = vst.msk [vmem:[%s10823_s9 + $0xc8] sm:$0xff] %vm5044_vm8, %v5028_v25  ;;  %v11103_v60 = vadd.f32 %v10810_v42, %v4929_v63  ;;  %7344 = vmatmul.mubr.msk.f32.gmra.mrb[76].mxu1 %vm336_vm1, %v3758_v34  ;;  %v7572_v16 = vpop.f32.mrb[229].mxu0 }
 0x41b   : > { %7346 = vmatprep.mubr.msk.f32.mxu1 %vm8295_vm0, %v11836_v32 }
 0x41c   : > { %11984 = vst [vmem:[#allocation65_spill] sm:$0xff] %v11103_v60  ;;  %v5029_v24 = vmax.f32 %v11103_v60, 0.0  ;;  %v3762_v60 = vsel %vm3685_vm6, %v3759_v62, %v3761_v12 }
 0x41d   : > { %v4934_v13 = vpop.f32.mrb[230].mxu0 }
 0x41e   : > { %5071 = vst.msk [vmem:[%s10823_s9 + $0xd0] sm:$0xff] %vm5044_vm8, %v5029_v24  ;;  %v11114_v25 = vadd.f32 %v10810_v42, %v4934_v13  ;;  %7347 = vmatmul.mubr.msk.f32.gmra.mrb[78].mxu1 %vm336_vm1, %v3760_v14  ;;  %v7575_v34 = vpop.f32.mrb[231].mxu0 }
 0x41f   : > { %7349 = vmatprep.mubr.msk.f32.mxu1 %vm8295_vm0, %v11836_v32  ;;  %v11986_v34 = vrot.slane %v11902_v26, 2 }
 0x420   : > { %11985 = vst [vmem:[#allocation66_spill] sm:$0xff] %v11114_v25  ;;  %v5030_v63 = vmax.f32 %v11114_v25, 0.0 }
 0x421   : > { %v4939_v16 = vpop.f32.mrb[232].mxu0  ;;  %v3764_v25 = vsel %vm3685_vm6, %v3761_v12, %v11986_v34  ;;  %v11988_v12 = vld [vmem:[#allocation35_spill] sm:$0xff]  ;;  %v4167_v34 = vrot.slane %v8892_v37, 3 }
 0x422   : > { %5072 = vst.msk [vmem:[%s10823_s9 + $0xd8] sm:$0xff] %vm5044_vm8, %v5030_v63  ;;  %v11124_v1 = vadd.f32 %v10810_v42, %v4939_v16  ;;  %7350 = vmatmul.mubr.msk.f32.gmra.mrb[80].mxu1 %vm336_vm1, %v3762_v60  ;;  %v7578_v24 = vpop.f32.mrb[233].mxu0 }
 0x423   : > { %7352 = vmatprep.mubr.msk.f32.mxu1 %vm8295_vm0, %v11836_v32 }
 0x424   : > { %v5031_v14 = vmax.f32 %v11124_v1, 0.0 }
 0x425   : > { %v4944_v13 = vpop.f32.mrb[234].mxu0 }
 0x426   : > { %5073 = vst.msk [vmem:[%s10823_s9 + $0xe0] sm:$0xff] %vm5044_vm8, %v5031_v14  ;;  %v11136_v62 = vadd.f32 %v10810_v42, %v4944_v13  ;;  %7353 = vmatmul.mubr.msk.f32.gmra.mrb[0].mxu1 %vm336_vm1, %v3764_v25  ;;  %v7581_v60 = vpop.f32.mrb[235].mxu0 }
 0x427   : > { %7355 = vmatprep.mubr.msk.f32.mxu1 %vm8295_vm0, %v11836_v32 }
 0x428   : > { %v5032_v63 = vmax.f32 %v11136_v62, 0.0 }
 0x429   : > { %v4949_v16 = vpop.f32.mrb[236].mxu0 }
 0x42a   : > { %5074 = vst.msk [vmem:[%s10823_s9 + $0xe8] sm:$0xff] %vm5044_vm8, %v5032_v63  ;;  %v11145_v24 = vadd.f32 %v10810_v42, %v4949_v16  ;;  %7356 = vmatmul.mubr.msk.f32.gmra.mrb[2].mxu1 %vm336_vm1, %v11988_v12  ;;  %v7584_v14 = vpop.f32.mrb[237].mxu0  ;;  %v11990_v63 = vld [vmem:[#allocation38_spill] sm:$0xff]  ;;  %v4166_v12 = vrot.slane %v11872_v27, 3 }
 0x42b   : > { %7358 = vmatprep.mubr.msk.f32.mxu1 %vm8295_vm0, %v11836_v32 }
 0x42c   : > { %11987 = vst [vmem:[#allocation67_spill] sm:$0xff] %v11145_v24  ;;  %v5033_v25 = vmax.f32 %v11145_v24, 0.0  ;;  %v4168_v37 = vsel %vm4165_vm7, %v4166_v12, %v4167_v34  ;;  %v4171_v12 = vrot.slane %v8920_v39, 3 }
 0x42d   : > { %v4954_v13 = vpop.f32.mrb[238].mxu0 }
 0x42e   : > { %5075 = vst.msk [vmem:[%s10823_s9 + $0xf0] sm:$0xff] %vm5044_vm8, %v5033_v25  ;;  %v11156_v60 = vadd.f32 %v10810_v42, %v4954_v13  ;;  %7359 = vmatmul.mubr.msk.f32.gmra.mrb[4].mxu1 %vm336_vm1, %v11990_v63  ;;  %v7587_v16 = vpop.f32.mrb[239].mxu0  ;;  %v4169_v25 = vrot.slane %v8907_v28, 3 }
 0x42f   : > { %7365 = vmatprep.mubr.msk.f32.mxu1 %vm8295_vm0, %v11836_v32 }
 0x430   : > { %11989 = vst [vmem:[#allocation35_spill] sm:$0xff] %v11156_v60  ;;  %v5034_v14 = vmax.f32 %v11156_v60, 0.0  ;;  %v4170_v60 = vsel %vm4165_vm7, %v4167_v34, %v4169_v25  ;;  %v4173_v34 = vrot.slane %v8929_v49, 3 }
 0x431   : > { %v4959_v24 = vpop.f32.mrb[240].mxu0 }
 0x432   : > { %5076 = vst.msk [vmem:[%s10823_s9 + $0xf8] sm:$0xff] %vm5044_vm8, %v5034_v14  ;;  %v11169_v13 = vadd.f32 %v10810_v42, %v4959_v24  ;;  %7366 = vmatmul.mubr.msk.f32.vlgmr.msra.gmra.mrb[6].mxu1 %vm336_vm1, %v4168_v37  ;;  %v7590_v63 = vpop.f32.mrb[241].mxu0 }
 0x433   : > { %7368 = vmatprep.mubr.msk.f32.mxu1 %vm8295_vm0, %v11836_v32  ;;  %v4172_v63 = vsel %vm4165_vm7, %v4169_v25, %v4171_v12  ;;  %v4175_v25 = vrot.slane %v11904_v8, 3 }
 0x434   : > { %v5035_v27 = vmax.f32 %v11169_v13, 0.0 }
 0x435   : > { %v4964_v16 = vpop.f32.mrb[242].mxu0 }
 0x436   : > { %5077 = vst.msk [vmem:[%s10823_s9 + $0x100] sm:$0xff] %vm5044_vm8, %v5035_v27  ;;  %v11180_v28 = vadd.f32 %v10810_v42, %v4964_v16  ;;  %7369 = vmatmul.mubr.msk.f32.gmra.mrb[8].mxu1 %vm336_vm1, %v4170_v60  ;;  %v7593_v24 = vpop.f32.mrb[243].mxu0 }
 0x437   : > { %7371 = vmatprep.mubr.msk.f32.mxu1 %vm8295_vm0, %v11836_v32  ;;  %v4174_v24 = vsel %vm4165_vm7, %v4171_v12, %v4173_v34  ;;  %v4177_v12 = vrot.slane %v8954_v44, 3 }
 0x438   : > { %v5036_v14 = vmax.f32 %v11180_v28, 0.0 }
 0x439   : > { %v4969_v37 = vpop.f32.mrb[244].mxu0 }
 0x43a   : > { %5078 = vst.msk [vmem:[%s10823_s9 + $0x108] sm:$0xff] %vm5044_vm8, %v5036_v14  ;;  %v11191_v39 = vadd.f32 %v10810_v42, %v4969_v37  ;;  %7372 = vmatmul.mubr.msk.f32.gmra.mrb[10].mxu1 %vm336_vm1, %v4172_v63  ;;  %v7596_v60 = vpop.f32.mrb[245].mxu0 }
 0x43b   : > { %7374 = vmatprep.mubr.msk.f32.mxu1 %vm8295_vm0, %v11836_v32  ;;  %v4176_v60 = vsel %vm4165_vm7, %v4173_v34, %v4175_v25  ;;  %v4179_v34 = vrot.slane %v8963_v23, 3 }
 0x43c   : > { %v5037_v27 = vmax.f32 %v11191_v39, 0.0 }
 0x43d   : > { %v4974_v16 = vpop.f32.mrb[246].mxu0 }
 0x43e   : > { %5079 = vst.msk [vmem:[%s10823_s9 + $0x110] sm:$0xff] %vm5044_vm8, %v5037_v27  ;;  %v11202_v49 = vadd.f32 %v10810_v42, %v4974_v16  ;;  %7375 = vmatmul.mubr.msk.f32.gmra.mrb[12].mxu1 %vm336_vm1, %v4174_v24  ;;  %v7599_v14 = vpop.f32.mrb[247].mxu0 }
 0x43f   : > { %7377 = vmatprep.mubr.msk.f32.mxu1 %vm8295_vm0, %v11836_v32  ;;  %v4178_v14 = vsel %vm4165_vm7, %v4175_v25, %v4177_v12  ;;  %v4181_v25 = vrot.slane %v8972_v61, 3 }
 0x440   : > { %v5038_v37 = vmax.f32 %v11202_v49, 0.0 }
 0x441   : > { %v4979_v63 = vpop.f32.mrb[248].mxu0 }
 0x442   : > { %5080 = vst.msk [vmem:[%s10823_s9 + $0x118] sm:$0xff] %vm5044_vm8, %v5038_v37  ;;  %v11213_v8 = vadd.f32 %v10810_v42, %v4979_v63  ;;  %7378 = vmatmul.mubr.msk.f32.gmra.mrb[14].mxu1 %vm336_vm1, %v4176_v60  ;;  %v7602_v27 = vpop.f32.mrb[249].mxu0 }
 0x443   : > { %7380 = vmatprep.mubr.msk.f32.mxu1 %vm8295_vm0, %v11836_v32  ;;  %v4180_v27 = vsel %vm4165_vm7, %v4177_v12, %v4179_v34  ;;  %v4183_v12 = vrot.slane %v8981_v45, 3 }
 0x444   : > { %v5039_v16 = vmax.f32 %v11213_v8, 0.0 }
 0x445   : > { %v4984_v24 = vpop.f32.mrb[250].mxu0 }
 0x446   : > { %5081 = vst.msk [vmem:[%s10823_s9 + $0x120] sm:$0xff] %vm5044_vm8, %v5039_v16  ;;  %v11224_v44 = vadd.f32 %v10810_v42, %v4984_v24  ;;  %7381 = vmatmul.mubr.msk.f32.gmra.mrb[16].mxu1 %vm336_vm1, %v4178_v14  ;;  %v7605_v37 = vpop.f32.mrb[251].mxu0 }
 0x447   : > { %7383 = vmatprep.mubr.msk.f32.mxu1 %vm8295_vm0, %v11836_v32  ;;  %v4182_v37 = vsel %vm4165_vm7, %v4179_v34, %v4181_v25  ;;  %v4185_v34 = vrot.slane %v8990_v47, 3 }
 0x448   : > { %v5040_v63 = vmax.f32 %v11224_v44, 0.0 }
 0x449   : > { %v4989_v60 = vpop.f32.mrb[252].mxu0 }
 0x44a   : > { %5082 = vst.msk [vmem:[%s10823_s9 + $0x128] sm:$0xff] %vm5044_vm8, %v5040_v63  ;;  %v11235_v23 = vadd.f32 %v10810_v42, %v4989_v60  ;;  %7384 = vmatmul.mubr.msk.f32.gmra.mrb[18].mxu1 %vm336_vm1, %v4180_v27  ;;  %v7608_v16 = vpop.f32.mrb[253].mxu0 }
 0x44b   : > { %7386 = vmatprep.mubr.msk.f32.mxu1 %vm8295_vm0, %v11836_v32  ;;  %v4184_v16 = vsel %vm4165_vm7, %v4181_v25, %v4183_v12 }
 0x44c   : > { %v5041_v24 = vmax.f32 %v11235_v23, 0.0 }
 0x44d   : > { %v4994_v14 = vpop.f32.mrb[254].mxu0 }
 0x44e   : > { %5083 = vst.msk [vmem:[%s10823_s9 + $0x130] sm:$0xff] %vm5044_vm8, %v5041_v24  ;;  %v11246_v61 = vadd.f32 %v10810_v42, %v4994_v14  ;;  %7387 = vmatmul.mubr.msk.f32.gmra.mrb[20].mxu1 %vm336_vm1, %v4182_v37  ;;  %v7611_v63 = vpop.f32.mrb[255].mxu0  ;;  %v4186_v37 = vsel %vm4165_vm7, %v4183_v12, %v4185_v34 }
 0x44f   : > { %7389 = vmatprep.mubr.msk.f32.mxu1 %vm8295_vm0, %v11836_v32  ;;  %v4187_v63 = vrot.slane %v8999_v48, 3  ;;  %v4191_v48 = vrot.slane %v9017_v51, 3 }
 0x450   : > { %v5042_v60 = vmax.f32 %v11246_v61, 0.0 }
 0x451   : > { %v4999_v27 = vpop.f32.mrb[0].mxu0  ;;  %v4188_v47 = vsel %vm4165_vm7, %v4185_v34, %v4187_v63  ;;  %v4199_v34 = vrot.slane %v11909_v19, 3 }
 0x452   : > { %5084 = vst.msk [vmem:[%s10823_s9 + $0x138] sm:$0xff] %vm5044_vm8, %v5042_v60  ;;  %v11257_v45 = vadd.f32 %v10810_v42, %v4999_v27  ;;  %7390 = vmatmul.mubr.msk.f32.gmra.mrb[22].mxu1 %vm336_vm1, %v4184_v16  ;;  %v7614_v24 = vpop.f32.mrb[1].mxu0  ;;  %v4189_v42 = vrot.slane %v9008_v50, 3  ;;  %v4193_v60 = vrot.slane %v9026_v53, 3  ;;  %v4195_v27 = vrot.slane %v9035_v54, 3 }
 0x453   : > { %7392 = vmatprep.mubr.msk.f32.mxu1 %vm8295_vm0, %v11836_v32  ;;  %v4197_v16 = vrot.slane %v11908_v0, 3  ;;  %v4201_v24 = vrot.slane %v11910_v21, 3 }
 0x454   : > { %v5043_v14 = vmax.f32 %v11257_v45, 0.0  ;;  %v4190_v25 = vsel %vm4165_vm7, %v4187_v63, %v4189_v42  ;;  %v4192_v12 = vsel %vm4165_vm7, %v4189_v42, %v4191_v48  ;;  %v4194_v50 = vsel %vm4165_vm7, %v4191_v48, %v4193_v60 }
 0x455   : > { %v4196_v51 = vsel %vm4165_vm7, %v4193_v60, %v4195_v27  ;;  %v4198_v53 = vsel %vm4165_vm7, %v4195_v27, %v4197_v16  ;;  %v4200_v54 = vsel %vm4165_vm7, %v4197_v16, %v4199_v34  ;;  %v4202_v0 = vsel %vm4165_vm7, %v4199_v34, %v4201_v24 }
 0x456   : > { %5085 = vst.msk [vmem:[%s10823_s9 + $0x140] sm:$0xff] %vm5044_vm8, %v5043_v14  ;;  %7393 = vmatmul.mubr.msk.f32.gmra.mrb[24].mxu1 %vm336_vm1, %v4186_v37  ;;  %v4203_v14 = vrot.slane %v11911_v58, 3  ;;  %v4205_v37 = vrot.slane %v11912_v4, 3  ;;  %v4207_v63 = vrot.slane %v11913_v43, 3  ;;  %v4211_v42 = vrot.slane %v11915_v31, 3 }
 0x457   : > { %7395 = vmatprep.mubr.msk.f32.mxu1 %vm8295_vm0, %v11836_v32  ;;  %v4215_v48 = vrot.slane %v11919_v35, 3  ;;  %v4219_v60 = vrot.slane %v11923_v38, 3  ;;  %v4223_v27 = vrot.slane %v11927_v3, 3  ;;  %v4227_v16 = vrot.slane %v11931_v7, 3 }
 0x458   : > { %v4204_v19 = vsel %vm4165_vm7, %v4201_v24, %v4203_v14  ;;  %v4206_v21 = vsel %vm4165_vm7, %v4203_v14, %v4205_v37  ;;  %v4208_v58 = vsel %vm4165_vm7, %v4205_v37, %v4207_v63  ;;  %v4231_v34 = vrot.slane %v11935_v10, 3 }
 0x459   : > { %v4235_v24 = vrot.slane %v9223_v40, 3  ;;  %v4239_v14 = vrot.slane %v9803_v17, 3  ;;  %v11991_v17 = vrot.slane %v11902_v26, 3 }
 0x45a   : > { %7396 = vmatmul.mubr.msk.f32.gmra.mrb[26].mxu1 %vm336_vm1, %v4188_v47  ;;  %v4209_v47 = vrot.slane %v11914_v22, 3 }
 0x45b   : > { %7398 = vmatprep.mubr.msk.f32.mxu1 %vm8295_vm0, %v11836_v32 }
 0x45c   : > { %v4210_v4 = vsel %vm4165_vm7, %v4207_v63, %v4209_v47  ;;  %v4212_v43 = vsel %vm4165_vm7, %v4209_v47, %v4211_v42 }
 0x45e   : > { %7399 = vmatmul.mubr.msk.f32.gmra.mrb[28].mxu1 %vm336_vm1, %v4190_v25  ;;  %v4213_v25 = vrot.slane %v11917_v5, 3 }
 0x45f   : > { %7401 = vmatprep.mubr.msk.f32.mxu1 %vm8295_vm0, %v11836_v32 }
 0x460   : > { %v4214_v22 = vsel %vm4165_vm7, %v4211_v42, %v4213_v25  ;;  %v4216_v31 = vsel %vm4165_vm7, %v4213_v25, %v4215_v48 }
 0x462   : > { %7402 = vmatmul.mubr.msk.f32.gmra.mrb[30].mxu1 %vm336_vm1, %v4192_v12  ;;  %v4217_v12 = vrot.slane %v11921_v41, 3 }
 0x463   : > { %7404 = vmatprep.mubr.msk.f32.mxu1 %vm8295_vm0, %v11836_v32 }
 0x464   : > { %v4218_v5 = vsel %vm4165_vm7, %v4215_v48, %v4217_v12  ;;  %v4220_v35 = vsel %vm4165_vm7, %v4217_v12, %v4219_v60 }
 0x466   : > { %7405 = vmatmul.mubr.msk.f32.gmra.mrb[32].mxu1 %vm336_vm1, %v4194_v50  ;;  %v4221_v50 = vrot.slane %v11925_v33, 3 }
 0x467   : > { %7407 = vmatprep.mubr.msk.f32.mxu1 %vm8295_vm0, %v11836_v32 }
 0x468   : > { %v4222_v41 = vsel %vm4165_vm7, %v4219_v60, %v4221_v50  ;;  %v4224_v38 = vsel %vm4165_vm7, %v4221_v50, %v4223_v27 }
 0x46a   : > { %7408 = vmatmul.mubr.msk.f32.gmra.mrb[34].mxu1 %vm336_vm1, %v4196_v51  ;;  %v4225_v51 = vrot.slane %v11929_v6, 3 }
 0x46b   : > { %7410 = vmatprep.mubr.msk.f32.mxu1 %vm8295_vm0, %v11836_v32 }
 0x46c   : > { %v4226_v33 = vsel %vm4165_vm7, %v4223_v27, %v4225_v51  ;;  %v4228_v3 = vsel %vm4165_vm7, %v4225_v51, %v4227_v16 }
 0x46e   : > { %7411 = vmatmul.mubr.msk.f32.gmra.mrb[36].mxu1 %vm336_vm1, %v4198_v53  ;;  %v4229_v53 = vrot.slane %v11933_v9, 3 }
 0x46f   : > { %7413 = vmatprep.mubr.msk.f32.mxu1 %vm8295_vm0, %v11836_v32 }
 0x470   : > { %v4230_v6 = vsel %vm4165_vm7, %v4227_v16, %v4229_v53  ;;  %v4232_v7 = vsel %vm4165_vm7, %v4229_v53, %v4231_v34 }
 0x472   : > { %7414 = vmatmul.mubr.msk.f32.gmra.mrb[38].mxu1 %vm336_vm1, %v4200_v54  ;;  %v4233_v54 = vrot.slane %v11937_v11, 3 }
 0x473   : > { %7416 = vmatprep.mubr.msk.f32.mxu1 %vm8295_vm0, %v11836_v32 }
 0x474   : > { %v4234_v9 = vsel %vm4165_vm7, %v4231_v34, %v4233_v54  ;;  %v4236_v10 = vsel %vm4165_vm7, %v4233_v54, %v4235_v24  ;;  %v11994_v34 = vld [vmem:[#allocation7_spill] sm:$0xff] }
 0x476   : > { %7417 = vmatmul.mubr.msk.f32.gmra.mrb[40].mxu1 %vm336_vm1, %v4202_v0  ;;  %v4237_v0 = vrot.slane %v9245_v18, 3 }
 0x477   : > { %7419 = vmatprep.mubr.msk.f32.mxu1 %vm8295_vm0, %v11836_v32 }
 0x478   : > { %v4238_v11 = vsel %vm4165_vm7, %v4235_v24, %v4237_v0  ;;  %v4240_v40 = vsel %vm4165_vm7, %v4237_v0, %v4239_v14  ;;  %v11996_v0 = vld [vmem:[#allocation31_spill] sm:$0xff] }
 0x47a   : > { %7420 = vmatmul.mubr.msk.f32.gmra.mrb[42].mxu1 %vm336_vm1, %v4204_v19  ;;  %v4241_v19 = vrot.slane %v11943_v15, 3  ;;  %v11992_v15 = vld [vmem:[#allocation36_spill] sm:$0xff] }
 0x47b   : > { %7422 = vmatprep.mubr.msk.f32.mxu1 %vm8295_vm0, %v11836_v32 }
 0x47c   : > { %v4242_v18 = vsel %vm4165_vm7, %v4239_v14, %v4241_v19  ;;  %v4244_v37 = vsel %vm4165_vm7, %v4241_v19, %v11991_v17 }
 0x47e   : > { %7423 = vmatmul.mubr.msk.f32.gmra.mrb[44].mxu1 %vm336_vm1, %v4206_v21  ;;  %v11993_v21 = vld [vmem:[#allocation39_spill] sm:$0xff] }
 0x47f   : > { %7425 = vmatprep.mubr.msk.f32.mxu1 %vm8295_vm0, %v11836_v32 }
 0x482   : > { %7426 = vmatmul.mubr.msk.f32.gmra.mrb[46].mxu1 %vm336_vm1, %v4208_v58 }
 0x483   : > { %7428 = vmatprep.mubr.msk.f32.mxu1 %vm8295_vm0, %v11836_v32 }
 0x486   : > { %7429 = vmatmul.mubr.msk.f32.gmra.mrb[48].mxu1 %vm336_vm1, %v4210_v4 }
 0x487   : > { %7431 = vmatprep.mubr.msk.f32.mxu1 %vm8295_vm0, %v11836_v32 }
 0x48a   : > { %7432 = vmatmul.mubr.msk.f32.gmra.mrb[50].mxu1 %vm336_vm1, %v4212_v43 }
 0x48b   : > { %7434 = vmatprep.mubr.msk.f32.mxu1 %vm8295_vm0, %v11836_v32 }
 0x48e   : > { %7435 = vmatmul.mubr.msk.f32.gmra.mrb[52].mxu1 %vm336_vm1, %v4214_v22 }
 0x48f   : > { %7437 = vmatprep.mubr.msk.f32.mxu1 %vm8295_vm0, %v11836_v32 }
 0x492   : > { %7438 = vmatmul.mubr.msk.f32.gmra.mrb[54].mxu1 %vm336_vm1, %v4216_v31 }
 0x493   : > { %7440 = vmatprep.mubr.msk.f32.mxu1 %vm8295_vm0, %v11836_v32 }
 0x496   : > { %7441 = vmatmul.mubr.msk.f32.gmra.mrb[56].mxu1 %vm336_vm1, %v4218_v5 }
 0x497   : > { %7443 = vmatprep.mubr.msk.f32.mxu1 %vm8295_vm0, %v11836_v32 }
 0x49a   : > { %7444 = vmatmul.mubr.msk.f32.gmra.mrb[58].mxu1 %vm336_vm1, %v4220_v35 }
 0x49b   : > { %7446 = vmatprep.mubr.msk.f32.mxu1 %vm8295_vm0, %v11836_v32 }
 0x49e   : > { %7447 = vmatmul.mubr.msk.f32.gmra.mrb[60].mxu1 %vm336_vm1, %v4222_v41 }
 0x49f   : > { %7449 = vmatprep.mubr.msk.f32.mxu1 %vm8295_vm0, %v11836_v32 }
 0x4a2   : > { %7450 = vmatmul.mubr.msk.f32.gmra.mrb[62].mxu1 %vm336_vm1, %v4224_v38 }
 0x4a3   : > { %7452 = vmatprep.mubr.msk.f32.mxu1 %vm8295_vm0, %v11836_v32 }
 0x4a6   : > { %7453 = vmatmul.mubr.msk.f32.gmra.mrb[64].mxu1 %vm336_vm1, %v4226_v33 }
 0x4a7   : > { %7455 = vmatprep.mubr.msk.f32.mxu1 %vm8295_vm0, %v11836_v32 }
 0x4aa   : > { %7456 = vmatmul.mubr.msk.f32.gmra.mrb[66].mxu1 %vm336_vm1, %v4228_v3 }
 0x4ab   : > { %7458 = vmatprep.mubr.msk.f32.mxu1 %vm8295_vm0, %v11836_v32 }
 0x4ae   : > { %7459 = vmatmul.mubr.msk.f32.gmra.mrb[68].mxu1 %vm336_vm1, %v4230_v6 }
 0x4af   : > { %7461 = vmatprep.mubr.msk.f32.mxu1 %vm8295_vm0, %v11836_v32 }
 0x4b2   : > { %7462 = vmatmul.mubr.msk.f32.gmra.mrb[70].mxu1 %vm336_vm1, %v4232_v7 }
 0x4b3   : > { %7464 = vmatprep.mubr.msk.f32.mxu1 %vm8295_vm0, %v11836_v32 }
 0x4b6   : > { %7465 = vmatmul.mubr.msk.f32.gmra.mrb[72].mxu1 %vm336_vm1, %v4234_v9  ;;  %v11995_v9 = vld [vmem:[#allocation30_spill] sm:$0xff] }
 0x4b7   : > { %7467 = vmatprep.mubr.msk.f32.mxu1 %vm8295_vm0, %v11836_v32 }
 0x4ba   : > { %7468 = vmatmul.mubr.msk.f32.gmra.mrb[74].mxu1 %vm336_vm1, %v4236_v10 }
 0x4bb   : > { %7470 = vmatprep.mubr.msk.f32.mxu1 %vm8295_vm0, %v11836_v32 }
 0x4be   : > { %7471 = vmatmul.mubr.msk.f32.gmra.mrb[76].mxu1 %vm336_vm1, %v4238_v11 }
 0x4bf   : > { %7473 = vmatprep.mubr.msk.f32.mxu1 %vm8295_vm0, %v11836_v32 }
 0x4c2   : > { %7474 = vmatmul.mubr.msk.f32.gmra.mrb[78].mxu1 %vm336_vm1, %v4240_v40  ;;  %v11997_v40 = vld [vmem:[#allocation33_spill] sm:$0xff] }
 0x4c3   : > { %7476 = vmatprep.mubr.msk.f32.mxu1 %vm8295_vm0, %v11836_v32 }
 0x4c6   : > { %7477 = vmatmul.mubr.msk.f32.gmra.mrb[80].mxu1 %vm336_vm1, %v4242_v18 }
 0x4c7   : > { %7479 = vmatprep.mubr.msk.f32.mxu1 %vm8295_vm0, %v11836_v32 }
 0x4ca   : > { %7480 = vmatmul.mubr.msk.f32.gmra.mrb[0].mxu1 %vm336_vm1, %v4244_v37  ;;  %v11998_v37 = vld [vmem:[#allocation40_spill] sm:$0xff] }
 0x4cb   : > { %7482 = vmatprep.mubr.msk.f32.mxu1 %vm8295_vm0, %v11836_v32 }
 0x4ce   : > { %7483 = vmatmul.mubr.msk.f32.gmra.mrb[2].mxu1 %vm336_vm1, %v11992_v15 }
 0x4cf   : > { %7485 = vmatprep.mubr.msk.f32.mxu1 %vm8295_vm0, %v11836_v32 }
 0x4d2   : > { %7486 = vmatmul.mubr.msk.f32.gmra.mrb[4].mxu1 %vm336_vm1, %v11993_v21 }
 0x505   : > { %v4397_v63 = vpop.f32.mrb[6].mxu1 }
 0x506   : > { %v7647_v58 = vadd.f32 %v4397_v63, %v10457_v2  ;;  %v7367_v26 = vpop.f32.mrb[7].mxu1 }
 0x508   : > { %5127 = vrot.lane.b32.xlu1 %v7647_v58, %s8298_s13  ;;  %v11999_v58 = vld [vmem:[#allocation41_spill] sm:$0xff] }
 0x509   : > { %v4402_v47 = vpop.f32.mrb[8].mxu1 }
 0x50a   : > { %v7648_v4 = vadd.f32 %v4402_v47, %v10467_v46  ;;  %v7370_v42 = vpop.f32.mrb[9].mxu1 }
 0x50b   : > { %v12000_v42 = vld [vmem:[#allocation42_spill] sm:$0xff] }
 0x50c   : > { %5129 = vrot.lane.b32.xlu0 %v7648_v4, %s8298_s13 }
 0x50d   : > { %v4407_v43 = vpop.f32.mrb[10].mxu1 }
 0x50e   : > { %v7649_v25 = vadd.f32 %v4407_v43, %v10477_v52  ;;  %v7373_v32 = vpop.f32.mrb[11].mxu1 }
 0x510   : > { %5131 = vrot.lane.b32.xlu1 %v7649_v25, %s8298_s13 }
 0x511   : > { %v4412_v22 = vpop.f32.mrb[12].mxu1 }
 0x512   : > { %v7650_v48 = vadd.f32 %v4412_v22, %v10487_v36  ;;  %v7376_v2 = vpop.f32.mrb[13].mxu1  ;;  %v12001_v22 = vld [vmem:[#allocation43_spill] sm:$0xff] }
 0x514   : > { %5133 = vrot.lane.b32.xlu0 %v7650_v48, %s8298_s13 }
 0x515   : > { %v4417_v31 = vpop.f32.mrb[14].mxu1 }
 0x516   : > { %v7651_v12 = vadd.f32 %v4417_v31, %v10497_v30  ;;  %v7379_v5 = vpop.f32.mrb[15].mxu1 }
 0x518   : > { %5135 = vrot.lane.b32.xlu1 %v7651_v12, %s8298_s13  ;;  %v12002_v12 = vld [vmem:[#allocation44_spill] sm:$0xff] }
 0x519   : > { %v4422_v46 = vpop.f32.mrb[16].mxu1 }
 0x51a   : > { %v7652_v60 = vadd.f32 %v4422_v46, %v10507_v29  ;;  %v7382_v35 = vpop.f32.mrb[17].mxu1 }
 0x51b   : > { %v12003_v35 = vld [vmem:[#allocation45_spill] sm:$0xff] }
 0x51c   : > { %5137 = vrot.lane.b32.xlu0 %v7652_v60, %s8298_s13 }
 0x51d   : > { %v4427_v52 = vpop.f32.mrb[18].mxu1 }
 0x51e   : > { %v7653_v50 = vadd.f32 %v4427_v52, %v10517_v20  ;;  %v7385_v41 = vpop.f32.mrb[19].mxu1 }
 0x520   : > { %5139 = vrot.lane.b32.xlu1 %v7653_v50, %s8298_s13 }
 0x521   : > { %v4432_v36 = vpop.f32.mrb[20].mxu1 }
 0x522   : > { %v7654_v27 = vadd.f32 %v4432_v36, %v10527_v55  ;;  %v7388_v38 = vpop.f32.mrb[21].mxu1  ;;  %v12004_v36 = vld [vmem:[#allocation46_spill] sm:$0xff] }
 0x524   : > { %5141 = vrot.lane.b32.xlu0 %v7654_v27, %s8298_s13 }
 0x525   : > { %v4437_v30 = vpop.f32.mrb[22].mxu1 }
 0x526   : > { %v7655_v51 = vadd.f32 %v4437_v30, %v10537_v56  ;;  %v7391_v33 = vpop.f32.mrb[23].mxu1 }
 0x528   : > { %5143 = vrot.lane.b32.xlu1 %v7655_v51, %s8298_s13  ;;  %v12005_v51 = vld [vmem:[#allocation47_spill] sm:$0xff] }
 0x529   : > { %v4442_v29 = vpop.f32.mrb[24].mxu1 }
 0x52a   : > { %v7656_v16 = vadd.f32 %v4442_v29, %v10547_v57  ;;  %v7394_v3 = vpop.f32.mrb[25].mxu1 }
 0x52b   : > { %v12006_v3 = vld [vmem:[#allocation48_spill] sm:$0xff] }
 0x52c   : > { %5145 = vrot.lane.b32.xlu0 %v7656_v16, %s8298_s13 }
 0x52d   : > { %v4447_v20 = vpop.f32.mrb[26].mxu1 }
 0x52e   : > { %v7657_v53 = vadd.f32 %v4447_v20, %v10557_v59  ;;  %v7397_v6 = vpop.f32.mrb[27].mxu1 }
 0x530   : > { %5147 = vrot.lane.b32.xlu1 %v7657_v53, %s8298_s13 }
 0x531   : > { %v4452_v55 = vpop.f32.mrb[28].mxu1 }
 0x532   : > { %v7658_v7 = vadd.f32 %v4452_v55, %v11994_v34  ;;  %v7400_v54 = vpop.f32.mrb[29].mxu1  ;;  %v12007_v55 = vld [vmem:[#allocation49_spill] sm:$0xff] }
 0x534   : > { %5149 = vrot.lane.b32.xlu0 %v7658_v7, %s8298_s13 }
 0x535   : > { %v4457_v56 = vpop.f32.mrb[30].mxu1 }
 0x536   : > { %v7659_v24 = vadd.f32 %v4457_v56, %v11995_v9  ;;  %v7403_v10 = vpop.f32.mrb[31].mxu1  ;;  %v12008_v56 = vld [vmem:[#allocation50_spill] sm:$0xff] }
 0x538   : > { %5151 = vrot.lane.b32.xlu1 %v7659_v24, %s8298_s13 }
 0x539   : > { %v4462_v57 = vpop.f32.mrb[32].mxu1 }
 0x53a   : > { %v7660_v11 = vadd.f32 %v4462_v57, %v11996_v0  ;;  %v7406_v14 = vpop.f32.mrb[33].mxu1  ;;  %v12009_v57 = vld [vmem:[#allocation51_spill] sm:$0xff] }
 0x53c   : > { %5153 = vrot.lane.b32.xlu0 %v7660_v11, %s8298_s13 }
 0x53d   : > { %v4467_v59 = vpop.f32.mrb[34].mxu1 }
 0x53e   : > { %v7661_v19 = vadd.f32 %v4467_v59, %v11997_v40  ;;  %v7409_v18 = vpop.f32.mrb[35].mxu1  ;;  %v12010_v59 = vld [vmem:[#allocation52_spill] sm:$0xff] }
 0x540   : > { %5155 = vrot.lane.b32.xlu1 %v7661_v19, %s8298_s13 }
 0x541   : > { %v4472_v17 = vpop.f32.mrb[36].mxu1 }
 0x542   : > { %v7662_v15 = vadd.f32 %v4472_v17, %v11998_v37  ;;  %v7412_v21 = vpop.f32.mrb[37].mxu1  ;;  %v12011_v17 = vld [vmem:[#allocation53_spill] sm:$0xff] }
 0x544   : > { %5157 = vrot.lane.b32.xlu0 %v7662_v15, %s8298_s13 }
 0x545   : > { %v4477_v63 = vpop.f32.mrb[38].mxu1 }
 0x546   : > { %v7663_v26 = vadd.f32 %v4477_v63, %v11999_v58  ;;  %v7415_v47 = vpop.f32.mrb[39].mxu1  ;;  %v12012_v63 = vld [vmem:[#allocation54_spill] sm:$0xff] }
 0x548   : > { %5159 = vrot.lane.b32.xlu1 %v7663_v26, %s8298_s13 }
 0x549   : > { %v4482_v4 = vpop.f32.mrb[40].mxu1 }
 0x54a   : > { %v7664_v43 = vadd.f32 %v4482_v4, %v12000_v42  ;;  %v7418_v25 = vpop.f32.mrb[41].mxu1  ;;  %v12013_v4 = vld [vmem:[#allocation10_spill] sm:$0xff] }
 0x54c   : > { %5161 = vrot.lane.b32.xlu0 %v7664_v43, %s8298_s13 }
 0x54d   : > { %v4487_v32 = vpop.f32.mrb[42].mxu1 }
 0x54e   : > { %v7665_v48 = vadd.f32 %v4487_v32, %v12001_v22  ;;  %v7421_v2 = vpop.f32.mrb[43].mxu1  ;;  %v12014_v32 = vld [vmem:[#allocation55_spill] sm:$0xff] }
 0x550   : > { %5163 = vrot.lane.b32.xlu1 %v7665_v48, %s8298_s13 }
 0x551   : > { %v4492_v31 = vpop.f32.mrb[44].mxu1 }
 0x552   : > { %v7666_v5 = vadd.f32 %v4492_v31, %v12002_v12  ;;  %v7424_v46 = vpop.f32.mrb[45].mxu1  ;;  %v12015_v31 = vld [vmem:[#allocation11_spill] sm:$0xff] }
 0x554   : > { %5165 = vrot.lane.b32.xlu0 %v7666_v5, %s8298_s13 }
 0x555   : > { %v4497_v60 = vpop.f32.mrb[46].mxu1 }
 0x556   : > { %v7667_v52 = vadd.f32 %v4497_v60, %v12003_v35  ;;  %v7427_v50 = vpop.f32.mrb[47].mxu1  ;;  %v12016_v60 = vld [vmem:[#allocation56_spill] sm:$0xff] }
 0x558   : > { %5167 = vrot.lane.b32.xlu1 %v7667_v52, %s8298_s13 }
 0x559   : > { %v4502_v41 = vpop.f32.mrb[48].mxu1 }
 0x55a   : > { %v7668_v27 = vadd.f32 %v4502_v41, %v12004_v36  ;;  %v7430_v38 = vpop.f32.mrb[49].mxu1  ;;  %v12017_v41 = vld [vmem:[#allocation12_spill] sm:$0xff] }
 0x55c   : > { %5169 = vrot.lane.b32.xlu0 %v7668_v27, %s8298_s13 }
 0x55d   : > { %v4507_v30 = vpop.f32.mrb[50].mxu1 }
 0x55e   : > { %v7669_v33 = vadd.f32 %v4507_v30, %v12005_v51  ;;  %v7433_v29 = vpop.f32.mrb[51].mxu1  ;;  %v12018_v30 = vld [vmem:[#allocation57_spill] sm:$0xff] }
 0x560   : > { %5171 = vrot.lane.b32.xlu1 %v7669_v33, %s8298_s13 }
 0x561   : > { %v4512_v16 = vpop.f32.mrb[52].mxu1 }
 0x562   : > { %v7670_v20 = vadd.f32 %v4512_v16, %v12006_v3  ;;  %v7436_v53 = vpop.f32.mrb[53].mxu1  ;;  %v12019_v16 = vld [vmem:[#allocation13_spill] sm:$0xff] }
 0x564   : > { %5173 = vrot.lane.b32.xlu0 %v7670_v20, %s8298_s13 }
 0x565   : > { %v4517_v6 = vpop.f32.mrb[54].mxu1 }
 0x566   : > { %v7671_v34 = vadd.f32 %v4517_v6, %v12007_v55  ;;  %v7439_v7 = vpop.f32.mrb[55].mxu1  ;;  %v12020_v6 = vld [vmem:[#allocation58_spill] sm:$0xff] }
 0x568   : > { %5175 = vrot.lane.b32.xlu1 %v7671_v34, %s8298_s13 }
 0x569   : > { %v4522_v54 = vpop.f32.mrb[56].mxu1 }
 0x56a   : > { %v7672_v9 = vadd.f32 %v4522_v54, %v12008_v56  ;;  %v7442_v24 = vpop.f32.mrb[57].mxu1  ;;  %v12021_v54 = vld [vmem:[#allocation14_spill] sm:$0xff] }
 0x56c   : > { %5177 = vrot.lane.b32.xlu0 %v7672_v9, %s8298_s13 }
 0x56d   : > { %v4527_v10 = vpop.f32.mrb[58].mxu1 }
 0x56e   : > { %v7673_v0 = vadd.f32 %v4527_v10, %v12009_v57  ;;  %v7445_v11 = vpop.f32.mrb[59].mxu1  ;;  %v12022_v10 = vld [vmem:[#allocation59_spill] sm:$0xff] }
 0x570   : > { %5179 = vrot.lane.b32.xlu1 %v7673_v0, %s8298_s13 }
 0x571   : > { %v4532_v14 = vpop.f32.mrb[60].mxu1 }
 0x572   : > { %v7674_v40 = vadd.f32 %v4532_v14, %v12010_v59  ;;  %v7448_v19 = vpop.f32.mrb[61].mxu1  ;;  %v12023_v14 = vld [vmem:[#allocation15_spill] sm:$0xff] }
 0x574   : > { %5181 = vrot.lane.b32.xlu0 %v7674_v40, %s8298_s13 }
 0x575   : > { %v4537_v18 = vpop.f32.mrb[62].mxu1 }
 0x576   : > { %v7675_v37 = vadd.f32 %v4537_v18, %v12011_v17  ;;  %v7451_v15 = vpop.f32.mrb[63].mxu1  ;;  %v12024_v18 = vld [vmem:[#allocation60_spill] sm:$0xff] }
 0x578   : > { %5183 = vrot.lane.b32.xlu1 %v7675_v37, %s8298_s13 }
 0x579   : > { %v4542_v21 = vpop.f32.mrb[64].mxu1 }
 0x57a   : > { %v7676_v58 = vadd.f32 %v4542_v21, %v12012_v63  ;;  %v7454_v26 = vpop.f32.mrb[65].mxu1  ;;  %v5128_v47 = vpop.permute.xlu1 %5127  ;;  %v12025_v21 = vld [vmem:[#allocation16_spill] sm:$0xff] }
 0x57b   : > { %v5250_v42 = vadd.f32 %v5128_v47, %v12013_v4  ;;  %v12026_v47 = vld [vmem:[#allocation61_spill] sm:$0xff] }
 0x57c   : > { %5185 = vrot.lane.b32.xlu0 %v7676_v58, %s8298_s13 }
 0x57d   : > { %v5291_v43 = vmax.f32 %v5250_v42, 0.0  ;;  %v4547_v25 = vpop.f32.mrb[66].mxu1 }
 0x57e   : > { %v7677_v22 = vadd.f32 %v4547_v25, %v12014_v32  ;;  %v7457_v48 = vpop.f32.mrb[67].mxu1  ;;  %v5130_v2 = vpop.permute.xlu0 %5129  ;;  %v12027_v25 = vld [vmem:[#allocation17_spill] sm:$0xff] }
 0x57f   : > { %5333 = vst.msk [vmem:[%s10823_s9] sm:$0xff] %vm5332_vm9, %v5291_v43  ;;  %v5251_v12 = vadd.f32 %v5130_v2, %v12015_v31  ;;  %v12028_v2 = vld [vmem:[#allocation32_spill] sm:$0xff] }
 0x580   : > { %5187 = vrot.lane.b32.xlu1 %v7677_v22, %s8298_s13 }
 0x581   : > { %v5292_v5 = vmax.f32 %v5251_v12, 0.0  ;;  %v4552_v46 = vpop.f32.mrb[68].mxu1 }
 0x582   : > { %v7678_v35 = vadd.f32 %v4552_v46, %v12016_v60  ;;  %v7460_v52 = vpop.f32.mrb[69].mxu1  ;;  %v5132_v50 = vpop.permute.xlu1 %5131  ;;  %v12029_v46 = vld [vmem:[#allocation18_spill] sm:$0xff] }
 0x583   : > { %5334 = vst.msk [vmem:[%s10823_s9 + $0x8] sm:$0xff] %vm5332_vm9, %v5292_v5  ;;  %v5252_v36 = vadd.f32 %v5132_v50, %v12017_v41  ;;  %v12030_v50 = vld [vmem:[#allocation6_spill] sm:$0xff] }
 0x584   : > { %5189 = vrot.lane.b32.xlu0 %v7678_v35, %s8298_s13 }
 0x585   : > { %v5293_v27 = vmax.f32 %v5252_v36, 0.0  ;;  %v4557_v38 = vpop.f32.mrb[70].mxu1 }
 0x586   : > { %v7679_v51 = vadd.f32 %v4557_v38, %v12018_v30  ;;  %v7463_v33 = vpop.f32.mrb[71].mxu1  ;;  %v5134_v29 = vpop.permute.xlu0 %5133  ;;  %v12031_v38 = vld [vmem:[#allocation19_spill] sm:$0xff] }
 0x587   : > { %5335 = vst.msk [vmem:[%s10823_s9 + $0x10] sm:$0xff] %vm5332_vm9, %v5293_v27  ;;  %v5253_v3 = vadd.f32 %v5134_v29, %v12019_v16  ;;  %v12032_v29 = vld [vmem:[#allocation9_spill] sm:$0xff] }
 0x588   : > { %5191 = vrot.lane.b32.xlu1 %v7679_v51, %s8298_s13 }
 0x589   : > { %v5294_v20 = vmax.f32 %v5253_v3, 0.0  ;;  %v4562_v53 = vpop.f32.mrb[72].mxu1 }
 0x58a   : > { %v7680_v55 = vadd.f32 %v4562_v53, %v12020_v6  ;;  %v7466_v34 = vpop.f32.mrb[73].mxu1  ;;  %v5136_v7 = vpop.permute.xlu1 %5135  ;;  %v12033_v53 = vld [vmem:[#allocation20_spill] sm:$0xff] }
 0x58b   : > { %5336 = vst.msk [vmem:[%s10823_s9 + $0x18] sm:$0xff] %vm5332_vm9, %v5294_v20  ;;  %v5254_v56 = vadd.f32 %v5136_v7, %v12021_v54  ;;  %v12034_v7 = vld [vmem:[#allocation5_spill] sm:$0xff] }
 0x58c   : > { %5193 = vrot.lane.b32.xlu0 %v7680_v55, %s8298_s13 }
 0x58d   : > { %v5295_v9 = vmax.f32 %v5254_v56, 0.0  ;;  %v4567_v24 = vpop.f32.mrb[74].mxu1 }
 0x58e   : > { %v7681_v57 = vadd.f32 %v4567_v24, %v12022_v10  ;;  %v7469_v0 = vpop.f32.mrb[75].mxu1  ;;  %v5138_v11 = vpop.permute.xlu0 %5137  ;;  %v12035_v24 = vld [vmem:[#allocation21_spill] sm:$0xff] }
 0x58f   : > { %5337 = vst.msk [vmem:[%s10823_s9 + $0x20] sm:$0xff] %vm5332_vm9, %v5295_v9  ;;  %v5255_v59 = vadd.f32 %v5138_v11, %v12023_v14  ;;  %v12036_v11 = vld [vmem:[#allocation22_spill] sm:$0xff] }
 0x590   : > { %5195 = vrot.lane.b32.xlu1 %v7681_v57, %s8298_s13 }
 0x591   : > { %v5296_v40 = vmax.f32 %v5255_v59, 0.0  ;;  %v4572_v19 = vpop.f32.mrb[76].mxu1 }
 0x592   : > { %v7682_v17 = vadd.f32 %v4572_v19, %v12024_v18  ;;  %v7472_v37 = vpop.f32.mrb[77].mxu1  ;;  %v5140_v15 = vpop.permute.xlu1 %5139  ;;  %v12037_v19 = vld [vmem:[#allocation23_spill] sm:$0xff] }
 0x593   : > { %5338 = vst.msk [vmem:[%s10823_s9 + $0x28] sm:$0xff] %vm5332_vm9, %v5296_v40  ;;  %v5256_v63 = vadd.f32 %v5140_v15, %v12025_v21  ;;  %v12038_v15 = vld [vmem:[#allocation24_spill] sm:$0xff] }
 0x594   : > { %5197 = vrot.lane.b32.xlu0 %v7682_v17, %s8298_s13 }
 0x595   : > { %v5297_v58 = vmax.f32 %v5256_v63, 0.0  ;;  %v4577_v26 = vpop.f32.mrb[78].mxu1 }
 0x596   : > { %v7683_v4 = vadd.f32 %v4577_v26, %v12026_v47  ;;  %v7475_v42 = vpop.f32.mrb[79].mxu1  ;;  %v5142_v43 = vpop.permute.xlu0 %5141  ;;  %v12039_v26 = vld [vmem:[#allocation25_spill] sm:$0xff] }
 0x597   : > { %5339 = vst.msk [vmem:[%s10823_s9 + $0x30] sm:$0xff] %vm5332_vm9, %v5297_v58  ;;  %v5257_v32 = vadd.f32 %v5142_v43, %v12027_v25  ;;  %v12040_v43 = vld [vmem:[#allocation26_spill] sm:$0xff] }
 0x598   : > { %5199 = vrot.lane.b32.xlu1 %v7683_v4, %s8298_s13 }
 0x599   : > { %v5298_v22 = vmax.f32 %v5257_v32, 0.0  ;;  %v4582_v48 = vpop.f32.mrb[80].mxu1 }
 0x59a   : > { %v7684_v31 = vadd.f32 %v4582_v48, %v12028_v2  ;;  %v7478_v12 = vpop.f32.mrb[81].mxu1  ;;  %v5144_v5 = vpop.permute.xlu1 %5143  ;;  %v12041_v48 = vld [vmem:[#allocation27_spill] sm:$0xff] }
 0x59b   : > { %5340 = vst.msk [vmem:[%s10823_s9 + $0x38] sm:$0xff] %vm5332_vm9, %v5298_v22  ;;  %v5258_v60 = vadd.f32 %v5144_v5, %v12029_v46  ;;  %v12042_v5 = vld [vmem:[#allocation28_spill] sm:$0xff] }
 0x59c   : > { %5201 = vrot.lane.b32.xlu0 %v7684_v31, %s8298_s13 }
 0x59d   : > { %v5299_v35 = vmax.f32 %v5258_v60, 0.0  ;;  %v4587_v52 = vpop.f32.mrb[0].mxu1 }
 0x59e   : > { %v7685_v41 = vadd.f32 %v4587_v52, %v12030_v50  ;;  %v7481_v36 = vpop.f32.mrb[1].mxu1  ;;  %v5146_v27 = vpop.permute.xlu0 %5145  ;;  %v12043_v52 = vld [vmem:[#allocation29_spill] sm:$0xff] }
 0x59f   : > { %5341 = vst.msk [vmem:[%s10823_s9 + $0x40] sm:$0xff] %vm5332_vm9, %v5299_v35  ;;  %v5259_v30 = vadd.f32 %v5146_v27, %v12031_v38  ;;  %v12044_v27 = vld [vmem:[#allocation8_spill] sm:$0xff] }
 0x5a0   : > { %5203 = vrot.lane.b32.xlu1 %v7685_v41, %s8298_s13 }
 0x5a1   : > { %v5300_v51 = vmax.f32 %v5259_v30, 0.0  ;;  %v4592_v33 = vpop.f32.mrb[2].mxu1 }
 0x5a2   : > { %v7686_v16 = vadd.f32 %v4592_v33, %v12032_v29  ;;  %v7484_v3 = vpop.f32.mrb[3].mxu1  ;;  %v5148_v20 = vpop.permute.xlu1 %5147  ;;  %v12045_v33 = vld [vmem:[#allocation62_spill] sm:$0xff] }
 0x5a3   : > { %5342 = vst.msk [vmem:[%s10823_s9 + $0x48] sm:$0xff] %vm5332_vm9, %v5300_v51  ;;  %v5260_v6 = vadd.f32 %v5148_v20, %v12033_v53  ;;  %v12046_v20 = vld [vmem:[#allocation34_spill] sm:$0xff] }
 0x5a4   : > { %5205 = vrot.lane.b32.xlu0 %v7686_v16, %s8298_s13 }
 0x5a5   : > { %v5301_v55 = vmax.f32 %v5260_v6, 0.0  ;;  %v4597_v34 = vpop.f32.mrb[4].mxu1 }
 0x5a6   : > { %v7687_v54 = vadd.f32 %v4597_v34, %v12034_v7  ;;  %v7487_v56 = vpop.f32.mrb[5].mxu1  ;;  %v5150_v9 = vpop.permute.xlu0 %5149  ;;  %v12047_v34 = vld [vmem:[#allocation37_spill] sm:$0xff] }
 0x5a7   : > { %5343 = vst.msk [vmem:[%s10823_s9 + $0x50] sm:$0xff] %vm5332_vm9, %v5301_v55  ;;  %v5261_v10 = vadd.f32 %v5150_v9, %v12035_v24  ;;  %v12048_v9 = vld [vmem:[#allocation63_spill] sm:$0xff] }
 0x5a8   : > { %5207 = vrot.lane.b32.xlu1 %v7687_v54, %s8298_s13 }
 0x5a9   : > { %v5302_v57 = vmax.f32 %v5261_v10, 0.0 }
 0x5aa   : > { %v5152_v0 = vpop.permute.xlu1 %5151 }
 0x5ab   : > { %5344 = vst.msk [vmem:[%s10823_s9 + $0x58] sm:$0xff] %vm5332_vm9, %v5302_v57  ;;  %v5262_v14 = vadd.f32 %v5152_v0, %v12036_v11  ;;  %v12049_v0 = vld [vmem:[#allocation64_spill] sm:$0xff] }
 0x5ad   : > { %v5303_v59 = vmax.f32 %v5262_v14, 0.0 }
 0x5ae   : > { %v5154_v40 = vpop.permute.xlu0 %5153 }
 0x5af   : > { %5345 = vst.msk [vmem:[%s10823_s9 + $0x60] sm:$0xff] %vm5332_vm9, %v5303_v59  ;;  %v5263_v18 = vadd.f32 %v5154_v40, %v12037_v19  ;;  %v12050_v40 = vld [vmem:[#allocation65_spill] sm:$0xff] }
 0x5b1   : > { %v5304_v17 = vmax.f32 %v5263_v18, 0.0 }
 0x5b2   : > { %v5156_v37 = vpop.permute.xlu1 %5155 }
 0x5b3   : > { %5346 = vst.msk [vmem:[%s10823_s9 + $0x68] sm:$0xff] %vm5332_vm9, %v5304_v17  ;;  %v5264_v21 = vadd.f32 %v5156_v37, %v12038_v15  ;;  %v12051_v37 = vld [vmem:[#allocation66_spill] sm:$0xff] }
 0x5b5   : > { %v5305_v63 = vmax.f32 %v5264_v21, 0.0 }
 0x5b6   : > { %v5158_v58 = vpop.permute.xlu0 %5157 }
 0x5b7   : > { %5347 = vst.msk [vmem:[%s10823_s9 + $0x70] sm:$0xff] %vm5332_vm9, %v5305_v63  ;;  %v5265_v47 = vadd.f32 %v5158_v58, %v12039_v26 }
 0x5b9   : > { %v5306_v4 = vmax.f32 %v5265_v47, 0.0 }
 0x5ba   : > { %v5160_v42 = vpop.permute.xlu1 %5159 }
 0x5bb   : > { %5348 = vst.msk [vmem:[%s10823_s9 + $0x78] sm:$0xff] %vm5332_vm9, %v5306_v4  ;;  %v5266_v25 = vadd.f32 %v5160_v42, %v12040_v43 }
 0x5bd   : > { %v5307_v32 = vmax.f32 %v5266_v25, 0.0  ;;  %v12052_v25 = vld [vmem:[#allocation67_spill] sm:$0xff] }
 0x5be   : > { %v5162_v22 = vpop.permute.xlu0 %5161 }
 0x5bf   : > { %5349 = vst.msk [vmem:[%s10823_s9 + $0x80] sm:$0xff] %vm5332_vm9, %v5307_v32  ;;  %v5267_v2 = vadd.f32 %v5162_v22, %v12041_v48 }
 0x5c1   : > { %v5308_v31 = vmax.f32 %v5267_v2, 0.0  ;;  %v12053_v2 = vld [vmem:[#allocation35_spill] sm:$0xff] }
 0x5c2   : > { %v5164_v12 = vpop.permute.xlu1 %5163 }
 0x5c3   : > { %5350 = vst.msk [vmem:[%s10823_s9 + $0x88] sm:$0xff] %vm5332_vm9, %v5308_v31  ;;  %v5268_v46 = vadd.f32 %v5164_v12, %v12042_v5 }
 0x5c5   : > { %v5309_v60 = vmax.f32 %v5268_v46, 0.0 }
 0x5c6   : > { %v5166_v35 = vpop.permute.xlu0 %5165 }
 0x5c7   : > { %5351 = vst.msk [vmem:[%s10823_s9 + $0x90] sm:$0xff] %vm5332_vm9, %v5309_v60  ;;  %v5269_v50 = vadd.f32 %v5166_v35, %v12043_v52 }
 0x5c9   : > { %v5310_v41 = vmax.f32 %v5269_v50, 0.0 }
 0x5ca   : > { %v5168_v36 = vpop.permute.xlu1 %5167 }
 0x5cb   : > { %5352 = vst.msk [vmem:[%s10823_s9 + $0x98] sm:$0xff] %vm5332_vm9, %v5310_v41  ;;  %v5270_v38 = vadd.f32 %v5168_v36, %v12044_v27 }
 0x5cd   : > { %v5311_v30 = vmax.f32 %v5270_v38, 0.0 }
 0x5ce   : > { %v5170_v51 = vpop.permute.xlu0 %5169 }
 0x5cf   : > { %5353 = vst.msk [vmem:[%s10823_s9 + $0xa0] sm:$0xff] %vm5332_vm9, %v5311_v30  ;;  %v5271_v29 = vadd.f32 %v5170_v51, %v12045_v33 }
 0x5d1   : > { %v5312_v16 = vmax.f32 %v5271_v29, 0.0 }
 0x5d2   : > { %v5172_v3 = vpop.permute.xlu1 %5171 }
 0x5d3   : > { %5354 = vst.msk [vmem:[%s10823_s9 + $0xa8] sm:$0xff] %vm5332_vm9, %v5312_v16  ;;  %v5272_v53 = vadd.f32 %v5172_v3, %v12046_v20 }
 0x5d5   : > { %v5313_v6 = vmax.f32 %v5272_v53, 0.0 }
 0x5d6   : > { %v5174_v55 = vpop.permute.xlu0 %5173 }
 0x5d7   : > { %5355 = vst.msk [vmem:[%s10823_s9 + $0xb0] sm:$0xff] %vm5332_vm9, %v5313_v6  ;;  %v5273_v7 = vadd.f32 %v5174_v55, %v12047_v34 }
 0x5d9   : > { %v5314_v54 = vmax.f32 %v5273_v7, 0.0 }
 0x5da   : > { %v5176_v56 = vpop.permute.xlu1 %5175 }
 0x5db   : > { %5356 = vst.msk [vmem:[%s10823_s9 + $0xb8] sm:$0xff] %vm5332_vm9, %v5314_v54  ;;  %v5274_v24 = vadd.f32 %v5176_v56, %v12048_v9 }
 0x5dd   : > { %v5315_v10 = vmax.f32 %v5274_v24, 0.0 }
 0x5de   : > { %v5178_v57 = vpop.permute.xlu0 %5177 }
 0x5df   : > { %5357 = vst.msk [vmem:[%s10823_s9 + $0xc0] sm:$0xff] %vm5332_vm9, %v5315_v10  ;;  %v5275_v11 = vadd.f32 %v5178_v57, %v12049_v0 }
 0x5e1   : > { %v5316_v14 = vmax.f32 %v5275_v11, 0.0 }
 0x5e2   : > { %v5180_v59 = vpop.permute.xlu1 %5179 }
 0x5e3   : > { %5358 = vst.msk [vmem:[%s10823_s9 + $0xc8] sm:$0xff] %vm5332_vm9, %v5316_v14  ;;  %v5276_v19 = vadd.f32 %v5180_v59, %v12050_v40 }
 0x5e5   : > { %v5317_v18 = vmax.f32 %v5276_v19, 0.0 }
 0x5e6   : > { %v5182_v17 = vpop.permute.xlu0 %5181 }
 0x5e7   : > { %5359 = vst.msk [vmem:[%s10823_s9 + $0xd0] sm:$0xff] %vm5332_vm9, %v5317_v18  ;;  %v5277_v15 = vadd.f32 %v5182_v17, %v12051_v37 }
 0x5e9   : > { %v5318_v21 = vmax.f32 %v5277_v15, 0.0 }
 0x5ea   : > { %v5184_v63 = vpop.permute.xlu1 %5183 }
 0x5eb   : > { %5360 = vst.msk [vmem:[%s10823_s9 + $0xd8] sm:$0xff] %vm5332_vm9, %v5318_v21  ;;  %v5278_v58 = vadd.f32 %v5184_v63, %v11124_v1 }
 0x5ed   : > { %v5319_v26 = vmax.f32 %v5278_v58, 0.0 }
 0x5ee   : > { %v5186_v47 = vpop.permute.xlu0 %5185 }
 0x5ef   : > { %5361 = vst.msk [vmem:[%s10823_s9 + $0xe0] sm:$0xff] %vm5332_vm9, %v5319_v26  ;;  %v5279_v4 = vadd.f32 %v5186_v47, %v11136_v62 }
 0x5f1   : > { %v5320_v42 = vmax.f32 %v5279_v4, 0.0 }
 0x5f2   : > { %v5188_v43 = vpop.permute.xlu1 %5187 }
 0x5f3   : > { %5362 = vst.msk [vmem:[%s10823_s9 + $0xe8] sm:$0xff] %vm5332_vm9, %v5320_v42  ;;  %v5280_v32 = vadd.f32 %v5188_v43, %v12052_v25 }
 0x5f5   : > { %v5321_v22 = vmax.f32 %v5280_v32, 0.0 }
 0x5f6   : > { %v5190_v48 = vpop.permute.xlu0 %5189 }
 0x5f7   : > { %5363 = vst.msk [vmem:[%s10823_s9 + $0xf0] sm:$0xff] %vm5332_vm9, %v5321_v22  ;;  %v5281_v1 = vadd.f32 %v5190_v48, %v12053_v2 }
 0x5f9   : > { %v5322_v31 = vmax.f32 %v5281_v1, 0.0 }
 0x5fa   : > { %v5192_v12 = vpop.permute.xlu1 %5191 }
 0x5fb   : > { %5364 = vst.msk [vmem:[%s10823_s9 + $0xf8] sm:$0xff] %vm5332_vm9, %v5322_v31  ;;  %v5282_v62 = vadd.f32 %v5192_v12, %v11169_v13 }
 0x5fd   : > { %v5323_v5 = vmax.f32 %v5282_v62, 0.0 }
 0x5fe   : > { %v5194_v46 = vpop.permute.xlu0 %5193 }
 0x5ff   : > { %5365 = vst.msk [vmem:[%s10823_s9 + $0x100] sm:$0xff] %vm5332_vm9, %v5323_v5  ;;  %v5283_v60 = vadd.f32 %v5194_v46, %v11180_v28 }
 0x601   : > { %v5324_v35 = vmax.f32 %v5283_v60, 0.0 }
 0x602   : > { %v5196_v52 = vpop.permute.xlu1 %5195 }
 0x603   : > { %5366 = vst.msk [vmem:[%s10823_s9 + $0x108] sm:$0xff] %vm5332_vm9, %v5324_v35  ;;  %v5284_v50 = vadd.f32 %v5196_v52, %v11191_v39 }
 0x605   : > { %v5325_v41 = vmax.f32 %v5284_v50, 0.0 }
 0x606   : > { %v5198_v36 = vpop.permute.xlu0 %5197 }
 0x607   : > { %5367 = vst.msk [vmem:[%s10823_s9 + $0x110] sm:$0xff] %vm5332_vm9, %v5325_v41  ;;  %v5285_v13 = vadd.f32 %v5198_v36, %v11202_v49 }
 0x609   : > { %v5326_v27 = vmax.f32 %v5285_v13, 0.0 }
 0x60a   : > { %v5200_v38 = vpop.permute.xlu1 %5199 }
 0x60b   : > { %5368 = vst.msk [vmem:[%s10823_s9 + $0x118] sm:$0xff] %vm5332_vm9, %v5326_v27  ;;  %v5286_v28 = vadd.f32 %v5200_v38, %v11213_v8 }
 0x60d   : > { %v5327_v30 = vmax.f32 %v5286_v28, 0.0 }
 0x60e   : > { %v5202_v51 = vpop.permute.xlu0 %5201 }
 0x60f   : > { %5369 = vst.msk [vmem:[%s10823_s9 + $0x120] sm:$0xff] %vm5332_vm9, %v5327_v30  ;;  %v5287_v39 = vadd.f32 %v5202_v51, %v11224_v44 }
 0x611   : > { %v5328_v33 = vmax.f32 %v5287_v39, 0.0 }
 0x612   : > { %v5204_v29 = vpop.permute.xlu1 %5203 }
 0x613   : > { %5370 = vst.msk [vmem:[%s10823_s9 + $0x128] sm:$0xff] %vm5332_vm9, %v5328_v33  ;;  %v5288_v49 = vadd.f32 %v5204_v29, %v11235_v23 }
 0x615   : > { %v5329_v16 = vmax.f32 %v5288_v49, 0.0 }
 0x616   : > { %v5206_v3 = vpop.permute.xlu0 %5205 }
 0x617   : > { %5371 = vst.msk [vmem:[%s10823_s9 + $0x130] sm:$0xff] %vm5332_vm9, %v5329_v16  ;;  %v5289_v8 = vadd.f32 %v5206_v3, %v11246_v61 }
 0x619   : > { %v5330_v20 = vmax.f32 %v5289_v8, 0.0 }
 0x61a   : > { %v5208_v53 = vpop.permute.xlu1 %5207 }
 0x61b   : > { %5372 = vst.msk [vmem:[%s10823_s9 + $0x138] sm:$0xff] %vm5332_vm9, %v5330_v20  ;;  %v5290_v44 = vadd.f32 %v5208_v53, %v11257_v45 }
 0x61d   : > { %v5331_v23 = vmax.f32 %v5290_v44, 0.0 }
 0x61f   : > { %5373 = vst.msk [vmem:[%s10823_s9 + $0x140] sm:$0xff] %vm5332_vm9, %v5331_v23 }
 0x620   : > { %8243 = shalt.err (!%p8240_p3)
}
 0x621   : > { %s8244_s22 = scalar_lea.hbm %s11629_s19, 5248  ;;  %s8248_s9 = scalar_lea.hbm %s11685_s7, 10496 }
 0x622   : > { %p8245_p4 = scmp.ne.s32.totalorder %s11629_s19, %s8244_s22  ;;  %p8249_p9 = scmp.lt.u32.totalorder %s11629_s19, %s11685_s7 }
 0x623   : > { %p8250_p10 = scmp.lt.u32.totalorder %s8248_s9, %s8244_s22  ;;  %p8252_p12 = scmp.lt.u32.totalorder %s8244_s22, %s11629_s19 }
 0x624   : > { %p8246_p7 = pnand %p8245_p4, %p8380_p5 }
 0x625   : > { %p8251_p11 = por %p8250_p10, %p8249_p9 }
 0x626   : > { %p8247_p8 = pneg %p8246_p7 }
 0x627   : > { %p8253_p13 = por %p8252_p12, %p8251_p11 }
 0x629   : > { %p8254_p0 = pnand %p8253_p13, %p8247_p8 }
 0x62b   : > { %8257 = shalt.err (!%p8254_p0)
}
 0x62c   : > { %s8300_s16 = smov 128   ;;  %s8301_s18 = smov 8  }
 0x62d   : > { %8181 = dma.vmem_to_hbm [thread:$0]  (%p8380_p5), %s11631_s14, 5248, %s11629_s19, %s11637_s28, %s8300_s16, %s8300_s16, %s8301_s18  }
 0x62e PF: > { %p8187_p1 = scmp.ge.s32.totalorder %s8292_s27, 2  ;;  %s5403_s17 = sand.u32 1, %s8280_s24  }
 0x62f   : > { %s5404_s20 = scalar_lea.sflag [#allocation3], %s5403_s17 }
 0x630   : > { %p8184_p2 = pnand %p8187_p1, %p8384_p6 }
 0x632   : > { %8275 = dma.done.wait (!%p8184_p2), %s5404_s20, 5248  }
 0x633   : > { %8277 = vsyncadd (!%p8184_p2), %s5404_s20, 4294962048  ;;  %p17_p3 = scmp.ge.s32.totalorder %s8367_s30, 4   ;;  %s12054_s24 = smov %s8284_s25 }
 0x634   : > { %s12055_s25 = smov %s8288_s26  ;;  %s12056_s26 = smov %s8378_s10 }
 0x635   : > { %s12057_s27 = smov %s8367_s30  ;;  %19 = sbr.rel (!%p17_p3) target bundleno = 3 (0x3), region = 90 }
 0x63c   :  { %5409 = vsyncpa [#allocation3], 1 }
 0x63d   :  { %5411 = vsyncpa [#allocation3 + $0x1], 1 }

</bundles_post_ra>
